<compile_context>
chip_gen: v5e
topology: v5e:2x2
jax: 0.10.0
libtpu: 0.0.40
codegen_flags: <defaults>
</compile_context>

<pallas_src>
import math

import jax
import jax.numpy as jnp
from jax.experimental import pallas as pl
from jax.experimental.pallas import tpu as pltpu


def _make_vrnn_kernel(T, B, X, Z, H, L, lmbd, std_Y, compute_dtype):
    LOG_2PI = math.log(2.0 * math.pi)
    LOG_2PI_E = math.log(2.0 * math.pi * math.e)
    NLL_CONST = math.log(std_Y) + 0.5 * LOG_2PI
    INV_2VAR_Y = 1.0 / (2.0 * std_Y * std_Y)

    n_gru_refs = (4 if Z == 1 else 3) + 3 * (L - 1)

    def sigmoid(v):
        # one EUP push (tanh) instead of exp + reciprocal
        return 0.5 * jnp.tanh(0.5 * v) + 0.5

    def softplus(v):
        # overflow-safe softplus: max(v, 0) + log(1 + exp(-|v|))
        return jnp.maximum(v, 0.0) + jnp.log(1.0 + jnp.exp(-jnp.abs(v)))

    def relu(v):
        return jnp.maximum(v, 0.0)

    def mm(a, b):
        # MXU matmul; operands in compute_dtype (bf16 => single-pass push),
        # accumulation always f32.
        return jnp.dot(a.astype(compute_dtype), b,
                       preferred_element_type=jnp.float32)

    def kernel(*refs):
        (x_ref, eq_ref, ep_ref,
         wx_ref, wh2_ref, b0_ref, whead_ref, bhead_ref) = refs[:8]
        gru_refs = refs[8:8 + n_gru_refs]
        out_ref = refs[8 + n_gru_refs]

        def gru_step(inp, h_layers):
            # nn.GRU (seq_len == 1) on the stacked 2B batch; one MXU push/layer.
            new_h = []
            cur = inp
            idx = 0
            for l in range(L):
                hl = h_layers[l]
                if l == 0 and Z == 1:
                    # K==1 input: x-side gates as a VPU outer product, hidden
                    # gates via a single (H,4H)=[Wh_r|Wh_z|0|Wh_n] matmul.
                    wh_ref, wi_ref, bi_ref, bhn_ref = gru_refs[idx:idx + 4]
                    idx += 4
                    g = mm(hl, wh_ref[...])                       # (2B, 4H)
                    pre = g[:, :3 * H] + cur * wi_ref[...] + bi_ref[...]
                else:
                    # one K-concatenated push: [cur | hl] @ (in+H, 4H)
                    w_ref, bi_ref, bhn_ref = gru_refs[idx:idx + 3]
                    idx += 3
                    lhs = jnp.concatenate([cur, hl], axis=1)      # (2B, in+H)
                    g = mm(lhs, w_ref[...])                       # (2B, 4H)
                    pre = g[:, :3 * H] + bi_ref[...]
                rz = sigmoid(pre[:, :2 * H])                      # fused r|z
                r = rz[:, :H]
                zg = rz[:, H:]
                n = jnp.tanh(pre[:, 2 * H:] + r * (g[:, 3 * H:] + bhn_ref[...]))
                hn = (1.0 - zg) * n + zg * hl
                new_h.append(hn)
                cur = hn
            return tuple(new_h)

        def body(t, carry):
            h, kld_acc, nll_acc, ent_acc = carry
            x2_t = x_ref[t]          # (2B, X); rows [:B] == rows [B:]
            eq_t = eq_ref[t]         # (B, Z)
            ep_t = ep_ref[t]         # (B, Z)

            # rows [:B] = kld/nll rollout, rows [B:] = prior-entropy rollout
            h_last = h[L - 1]        # (2B, H)

            # fused enc-hidden / prior projection: one (2B,H)@(H,2H) push
            hp = mm(h_last, wh2_ref[...])            # lanes [:H]=enc, [H:]=pr
            if X == 1:
                xc = x2_t * wx_ref[...]              # (2B,1)*(1,2H) VPU outer product
            else:
                xc = mm(x2_t, wx_ref[...])           # zero-padded (X,2H) weight
            ep_act = relu(hp + xc + b0_ref[...])     # (2B, 2H)

            # fused block-diagonal heads (enc[1]/pr[1] folded in): one push
            head = mm(ep_act, whead_ref[...]) + bhead_ref[...]   # (2B, 4Z)
            stds = softplus(head[:, 2 * Z:])                     # [:, :Z]=q, [:, Z:]=pr
            logs = jnp.log(stds)

            q_mean = head[:B, :Z]
            q_std = stds[:B, :Z]
            log_q_std = logs[:B, :Z]
            pr_mean = head[:, Z:2 * Z]
            pr_std = stds[:, Z:]
            log_pr_std = logs[:, Z:]

            # kld term (constants hoisted; exact divide for the 1/(2σ²) factor)
            kld_acc = kld_acc + (log_pr_std[:B] - log_q_std
                                 + (q_std * q_std + (q_mean - pr_mean[:B]) ** 2)
                                 / (2.0 * pr_std[:B] * pr_std[:B]))

            # sample z, nll term.  p_dec: p_mean_t = z_t, p_std_t = std_Y (the
            # dec MLP output is computed-but-unused in the reference forward).
            z_t = eq_t * q_std + q_mean
            nll_acc = nll_acc + (x2_t[:B, :] - z_t) ** 2

            # entropy rollout (rows [B:])
            z2_t = ep_t * pr_std[B:] + pr_mean[B:]
            ent_acc = ent_acc + log_pr_std[B:]

            # one fused GRU step advances both rollouts
            h = gru_step(jnp.concatenate([z_t, z2_t], axis=0), h)
            return (h, kld_acc, nll_acc, ent_acc)

        h0 = tuple(jnp.zeros((2 * B, H), jnp.float32) for _ in range(L))
        init = (h0,
                jnp.zeros((B, Z), jnp.float32),
                jnp.zeros((B, X), jnp.float32),
                jnp.zeros((B, Z), jnp.float32))
        # full unroll only for tiny T; fixed partial unroll otherwise (no spills)
        unroll = T if T <= 8 else (4 if T % 4 == 0 else (2 if T % 2 == 0 else 1))
        _, kld_acc, nll_acc, ent_acc = jax.lax.fori_loop(
            0, T, body, init, unroll=unroll)

        # single cross-lane reduction per loss, once, after the loop
        kld = jnp.sum(kld_acc, keepdims=True) * (1.0 / (B * Z)) - 0.5 * T
        nll = jnp.sum(nll_acc, keepdims=True) * (INV_2VAR_Y / (B * X)) + T * NLL_CONST
        ent = lmbd * (jnp.sum(ent_acc, keepdims=True) * (1.0 / (B * Z))
                      + T * 0.5 * LOG_2PI_E)

        # single lane-dense (1,128) store: lanes {0,1,2} = {kld, nll, ent}
        lane = jax.lax.broadcasted_iota(jnp.int32, (1, 128), 1)
        out_ref[...] = jnp.where(lane == 0, kld,
                                 jnp.where(lane == 1, nll,
                                           jnp.where(lane == 2, ent, 0.0)))

    return kernel


def init_params(key, x_dim, z_dim, h_dim, n_layers):
    """Deterministic init mirroring VRNN.__init__: all params ~ N(0, 0.1),
    except enc_std[0].bias / pr_std[0].bias = log(exp(0.1) - 1)."""
    n_keys = 32 + 16 * n_layers
    keys = iter(jax.random.split(key, n_keys))

    def normal(shape):
        return 0.1 * jax.random.normal(next(keys), shape, dtype=jnp.float32)

    bias_init = math.log(math.exp(0.1) - 1.0)

    p = {}
    # enc: Linear(h+x, h) -> ReLU -> Linear(h, h)   (cat order is [x_t, h[-1]])
    p["Wenc0_x"] = normal((x_dim, h_dim))
    p["Wenc0_h"] = normal((h_dim, h_dim))
    p["benc0"] = normal((1, h_dim))
    p["Wenc1"] = normal((h_dim, h_dim))
    p["benc1"] = normal((1, h_dim))
    # enc_mean / enc_std
    p["Wqm"] = normal((h_dim, z_dim))
    p["bqm"] = normal((1, z_dim))
    p["Wqs"] = normal((h_dim, z_dim))
    p["bqs"] = jnp.full((1, z_dim), bias_init, dtype=jnp.float32)
    # pr: Linear(h, h) -> ReLU -> Linear(h, h)
    p["Wpr0"] = normal((h_dim, h_dim))
    p["bpr0"] = normal((1, h_dim))
    p["Wpr1"] = normal((h_dim, h_dim))
    p["bpr1"] = normal((1, h_dim))
    # pr_mean / pr_std
    p["Wprm"] = normal((h_dim, z_dim))
    p["bprm"] = normal((1, z_dim))
    p["Wprs"] = normal((h_dim, z_dim))
    p["bprs"] = jnp.full((1, z_dim), bias_init, dtype=jnp.float32)
    # GRU(z_dim, h_dim, n_layers), gate order [r, z, n]
    p["gru"] = []
    for l in range(n_layers):
        in_dim = z_dim if l == 0 else h_dim
        Wir, Wiz, Win = normal((in_dim, h_dim)), normal((in_dim, h_dim)), normal((in_dim, h_dim))
        Whr, Whz, Whn = normal((h_dim, h_dim)), normal((h_dim, h_dim)), normal((h_dim, h_dim))
        bir, biz, bin_ = normal((1, h_dim)), normal((1, h_dim)), normal((1, h_dim))
        bhr, bhz, bhn = normal((1, h_dim)), normal((1, h_dim)), normal((1, h_dim))
        p["gru"].append((Wir, Wiz, Win, Whr, Whz, Whn,
                         bir + bhr, biz + bhz, bin_, bhn))
    return p


def vrnn_forward(x, eps_q, eps_pr, params, *, z_dim, h_dim, n_layers, lmbd, std_Y,
                 mxu_bf16=True):
    T, B, x_dim = x.shape
    Z, H, L = z_dim, h_dim, n_layers
    f32 = jnp.float32
    cd = jnp.bfloat16 if mxu_bf16 else f32   # MXU operand dtype; accum stays f32

    # ---- offline folding / packing (host side, once) ----
    # Fold enc[1] / pr[1] through the mean/std heads (valid: enc/pr end with a
    # Linear, no trailing activation -> identical up to fp reassociation).
    Wqm_f = params["Wenc1"] @ params["Wqm"]
    bqm_f = params["benc1"] @ params["Wqm"] + params["bqm"]
    Wqs_f = params["Wenc1"] @ params["Wqs"]
    bqs_f = params["benc1"] @ params["Wqs"] + params["bqs"]
    Wpm_f = params["Wpr1"] @ params["Wprm"]
    bpm_f = params["bpr1"] @ params["Wprm"] + params["bprm"]
    Wps_f = params["Wpr1"] @ params["Wprs"]
    bps_f = params["bpr1"] @ params["Wprs"] + params["bprs"]

    # block-diagonal fused heads: columns [q_mean | pr_mean | q_std | pr_std]
    zHZ = jnp.zeros((H, Z), f32)
    W_head = jnp.concatenate([
        jnp.concatenate([Wqm_f, zHZ, Wqs_f, zHZ], axis=1),   # rows 0:H  (enc part)
        jnp.concatenate([zHZ, Wpm_f, zHZ, Wps_f], axis=1),   # rows H:2H (pr part)
    ], axis=0)                                               # (2H, 4Z)
    b_head = jnp.concatenate([bqm_f, bpm_f, bqs_f, bps_f], axis=1)   # (1, 4Z)

    # fused h[-1] projection [enc | pr] and zero-padded x weight
    W_x = jnp.concatenate([params["Wenc0_x"], jnp.zeros((x_dim, H), f32)], axis=1)  # (X, 2H)
    W_h2 = jnp.concatenate([params["Wenc0_h"], params["Wpr0"]], axis=1)             # (H, 2H)
    b_0 = jnp.concatenate([params["benc0"], params["bpr0"]], axis=1)                # (1, 2H)

    def bc(b, rows):  # pre-broadcast biases once (JAX won't CSE broadcasts)
        return jnp.broadcast_to(b, (rows,) + b.shape[1:]).astype(f32)

    weights = [
        W_x if x_dim == 1 else W_x.astype(cd),   # VPU path keeps f32 when X==1
        W_h2.astype(cd), bc(b_0, 2 * B),
        W_head.astype(cd), bc(b_head, 2 * B),
    ]
    for l in range(L):
        Wir, Wiz, Win, Whr, Whz, Whn, brz_r, brz_z, bin_, bhn = params["gru"][l]
        in_dim = Z if l == 0 else H
        Wh4 = jnp.concatenate([Whr, Whz, jnp.zeros((H, H), f32), Whn], axis=1)   # (H, 4H)
        bi3 = jnp.concatenate([brz_r, brz_z, bin_], axis=1)                      # (1, 3H)
        if l == 0 and Z == 1:
            wi3 = jnp.concatenate([Wir, Wiz, Win], axis=1)                       # (1, 3H) f32 (VPU)
            weights.extend([Wh4.astype(cd), wi3, bc(bi3, 2 * B), bc(bhn, 2 * B)])
        else:
            Wi4 = jnp.concatenate([Wir, Wiz, Win, jnp.zeros((in_dim, H), f32)], axis=1)
            Wcat = jnp.concatenate([Wi4, Wh4], axis=0)                           # (in+H, 4H)
            weights.extend([Wcat.astype(cd), bc(bi3, 2 * B), bc(bhn, 2 * B)])

    # stack x to 2B rows (rows [B:] only feed the unused enc path of rollout 2)
    x2 = jnp.concatenate([x, x], axis=1)   # (T, 2B, X)

    kernel = _make_vrnn_kernel(T, B, x_dim, Z, H, L, float(lmbd), float(std_Y), cd)

    n_in = 3 + len(weights)
    vmem = pltpu.MemorySpace.VMEM
    # Note: at these shapes everything (few hundred KB) is VMEM-resident on all
    # generations; if T*B ever grows large, stream x/eps through a time-chunked
    # grid (BlockSpec over T, "arbitrary" semantics, h + accumulators in
    # scratch) and size the chunk against v7x's smaller VMEM.
    out = pl.pallas_call(
        kernel,
        out_shape=jax.ShapeDtypeStruct((1, 128), jnp.float32),
        in_specs=[pl.BlockSpec(memory_space=vmem)] * n_in,
        out_specs=pl.BlockSpec(memory_space=vmem),
    )(x2, eps_q, eps_pr, *weights)

    return {
        "kld_loss": out[0, 0],
        "nll_loss": out[0, 1],
        "ent_loss": out[0, 2],
    }


if __name__ == "__main__":
    # Small shapes consistent with the module's forward (x: T x B x D, D == 1
    # as implied by the per-step .item() calls in the reference code).
    T, B = 8, 8
    x_dim, z_dim, h_dim, n_layers = 1, 1, 32, 2
    lmbd, std_Y = 0.5, 0.1

    key = jax.random.PRNGKey(0)
    kp, kx, keq, kep = jax.random.split(key, 4)

    params = init_params(kp, x_dim, z_dim, h_dim, n_layers)
    x = jax.random.normal(kx, (T, B, x_dim), dtype=jnp.float32)
    # torch.randn_like(...) reparameterization noise, precomputed deterministically
    eps_q = jax.random.normal(keq, (T, B, z_dim), dtype=jnp.float32)
    eps_pr = jax.random.normal(kep, (T, B, z_dim), dtype=jnp.float32)

    out = vrnn_forward(x, eps_q, eps_pr, params,
                       z_dim=z_dim, h_dim=h_dim, n_layers=n_layers,
                       lmbd=lmbd, std_Y=std_Y)
    jax.block_until_ready(out)
    assert all(bool(jnp.isfinite(v)) for v in out.values())
    print("KERNEL_OK")
</pallas_src>

<mosaic_0001>
module attributes {stable_mosaic.version = 11 : i64} {
  func.func @kernel(%arg0: memref<8x16x1xf32, #tpu.memory_space<vmem>>, %arg1: memref<8x8x1xf32, #tpu.memory_space<vmem>>, %arg2: memref<8x8x1xf32, #tpu.memory_space<vmem>>, %arg3: memref<1x64xf32, #tpu.memory_space<vmem>>, %arg4: memref<32x64xbf16, #tpu.memory_space<vmem>>, %arg5: memref<16x64xf32, #tpu.memory_space<vmem>>, %arg6: memref<64x4xbf16, #tpu.memory_space<vmem>>, %arg7: memref<16x4xf32, #tpu.memory_space<vmem>>, %arg8: memref<32x128xbf16, #tpu.memory_space<vmem>>, %arg9: memref<1x96xf32, #tpu.memory_space<vmem>>, %arg10: memref<16x96xf32, #tpu.memory_space<vmem>>, %arg11: memref<16x32xf32, #tpu.memory_space<vmem>>, %arg12: memref<64x128xbf16, #tpu.memory_space<vmem>>, %arg13: memref<16x96xf32, #tpu.memory_space<vmem>>, %arg14: memref<16x32xf32, #tpu.memory_space<vmem>>, %arg15: memref<1x128xf32, #tpu.memory_space<vmem>>) attributes {dimension_semantics = [], scalar_prefetch = 0 : i64, scratch_operands = 0 : i64, tpu.core_type = #tpu.core_type<tc>} {
    %cst = arith.constant 0.000000e+00 : f32
    %0 = vector.broadcast %cst : f32 to vector<16x32xf32>
    %cst_0 = arith.constant 0.000000e+00 : f32
    %1 = vector.broadcast %cst_0 : f32 to vector<16x32xf32>
    %cst_1 = arith.constant 0.000000e+00 : f32
    %2 = vector.broadcast %cst_1 : f32 to vector<8x1xf32>
    %cst_2 = arith.constant 0.000000e+00 : f32
    %3 = vector.broadcast %cst_2 : f32 to vector<8x1xf32>
    %cst_3 = arith.constant 0.000000e+00 : f32
    %4 = vector.broadcast %cst_3 : f32 to vector<8x1xf32>
    %c0_i32 = arith.constant 0 : i32
    %5 = arith.index_cast %c0_i32 : i32 to index
    %c0 = arith.constant 0 : index
    %c0_4 = arith.constant 0 : index
    %6 = vector.load %arg0[%5, %c0, %c0_4] : memref<8x16x1xf32, #tpu.memory_space<vmem>>, vector<1x16x1xf32>
    %7 = vector.shape_cast %6 : vector<1x16x1xf32> to vector<16x1xf32>
    %8 = arith.index_cast %c0_i32 : i32 to index
    %c0_5 = arith.constant 0 : index
    %c0_6 = arith.constant 0 : index
    %9 = vector.load %arg1[%8, %c0_5, %c0_6] : memref<8x8x1xf32, #tpu.memory_space<vmem>>, vector<1x8x1xf32>
    %10 = vector.shape_cast %9 : vector<1x8x1xf32> to vector<8x1xf32>
    %11 = arith.index_cast %c0_i32 : i32 to index
    %c0_7 = arith.constant 0 : index
    %c0_8 = arith.constant 0 : index
    %12 = vector.load %arg2[%11, %c0_7, %c0_8] : memref<8x8x1xf32, #tpu.memory_space<vmem>>, vector<1x8x1xf32>
    %13 = vector.shape_cast %12 : vector<1x8x1xf32> to vector<8x1xf32>
    %c0_9 = arith.constant 0 : index
    %c0_10 = arith.constant 0 : index
    %14 = vector.load %arg4[%c0_9, %c0_10] : memref<32x64xbf16, #tpu.memory_space<vmem>>, vector<32x64xbf16>
    %15 = arith.truncf %1 : vector<16x32xf32> to vector<16x32xbf16>
    %cst_11 = arith.constant dense<0.000000e+00> : vector<16x64xf32>
    %16 = tpu.matmul %15, %14, %cst_11 {dimension_numbers = #tpu.dot_dimension_numbers<[1], [0], [0], [1], [0, 0, 1, 1], [], []>} : vector<16x32xbf16>, vector<32x64xbf16>, vector<16x64xf32> -> vector<16x64xf32>
    %c0_12 = arith.constant 0 : index
    %c0_13 = arith.constant 0 : index
    %17 = vector.load %arg3[%c0_12, %c0_13] : memref<1x64xf32, #tpu.memory_space<vmem>>, vector<1x64xf32>
    %18 = vector.broadcast %7 : vector<16x1xf32> to vector<16x64xf32>
    %19 = vector.broadcast %17 : vector<1x64xf32> to vector<16x64xf32>
    %20 = arith.mulf %18, %19 : vector<16x64xf32>
    %21 = arith.addf %16, %20 : vector<16x64xf32>
    %c0_14 = arith.constant 0 : index
    %c0_15 = arith.constant 0 : index
    %22 = vector.load %arg5[%c0_14, %c0_15] : memref<16x64xf32, #tpu.memory_space<vmem>>, vector<16x64xf32>
    %23 = arith.addf %21, %22 : vector<16x64xf32>
    %cst_16 = arith.constant 0.000000e+00 : f32
    %24 = vector.broadcast %cst_16 : f32 to vector<16x64xf32>
    %25 = arith.maximumf %23, %24 : vector<16x64xf32>
    %c0_17 = arith.constant 0 : index
    %c0_18 = arith.constant 0 : index
    %26 = vector.load %arg6[%c0_17, %c0_18] : memref<64x4xbf16, #tpu.memory_space<vmem>>, vector<64x4xbf16>
    %27 = arith.truncf %25 : vector<16x64xf32> to vector<16x64xbf16>
    %cst_19 = arith.constant dense<0.000000e+00> : vector<16x4xf32>
    %28 = tpu.matmul %27, %26, %cst_19 {dimension_numbers = #tpu.dot_dimension_numbers<[1], [0], [0], [1], [0, 0, 1, 1], [], []>} : vector<16x64xbf16>, vector<64x4xbf16>, vector<16x4xf32> -> vector<16x4xf32>
    %c0_20 = arith.constant 0 : index
    %c0_21 = arith.constant 0 : index
    %29 = vector.load %arg7[%c0_20, %c0_21] : memref<16x4xf32, #tpu.memory_space<vmem>>, vector<16x4xf32>
    %30 = arith.addf %28, %29 : vector<16x4xf32>
    %31 = vector.extract_strided_slice %30 {offsets = [0, 2], sizes = [16, 2], strides = [1, 1]} : vector<16x4xf32> to vector<16x2xf32>
    %cst_22 = arith.constant 0.000000e+00 : f32
    %32 = vector.broadcast %cst_22 : f32 to vector<16x2xf32>
    %33 = arith.maximumf %31, %32 : vector<16x2xf32>
    %34 = math.absf %31 : vector<16x2xf32>
    %cst_23 = arith.constant 0.000000e+00 : f32
    %35 = vector.broadcast %cst_23 : f32 to vector<16x2xf32>
    %36 = arith.subf %35, %34 : vector<16x2xf32>
    %37 = math.exp %36 : vector<16x2xf32>
    %cst_24 = arith.constant 1.000000e+00 : f32
    %38 = vector.broadcast %cst_24 : f32 to vector<16x2xf32>
    %39 = arith.addf %38, %37 : vector<16x2xf32>
    %40 = math.log %39 : vector<16x2xf32>
    %41 = arith.addf %33, %40 : vector<16x2xf32>
    %42 = math.log %41 : vector<16x2xf32>
    %43 = vector.extract_strided_slice %30 {offsets = [0, 0], sizes = [8, 1], strides = [1, 1]} : vector<16x4xf32> to vector<8x1xf32>
    %44 = vector.extract_strided_slice %41 {offsets = [0, 0], sizes = [8, 1], strides = [1, 1]} : vector<16x2xf32> to vector<8x1xf32>
    %45 = vector.extract_strided_slice %42 {offsets = [0, 0], sizes = [8, 1], strides = [1, 1]} : vector<16x2xf32> to vector<8x1xf32>
    %46 = vector.extract_strided_slice %30 {offsets = [0, 1], sizes = [16, 1], strides = [1, 1]} : vector<16x4xf32> to vector<16x1xf32>
    %47 = vector.extract_strided_slice %41 {offsets = [0, 1], sizes = [16, 1], strides = [1, 1]} : vector<16x2xf32> to vector<16x1xf32>
    %48 = vector.extract_strided_slice %42 {offsets = [0, 1], sizes = [16, 1], strides = [1, 1]} : vector<16x2xf32> to vector<16x1xf32>
    %49 = vector.extract_strided_slice %48 {offsets = [0, 0], sizes = [8, 1], strides = [1, 1]} : vector<16x1xf32> to vector<8x1xf32>
    %50 = arith.subf %49, %45 : vector<8x1xf32>
    %51 = arith.mulf %44, %44 : vector<8x1xf32>
    %52 = vector.extract_strided_slice %46 {offsets = [0, 0], sizes = [8, 1], strides = [1, 1]} : vector<16x1xf32> to vector<8x1xf32>
    %53 = arith.subf %43, %52 : vector<8x1xf32>
    %54 = arith.mulf %53, %53 : vector<8x1xf32>
    %55 = arith.addf %51, %54 : vector<8x1xf32>
    %56 = vector.extract_strided_slice %47 {offsets = [0, 0], sizes = [8, 1], strides = [1, 1]} : vector<16x1xf32> to vector<8x1xf32>
    %cst_25 = arith.constant 2.000000e+00 : f32
    %57 = vector.broadcast %cst_25 : f32 to vector<8x1xf32>
    %58 = arith.mulf %57, %56 : vector<8x1xf32>
    %59 = vector.extract_strided_slice %47 {offsets = [0, 0], sizes = [8, 1], strides = [1, 1]} : vector<16x1xf32> to vector<8x1xf32>
    %60 = arith.mulf %58, %59 : vector<8x1xf32>
    %61 = arith.divf %55, %60 : vector<8x1xf32>
    %62 = arith.addf %50, %61 : vector<8x1xf32>
    %63 = arith.addf %2, %62 : vector<8x1xf32>
    %64 = arith.mulf %10, %44 : vector<8x1xf32>
    %65 = arith.addf %64, %43 : vector<8x1xf32>
    %66 = vector.extract_strided_slice %7 {offsets = [0, 0], sizes = [8, 1], strides = [1, 1]} : vector<16x1xf32> to vector<8x1xf32>
    %67 = arith.subf %66, %65 : vector<8x1xf32>
    %68 = arith.mulf %67, %67 : vector<8x1xf32>
    %69 = arith.addf %3, %68 : vector<8x1xf32>
    %70 = vector.extract_strided_slice %47 {offsets = [8, 0], sizes = [8, 1], strides = [1, 1]} : vector<16x1xf32> to vector<8x1xf32>
    %71 = arith.mulf %13, %70 : vector<8x1xf32>
    %72 = vector.extract_strided_slice %46 {offsets = [8, 0], sizes = [8, 1], strides = [1, 1]} : vector<16x1xf32> to vector<8x1xf32>
    %73 = arith.addf %71, %72 : vector<8x1xf32>
    %74 = vector.extract_strided_slice %48 {offsets = [8, 0], sizes = [8, 1], strides = [1, 1]} : vector<16x1xf32> to vector<8x1xf32>
    %75 = arith.addf %4, %74 : vector<8x1xf32>
    %76 = tpu.concatenate %65, %73 in 0 : vector<8x1xf32>, vector<8x1xf32> -> vector<16x1xf32>
    %c0_26 = arith.constant 0 : index
    %c0_27 = arith.constant 0 : index
    %77 = vector.load %arg8[%c0_26, %c0_27] : memref<32x128xbf16, #tpu.memory_space<vmem>>, vector<32x128xbf16>
    %78 = arith.truncf %0 : vector<16x32xf32> to vector<16x32xbf16>
    %cst_28 = arith.constant dense<0.000000e+00> : vector<16x128xf32>
    %79 = tpu.matmul %78, %77, %cst_28 {dimension_numbers = #tpu.dot_dimension_numbers<[1], [0], [0], [1], [0, 0, 1, 1], [], []>} : vector<16x32xbf16>, vector<32x128xbf16>, vector<16x128xf32> -> vector<16x128xf32>
    %80 = vector.extract_strided_slice %79 {offsets = [0, 0], sizes = [16, 96], strides = [1, 1]} : vector<16x128xf32> to vector<16x96xf32>
    %c0_29 = arith.constant 0 : index
    %c0_30 = arith.constant 0 : index
    %81 = vector.load %arg9[%c0_29, %c0_30] : memref<1x96xf32, #tpu.memory_space<vmem>>, vector<1x96xf32>
    %82 = vector.broadcast %76 : vector<16x1xf32> to vector<16x96xf32>
    %83 = vector.broadcast %81 : vector<1x96xf32> to vector<16x96xf32>
    %84 = arith.mulf %82, %83 : vector<16x96xf32>
    %85 = arith.addf %80, %84 : vector<16x96xf32>
    %c0_31 = arith.constant 0 : index
    %c0_32 = arith.constant 0 : index
    %86 = vector.load %arg10[%c0_31, %c0_32] : memref<16x96xf32, #tpu.memory_space<vmem>>, vector<16x96xf32>
    %87 = arith.addf %85, %86 : vector<16x96xf32>
    %88 = vector.extract_strided_slice %87 {offsets = [0, 0], sizes = [16, 64], strides = [1, 1]} : vector<16x96xf32> to vector<16x64xf32>
    %cst_33 = arith.constant 5.000000e-01 : f32
    %89 = vector.broadcast %cst_33 : f32 to vector<16x64xf32>
    %90 = arith.mulf %89, %88 : vector<16x64xf32>
    %91 = math.tanh %90 : vector<16x64xf32>
    %cst_34 = arith.constant 5.000000e-01 : f32
    %92 = vector.broadcast %cst_34 : f32 to vector<16x64xf32>
    %93 = arith.mulf %92, %91 : vector<16x64xf32>
    %cst_35 = arith.constant 5.000000e-01 : f32
    %94 = vector.broadcast %cst_35 : f32 to vector<16x64xf32>
    %95 = arith.addf %93, %94 : vector<16x64xf32>
    %96 = vector.extract_strided_slice %95 {offsets = [0, 0], sizes = [16, 32], strides = [1, 1]} : vector<16x64xf32> to vector<16x32xf32>
    %97 = vector.extract_strided_slice %95 {offsets = [0, 32], sizes = [16, 32], strides = [1, 1]} : vector<16x64xf32> to vector<16x32xf32>
    %98 = vector.extract_strided_slice %87 {offsets = [0, 64], sizes = [16, 32], strides = [1, 1]} : vector<16x96xf32> to vector<16x32xf32>
    %99 = vector.extract_strided_slice %79 {offsets = [0, 96], sizes = [16, 32], strides = [1, 1]} : vector<16x128xf32> to vector<16x32xf32>
    %c0_36 = arith.constant 0 : index
    %c0_37 = arith.constant 0 : index
    %100 = vector.load %arg11[%c0_36, %c0_37] : memref<16x32xf32, #tpu.memory_space<vmem>>, vector<16x32xf32>
    %101 = arith.addf %99, %100 : vector<16x32xf32>
    %102 = arith.mulf %96, %101 : vector<16x32xf32>
    %103 = arith.addf %98, %102 : vector<16x32xf32>
    %104 = math.tanh %103 : vector<16x32xf32>
    %cst_38 = arith.constant 1.000000e+00 : f32
    %105 = vector.broadcast %cst_38 : f32 to vector<16x32xf32>
    %106 = arith.subf %105, %97 : vector<16x32xf32>
    %107 = arith.mulf %106, %104 : vector<16x32xf32>
    %108 = arith.mulf %97, %0 : vector<16x32xf32>
    %109 = arith.addf %107, %108 : vector<16x32xf32>
    %110 = tpu.concatenate %109, %1 in 1 : vector<16x32xf32>, vector<16x32xf32> -> vector<16x64xf32>
    %c0_39 = arith.constant 0 : index
    %c0_40 = arith.constant 0 : index
    %111 = vector.load %arg12[%c0_39, %c0_40] : memref<64x128xbf16, #tpu.memory_space<vmem>>, vector<64x128xbf16>
    %112 = arith.truncf %110 : vector<16x64xf32> to vector<16x64xbf16>
    %cst_41 = arith.constant dense<0.000000e+00> : vector<16x128xf32>
    %113 = tpu.matmul %112, %111, %cst_41 {dimension_numbers = #tpu.dot_dimension_numbers<[1], [0], [0], [1], [0, 0, 1, 1], [], []>} : vector<16x64xbf16>, vector<64x128xbf16>, vector<16x128xf32> -> vector<16x128xf32>
    %114 = vector.extract_strided_slice %113 {offsets = [0, 0], sizes = [16, 96], strides = [1, 1]} : vector<16x128xf32> to vector<16x96xf32>
    %c0_42 = arith.constant 0 : index
    %c0_43 = arith.constant 0 : index
    %115 = vector.load %arg13[%c0_42, %c0_43] : memref<16x96xf32, #tpu.memory_space<vmem>>, vector<16x96xf32>
    %116 = arith.addf %114, %115 : vector<16x96xf32>
    %117 = vector.extract_strided_slice %116 {offsets = [0, 0], sizes = [16, 64], strides = [1, 1]} : vector<16x96xf32> to vector<16x64xf32>
    %cst_44 = arith.constant 5.000000e-01 : f32
    %118 = vector.broadcast %cst_44 : f32 to vector<16x64xf32>
    %119 = arith.mulf %118, %117 : vector<16x64xf32>
    %120 = math.tanh %119 : vector<16x64xf32>
    %cst_45 = arith.constant 5.000000e-01 : f32
    %121 = vector.broadcast %cst_45 : f32 to vector<16x64xf32>
    %122 = arith.mulf %121, %120 : vector<16x64xf32>
    %cst_46 = arith.constant 5.000000e-01 : f32
    %123 = vector.broadcast %cst_46 : f32 to vector<16x64xf32>
    %124 = arith.addf %122, %123 : vector<16x64xf32>
    %125 = vector.extract_strided_slice %124 {offsets = [0, 0], sizes = [16, 32], strides = [1, 1]} : vector<16x64xf32> to vector<16x32xf32>
    %126 = vector.extract_strided_slice %124 {offsets = [0, 32], sizes = [16, 32], strides = [1, 1]} : vector<16x64xf32> to vector<16x32xf32>
    %127 = vector.extract_strided_slice %116 {offsets = [0, 64], sizes = [16, 32], strides = [1, 1]} : vector<16x96xf32> to vector<16x32xf32>
    %128 = vector.extract_strided_slice %113 {offsets = [0, 96], sizes = [16, 32], strides = [1, 1]} : vector<16x128xf32> to vector<16x32xf32>
    %c0_47 = arith.constant 0 : index
    %c0_48 = arith.constant 0 : index
    %129 = vector.load %arg14[%c0_47, %c0_48] : memref<16x32xf32, #tpu.memory_space<vmem>>, vector<16x32xf32>
    %130 = arith.addf %128, %129 : vector<16x32xf32>
    %131 = arith.mulf %125, %130 : vector<16x32xf32>
    %132 = arith.addf %127, %131 : vector<16x32xf32>
    %133 = math.tanh %132 : vector<16x32xf32>
    %cst_49 = arith.constant 1.000000e+00 : f32
    %134 = vector.broadcast %cst_49 : f32 to vector<16x32xf32>
    %135 = arith.subf %134, %126 : vector<16x32xf32>
    %136 = arith.mulf %135, %133 : vector<16x32xf32>
    %137 = arith.mulf %126, %1 : vector<16x32xf32>
    %138 = arith.addf %136, %137 : vector<16x32xf32>
    %c1_i32 = arith.constant 1 : i32
    %139 = arith.index_cast %c1_i32 : i32 to index
    %c0_50 = arith.constant 0 : index
    %c0_51 = arith.constant 0 : index
    %140 = vector.load %arg0[%139, %c0_50, %c0_51] : memref<8x16x1xf32, #tpu.memory_space<vmem>>, vector<1x16x1xf32>
    %141 = vector.shape_cast %140 : vector<1x16x1xf32> to vector<16x1xf32>
    %142 = arith.index_cast %c1_i32 : i32 to index
    %c0_52 = arith.constant 0 : index
    %c0_53 = arith.constant 0 : index
    %143 = vector.load %arg1[%142, %c0_52, %c0_53] : memref<8x8x1xf32, #tpu.memory_space<vmem>>, vector<1x8x1xf32>
    %144 = vector.shape_cast %143 : vector<1x8x1xf32> to vector<8x1xf32>
    %145 = arith.index_cast %c1_i32 : i32 to index
    %c0_54 = arith.constant 0 : index
    %c0_55 = arith.constant 0 : index
    %146 = vector.load %arg2[%145, %c0_54, %c0_55] : memref<8x8x1xf32, #tpu.memory_space<vmem>>, vector<1x8x1xf32>
    %147 = vector.shape_cast %146 : vector<1x8x1xf32> to vector<8x1xf32>
    %c0_56 = arith.constant 0 : index
    %c0_57 = arith.constant 0 : index
    %148 = vector.load %arg4[%c0_56, %c0_57] : memref<32x64xbf16, #tpu.memory_space<vmem>>, vector<32x64xbf16>
    %149 = arith.truncf %138 : vector<16x32xf32> to vector<16x32xbf16>
    %cst_58 = arith.constant dense<0.000000e+00> : vector<16x64xf32>
    %150 = tpu.matmul %149, %148, %cst_58 {dimension_numbers = #tpu.dot_dimension_numbers<[1], [0], [0], [1], [0, 0, 1, 1], [], []>} : vector<16x32xbf16>, vector<32x64xbf16>, vector<16x64xf32> -> vector<16x64xf32>
    %c0_59 = arith.constant 0 : index
    %c0_60 = arith.constant 0 : index
    %151 = vector.load %arg3[%c0_59, %c0_60] : memref<1x64xf32, #tpu.memory_space<vmem>>, vector<1x64xf32>
    %152 = vector.broadcast %141 : vector<16x1xf32> to vector<16x64xf32>
    %153 = vector.broadcast %151 : vector<1x64xf32> to vector<16x64xf32>
    %154 = arith.mulf %152, %153 : vector<16x64xf32>
    %155 = arith.addf %150, %154 : vector<16x64xf32>
    %c0_61 = arith.constant 0 : index
    %c0_62 = arith.constant 0 : index
    %156 = vector.load %arg5[%c0_61, %c0_62] : memref<16x64xf32, #tpu.memory_space<vmem>>, vector<16x64xf32>
    %157 = arith.addf %155, %156 : vector<16x64xf32>
    %cst_63 = arith.constant 0.000000e+00 : f32
    %158 = vector.broadcast %cst_63 : f32 to vector<16x64xf32>
    %159 = arith.maximumf %157, %158 : vector<16x64xf32>
    %c0_64 = arith.constant 0 : index
    %c0_65 = arith.constant 0 : index
    %160 = vector.load %arg6[%c0_64, %c0_65] : memref<64x4xbf16, #tpu.memory_space<vmem>>, vector<64x4xbf16>
    %161 = arith.truncf %159 : vector<16x64xf32> to vector<16x64xbf16>
    %cst_66 = arith.constant dense<0.000000e+00> : vector<16x4xf32>
    %162 = tpu.matmul %161, %160, %cst_66 {dimension_numbers = #tpu.dot_dimension_numbers<[1], [0], [0], [1], [0, 0, 1, 1], [], []>} : vector<16x64xbf16>, vector<64x4xbf16>, vector<16x4xf32> -> vector<16x4xf32>
    %c0_67 = arith.constant 0 : index
    %c0_68 = arith.constant 0 : index
    %163 = vector.load %arg7[%c0_67, %c0_68] : memref<16x4xf32, #tpu.memory_space<vmem>>, vector<16x4xf32>
    %164 = arith.addf %162, %163 : vector<16x4xf32>
    %165 = vector.extract_strided_slice %164 {offsets = [0, 2], sizes = [16, 2], strides = [1, 1]} : vector<16x4xf32> to vector<16x2xf32>
    %cst_69 = arith.constant 0.000000e+00 : f32
    %166 = vector.broadcast %cst_69 : f32 to vector<16x2xf32>
    %167 = arith.maximumf %165, %166 : vector<16x2xf32>
    %168 = math.absf %165 : vector<16x2xf32>
    %cst_70 = arith.constant 0.000000e+00 : f32
    %169 = vector.broadcast %cst_70 : f32 to vector<16x2xf32>
    %170 = arith.subf %169, %168 : vector<16x2xf32>
    %171 = math.exp %170 : vector<16x2xf32>
    %cst_71 = arith.constant 1.000000e+00 : f32
    %172 = vector.broadcast %cst_71 : f32 to vector<16x2xf32>
    %173 = arith.addf %172, %171 : vector<16x2xf32>
    %174 = math.log %173 : vector<16x2xf32>
    %175 = arith.addf %167, %174 : vector<16x2xf32>
    %176 = math.log %175 : vector<16x2xf32>
    %177 = vector.extract_strided_slice %164 {offsets = [0, 0], sizes = [8, 1], strides = [1, 1]} : vector<16x4xf32> to vector<8x1xf32>
    %178 = vector.extract_strided_slice %175 {offsets = [0, 0], sizes = [8, 1], strides = [1, 1]} : vector<16x2xf32> to vector<8x1xf32>
    %179 = vector.extract_strided_slice %176 {offsets = [0, 0], sizes = [8, 1], strides = [1, 1]} : vector<16x2xf32> to vector<8x1xf32>
    %180 = vector.extract_strided_slice %164 {offsets = [0, 1], sizes = [16, 1], strides = [1, 1]} : vector<16x4xf32> to vector<16x1xf32>
    %181 = vector.extract_strided_slice %175 {offsets = [0, 1], sizes = [16, 1], strides = [1, 1]} : vector<16x2xf32> to vector<16x1xf32>
    %182 = vector.extract_strided_slice %176 {offsets = [0, 1], sizes = [16, 1], strides = [1, 1]} : vector<16x2xf32> to vector<16x1xf32>
    %183 = vector.extract_strided_slice %182 {offsets = [0, 0], sizes = [8, 1], strides = [1, 1]} : vector<16x1xf32> to vector<8x1xf32>
    %184 = arith.subf %183, %179 : vector<8x1xf32>
    %185 = arith.mulf %178, %178 : vector<8x1xf32>
    %186 = vector.extract_strided_slice %180 {offsets = [0, 0], sizes = [8, 1], strides = [1, 1]} : vector<16x1xf32> to vector<8x1xf32>
    %187 = arith.subf %177, %186 : vector<8x1xf32>
    %188 = arith.mulf %187, %187 : vector<8x1xf32>
    %189 = arith.addf %185, %188 : vector<8x1xf32>
    %190 = vector.extract_strided_slice %181 {offsets = [0, 0], sizes = [8, 1], strides = [1, 1]} : vector<16x1xf32> to vector<8x1xf32>
    %cst_72 = arith.constant 2.000000e+00 : f32
    %191 = vector.broadcast %cst_72 : f32 to vector<8x1xf32>
    %192 = arith.mulf %191, %190 : vector<8x1xf32>
    %193 = vector.extract_strided_slice %181 {offsets = [0, 0], sizes = [8, 1], strides = [1, 1]} : vector<16x1xf32> to vector<8x1xf32>
    %194 = arith.mulf %192, %193 : vector<8x1xf32>
    %195 = arith.divf %189, %194 : vector<8x1xf32>
    %196 = arith.addf %184, %195 : vector<8x1xf32>
    %197 = arith.addf %63, %196 : vector<8x1xf32>
    %198 = arith.mulf %144, %178 : vector<8x1xf32>
    %199 = arith.addf %198, %177 : vector<8x1xf32>
    %200 = vector.extract_strided_slice %141 {offsets = [0, 0], sizes = [8, 1], strides = [1, 1]} : vector<16x1xf32> to vector<8x1xf32>
    %201 = arith.subf %200, %199 : vector<8x1xf32>
    %202 = arith.mulf %201, %201 : vector<8x1xf32>
    %203 = arith.addf %69, %202 : vector<8x1xf32>
    %204 = vector.extract_strided_slice %181 {offsets = [8, 0], sizes = [8, 1], strides = [1, 1]} : vector<16x1xf32> to vector<8x1xf32>
    %205 = arith.mulf %147, %204 : vector<8x1xf32>
    %206 = vector.extract_strided_slice %180 {offsets = [8, 0], sizes = [8, 1], strides = [1, 1]} : vector<16x1xf32> to vector<8x1xf32>
    %207 = arith.addf %205, %206 : vector<8x1xf32>
    %208 = vector.extract_strided_slice %182 {offsets = [8, 0], sizes = [8, 1], strides = [1, 1]} : vector<16x1xf32> to vector<8x1xf32>
    %209 = arith.addf %75, %208 : vector<8x1xf32>
    %210 = tpu.concatenate %199, %207 in 0 : vector<8x1xf32>, vector<8x1xf32> -> vector<16x1xf32>
    %c0_73 = arith.constant 0 : index
    %c0_74 = arith.constant 0 : index
    %211 = vector.load %arg8[%c0_73, %c0_74] : memref<32x128xbf16, #tpu.memory_space<vmem>>, vector<32x128xbf16>
    %212 = arith.truncf %109 : vector<16x32xf32> to vector<16x32xbf16>
    %cst_75 = arith.constant dense<0.000000e+00> : vector<16x128xf32>
    %213 = tpu.matmul %212, %211, %cst_75 {dimension_numbers = #tpu.dot_dimension_numbers<[1], [0], [0], [1], [0, 0, 1, 1], [], []>} : vector<16x32xbf16>, vector<32x128xbf16>, vector<16x128xf32> -> vector<16x128xf32>
    %214 = vector.extract_strided_slice %213 {offsets = [0, 0], sizes = [16, 96], strides = [1, 1]} : vector<16x128xf32> to vector<16x96xf32>
    %c0_76 = arith.constant 0 : index
    %c0_77 = arith.constant 0 : index
    %215 = vector.load %arg9[%c0_76, %c0_77] : memref<1x96xf32, #tpu.memory_space<vmem>>, vector<1x96xf32>
    %216 = vector.broadcast %210 : vector<16x1xf32> to vector<16x96xf32>
    %217 = vector.broadcast %215 : vector<1x96xf32> to vector<16x96xf32>
    %218 = arith.mulf %216, %217 : vector<16x96xf32>
    %219 = arith.addf %214, %218 : vector<16x96xf32>
    %c0_78 = arith.constant 0 : index
    %c0_79 = arith.constant 0 : index
    %220 = vector.load %arg10[%c0_78, %c0_79] : memref<16x96xf32, #tpu.memory_space<vmem>>, vector<16x96xf32>
    %221 = arith.addf %219, %220 : vector<16x96xf32>
    %222 = vector.extract_strided_slice %221 {offsets = [0, 0], sizes = [16, 64], strides = [1, 1]} : vector<16x96xf32> to vector<16x64xf32>
    %cst_80 = arith.constant 5.000000e-01 : f32
    %223 = vector.broadcast %cst_80 : f32 to vector<16x64xf32>
    %224 = arith.mulf %223, %222 : vector<16x64xf32>
    %225 = math.tanh %224 : vector<16x64xf32>
    %cst_81 = arith.constant 5.000000e-01 : f32
    %226 = vector.broadcast %cst_81 : f32 to vector<16x64xf32>
    %227 = arith.mulf %226, %225 : vector<16x64xf32>
    %cst_82 = arith.constant 5.000000e-01 : f32
    %228 = vector.broadcast %cst_82 : f32 to vector<16x64xf32>
    %229 = arith.addf %227, %228 : vector<16x64xf32>
    %230 = vector.extract_strided_slice %229 {offsets = [0, 0], sizes = [16, 32], strides = [1, 1]} : vector<16x64xf32> to vector<16x32xf32>
    %231 = vector.extract_strided_slice %229 {offsets = [0, 32], sizes = [16, 32], strides = [1, 1]} : vector<16x64xf32> to vector<16x32xf32>
    %232 = vector.extract_strided_slice %221 {offsets = [0, 64], sizes = [16, 32], strides = [1, 1]} : vector<16x96xf32> to vector<16x32xf32>
    %233 = vector.extract_strided_slice %213 {offsets = [0, 96], sizes = [16, 32], strides = [1, 1]} : vector<16x128xf32> to vector<16x32xf32>
    %c0_83 = arith.constant 0 : index
    %c0_84 = arith.constant 0 : index
    %234 = vector.load %arg11[%c0_83, %c0_84] : memref<16x32xf32, #tpu.memory_space<vmem>>, vector<16x32xf32>
    %235 = arith.addf %233, %234 : vector<16x32xf32>
    %236 = arith.mulf %230, %235 : vector<16x32xf32>
    %237 = arith.addf %232, %236 : vector<16x32xf32>
    %238 = math.tanh %237 : vector<16x32xf32>
    %cst_85 = arith.constant 1.000000e+00 : f32
    %239 = vector.broadcast %cst_85 : f32 to vector<16x32xf32>
    %240 = arith.subf %239, %231 : vector<16x32xf32>
    %241 = arith.mulf %240, %238 : vector<16x32xf32>
    %242 = arith.mulf %231, %109 : vector<16x32xf32>
    %243 = arith.addf %241, %242 : vector<16x32xf32>
    %244 = tpu.concatenate %243, %138 in 1 : vector<16x32xf32>, vector<16x32xf32> -> vector<16x64xf32>
    %c0_86 = arith.constant 0 : index
    %c0_87 = arith.constant 0 : index
    %245 = vector.load %arg12[%c0_86, %c0_87] : memref<64x128xbf16, #tpu.memory_space<vmem>>, vector<64x128xbf16>
    %246 = arith.truncf %244 : vector<16x64xf32> to vector<16x64xbf16>
    %cst_88 = arith.constant dense<0.000000e+00> : vector<16x128xf32>
    %247 = tpu.matmul %246, %245, %cst_88 {dimension_numbers = #tpu.dot_dimension_numbers<[1], [0], [0], [1], [0, 0, 1, 1], [], []>} : vector<16x64xbf16>, vector<64x128xbf16>, vector<16x128xf32> -> vector<16x128xf32>
    %248 = vector.extract_strided_slice %247 {offsets = [0, 0], sizes = [16, 96], strides = [1, 1]} : vector<16x128xf32> to vector<16x96xf32>
    %c0_89 = arith.constant 0 : index
    %c0_90 = arith.constant 0 : index
    %249 = vector.load %arg13[%c0_89, %c0_90] : memref<16x96xf32, #tpu.memory_space<vmem>>, vector<16x96xf32>
    %250 = arith.addf %248, %249 : vector<16x96xf32>
    %251 = vector.extract_strided_slice %250 {offsets = [0, 0], sizes = [16, 64], strides = [1, 1]} : vector<16x96xf32> to vector<16x64xf32>
    %cst_91 = arith.constant 5.000000e-01 : f32
    %252 = vector.broadcast %cst_91 : f32 to vector<16x64xf32>
    %253 = arith.mulf %252, %251 : vector<16x64xf32>
    %254 = math.tanh %253 : vector<16x64xf32>
    %cst_92 = arith.constant 5.000000e-01 : f32
    %255 = vector.broadcast %cst_92 : f32 to vector<16x64xf32>
    %256 = arith.mulf %255, %254 : vector<16x64xf32>
    %cst_93 = arith.constant 5.000000e-01 : f32
    %257 = vector.broadcast %cst_93 : f32 to vector<16x64xf32>
    %258 = arith.addf %256, %257 : vector<16x64xf32>
    %259 = vector.extract_strided_slice %258 {offsets = [0, 0], sizes = [16, 32], strides = [1, 1]} : vector<16x64xf32> to vector<16x32xf32>
    %260 = vector.extract_strided_slice %258 {offsets = [0, 32], sizes = [16, 32], strides = [1, 1]} : vector<16x64xf32> to vector<16x32xf32>
    %261 = vector.extract_strided_slice %250 {offsets = [0, 64], sizes = [16, 32], strides = [1, 1]} : vector<16x96xf32> to vector<16x32xf32>
    %262 = vector.extract_strided_slice %247 {offsets = [0, 96], sizes = [16, 32], strides = [1, 1]} : vector<16x128xf32> to vector<16x32xf32>
    %c0_94 = arith.constant 0 : index
    %c0_95 = arith.constant 0 : index
    %263 = vector.load %arg14[%c0_94, %c0_95] : memref<16x32xf32, #tpu.memory_space<vmem>>, vector<16x32xf32>
    %264 = arith.addf %262, %263 : vector<16x32xf32>
    %265 = arith.mulf %259, %264 : vector<16x32xf32>
    %266 = arith.addf %261, %265 : vector<16x32xf32>
    %267 = math.tanh %266 : vector<16x32xf32>
    %cst_96 = arith.constant 1.000000e+00 : f32
    %268 = vector.broadcast %cst_96 : f32 to vector<16x32xf32>
    %269 = arith.subf %268, %260 : vector<16x32xf32>
    %270 = arith.mulf %269, %267 : vector<16x32xf32>
    %271 = arith.mulf %260, %138 : vector<16x32xf32>
    %272 = arith.addf %270, %271 : vector<16x32xf32>
    %c2_i32 = arith.constant 2 : i32
    %273 = arith.index_cast %c2_i32 : i32 to index
    %c0_97 = arith.constant 0 : index
    %c0_98 = arith.constant 0 : index
    %274 = vector.load %arg0[%273, %c0_97, %c0_98] : memref<8x16x1xf32, #tpu.memory_space<vmem>>, vector<1x16x1xf32>
    %275 = vector.shape_cast %274 : vector<1x16x1xf32> to vector<16x1xf32>
    %276 = arith.index_cast %c2_i32 : i32 to index
    %c0_99 = arith.constant 0 : index
    %c0_100 = arith.constant 0 : index
    %277 = vector.load %arg1[%276, %c0_99, %c0_100] : memref<8x8x1xf32, #tpu.memory_space<vmem>>, vector<1x8x1xf32>
    %278 = vector.shape_cast %277 : vector<1x8x1xf32> to vector<8x1xf32>
    %279 = arith.index_cast %c2_i32 : i32 to index
    %c0_101 = arith.constant 0 : index
    %c0_102 = arith.constant 0 : index
    %280 = vector.load %arg2[%279, %c0_101, %c0_102] : memref<8x8x1xf32, #tpu.memory_space<vmem>>, vector<1x8x1xf32>
    %281 = vector.shape_cast %280 : vector<1x8x1xf32> to vector<8x1xf32>
    %c0_103 = arith.constant 0 : index
    %c0_104 = arith.constant 0 : index
    %282 = vector.load %arg4[%c0_103, %c0_104] : memref<32x64xbf16, #tpu.memory_space<vmem>>, vector<32x64xbf16>
    %283 = arith.truncf %272 : vector<16x32xf32> to vector<16x32xbf16>
    %cst_105 = arith.constant dense<0.000000e+00> : vector<16x64xf32>
    %284 = tpu.matmul %283, %282, %cst_105 {dimension_numbers = #tpu.dot_dimension_numbers<[1], [0], [0], [1], [0, 0, 1, 1], [], []>} : vector<16x32xbf16>, vector<32x64xbf16>, vector<16x64xf32> -> vector<16x64xf32>
    %c0_106 = arith.constant 0 : index
    %c0_107 = arith.constant 0 : index
    %285 = vector.load %arg3[%c0_106, %c0_107] : memref<1x64xf32, #tpu.memory_space<vmem>>, vector<1x64xf32>
    %286 = vector.broadcast %275 : vector<16x1xf32> to vector<16x64xf32>
    %287 = vector.broadcast %285 : vector<1x64xf32> to vector<16x64xf32>
    %288 = arith.mulf %286, %287 : vector<16x64xf32>
    %289 = arith.addf %284, %288 : vector<16x64xf32>
    %c0_108 = arith.constant 0 : index
    %c0_109 = arith.constant 0 : index
    %290 = vector.load %arg5[%c0_108, %c0_109] : memref<16x64xf32, #tpu.memory_space<vmem>>, vector<16x64xf32>
    %291 = arith.addf %289, %290 : vector<16x64xf32>
    %cst_110 = arith.constant 0.000000e+00 : f32
    %292 = vector.broadcast %cst_110 : f32 to vector<16x64xf32>
    %293 = arith.maximumf %291, %292 : vector<16x64xf32>
    %c0_111 = arith.constant 0 : index
    %c0_112 = arith.constant 0 : index
    %294 = vector.load %arg6[%c0_111, %c0_112] : memref<64x4xbf16, #tpu.memory_space<vmem>>, vector<64x4xbf16>
    %295 = arith.truncf %293 : vector<16x64xf32> to vector<16x64xbf16>
    %cst_113 = arith.constant dense<0.000000e+00> : vector<16x4xf32>
    %296 = tpu.matmul %295, %294, %cst_113 {dimension_numbers = #tpu.dot_dimension_numbers<[1], [0], [0], [1], [0, 0, 1, 1], [], []>} : vector<16x64xbf16>, vector<64x4xbf16>, vector<16x4xf32> -> vector<16x4xf32>
    %c0_114 = arith.constant 0 : index
    %c0_115 = arith.constant 0 : index
    %297 = vector.load %arg7[%c0_114, %c0_115] : memref<16x4xf32, #tpu.memory_space<vmem>>, vector<16x4xf32>
    %298 = arith.addf %296, %297 : vector<16x4xf32>
    %299 = vector.extract_strided_slice %298 {offsets = [0, 2], sizes = [16, 2], strides = [1, 1]} : vector<16x4xf32> to vector<16x2xf32>
    %cst_116 = arith.constant 0.000000e+00 : f32
    %300 = vector.broadcast %cst_116 : f32 to vector<16x2xf32>
    %301 = arith.maximumf %299, %300 : vector<16x2xf32>
    %302 = math.absf %299 : vector<16x2xf32>
    %cst_117 = arith.constant 0.000000e+00 : f32
    %303 = vector.broadcast %cst_117 : f32 to vector<16x2xf32>
    %304 = arith.subf %303, %302 : vector<16x2xf32>
    %305 = math.exp %304 : vector<16x2xf32>
    %cst_118 = arith.constant 1.000000e+00 : f32
    %306 = vector.broadcast %cst_118 : f32 to vector<16x2xf32>
    %307 = arith.addf %306, %305 : vector<16x2xf32>
    %308 = math.log %307 : vector<16x2xf32>
    %309 = arith.addf %301, %308 : vector<16x2xf32>
    %310 = math.log %309 : vector<16x2xf32>
    %311 = vector.extract_strided_slice %298 {offsets = [0, 0], sizes = [8, 1], strides = [1, 1]} : vector<16x4xf32> to vector<8x1xf32>
    %312 = vector.extract_strided_slice %309 {offsets = [0, 0], sizes = [8, 1], strides = [1, 1]} : vector<16x2xf32> to vector<8x1xf32>
    %313 = vector.extract_strided_slice %310 {offsets = [0, 0], sizes = [8, 1], strides = [1, 1]} : vector<16x2xf32> to vector<8x1xf32>
    %314 = vector.extract_strided_slice %298 {offsets = [0, 1], sizes = [16, 1], strides = [1, 1]} : vector<16x4xf32> to vector<16x1xf32>
    %315 = vector.extract_strided_slice %309 {offsets = [0, 1], sizes = [16, 1], strides = [1, 1]} : vector<16x2xf32> to vector<16x1xf32>
    %316 = vector.extract_strided_slice %310 {offsets = [0, 1], sizes = [16, 1], strides = [1, 1]} : vector<16x2xf32> to vector<16x1xf32>
    %317 = vector.extract_strided_slice %316 {offsets = [0, 0], sizes = [8, 1], strides = [1, 1]} : vector<16x1xf32> to vector<8x1xf32>
    %318 = arith.subf %317, %313 : vector<8x1xf32>
    %319 = arith.mulf %312, %312 : vector<8x1xf32>
    %320 = vector.extract_strided_slice %314 {offsets = [0, 0], sizes = [8, 1], strides = [1, 1]} : vector<16x1xf32> to vector<8x1xf32>
    %321 = arith.subf %311, %320 : vector<8x1xf32>
    %322 = arith.mulf %321, %321 : vector<8x1xf32>
    %323 = arith.addf %319, %322 : vector<8x1xf32>
    %324 = vector.extract_strided_slice %315 {offsets = [0, 0], sizes = [8, 1], strides = [1, 1]} : vector<16x1xf32> to vector<8x1xf32>
    %cst_119 = arith.constant 2.000000e+00 : f32
    %325 = vector.broadcast %cst_119 : f32 to vector<8x1xf32>
    %326 = arith.mulf %325, %324 : vector<8x1xf32>
    %327 = vector.extract_strided_slice %315 {offsets = [0, 0], sizes = [8, 1], strides = [1, 1]} : vector<16x1xf32> to vector<8x1xf32>
    %328 = arith.mulf %326, %327 : vector<8x1xf32>
    %329 = arith.divf %323, %328 : vector<8x1xf32>
    %330 = arith.addf %318, %329 : vector<8x1xf32>
    %331 = arith.addf %197, %330 : vector<8x1xf32>
    %332 = arith.mulf %278, %312 : vector<8x1xf32>
    %333 = arith.addf %332, %311 : vector<8x1xf32>
    %334 = vector.extract_strided_slice %275 {offsets = [0, 0], sizes = [8, 1], strides = [1, 1]} : vector<16x1xf32> to vector<8x1xf32>
    %335 = arith.subf %334, %333 : vector<8x1xf32>
    %336 = arith.mulf %335, %335 : vector<8x1xf32>
    %337 = arith.addf %203, %336 : vector<8x1xf32>
    %338 = vector.extract_strided_slice %315 {offsets = [8, 0], sizes = [8, 1], strides = [1, 1]} : vector<16x1xf32> to vector<8x1xf32>
    %339 = arith.mulf %281, %338 : vector<8x1xf32>
    %340 = vector.extract_strided_slice %314 {offsets = [8, 0], sizes = [8, 1], strides = [1, 1]} : vector<16x1xf32> to vector<8x1xf32>
    %341 = arith.addf %339, %340 : vector<8x1xf32>
    %342 = vector.extract_strided_slice %316 {offsets = [8, 0], sizes = [8, 1], strides = [1, 1]} : vector<16x1xf32> to vector<8x1xf32>
    %343 = arith.addf %209, %342 : vector<8x1xf32>
    %344 = tpu.concatenate %333, %341 in 0 : vector<8x1xf32>, vector<8x1xf32> -> vector<16x1xf32>
    %c0_120 = arith.constant 0 : index
    %c0_121 = arith.constant 0 : index
    %345 = vector.load %arg8[%c0_120, %c0_121] : memref<32x128xbf16, #tpu.memory_space<vmem>>, vector<32x128xbf16>
    %346 = arith.truncf %243 : vector<16x32xf32> to vector<16x32xbf16>
    %cst_122 = arith.constant dense<0.000000e+00> : vector<16x128xf32>
    %347 = tpu.matmul %346, %345, %cst_122 {dimension_numbers = #tpu.dot_dimension_numbers<[1], [0], [0], [1], [0, 0, 1, 1], [], []>} : vector<16x32xbf16>, vector<32x128xbf16>, vector<16x128xf32> -> vector<16x128xf32>
    %348 = vector.extract_strided_slice %347 {offsets = [0, 0], sizes = [16, 96], strides = [1, 1]} : vector<16x128xf32> to vector<16x96xf32>
    %c0_123 = arith.constant 0 : index
    %c0_124 = arith.constant 0 : index
    %349 = vector.load %arg9[%c0_123, %c0_124] : memref<1x96xf32, #tpu.memory_space<vmem>>, vector<1x96xf32>
    %350 = vector.broadcast %344 : vector<16x1xf32> to vector<16x96xf32>
    %351 = vector.broadcast %349 : vector<1x96xf32> to vector<16x96xf32>
    %352 = arith.mulf %350, %351 : vector<16x96xf32>
    %353 = arith.addf %348, %352 : vector<16x96xf32>
    %c0_125 = arith.constant 0 : index
    %c0_126 = arith.constant 0 : index
    %354 = vector.load %arg10[%c0_125, %c0_126] : memref<16x96xf32, #tpu.memory_space<vmem>>, vector<16x96xf32>
    %355 = arith.addf %353, %354 : vector<16x96xf32>
    %356 = vector.extract_strided_slice %355 {offsets = [0, 0], sizes = [16, 64], strides = [1, 1]} : vector<16x96xf32> to vector<16x64xf32>
    %cst_127 = arith.constant 5.000000e-01 : f32
    %357 = vector.broadcast %cst_127 : f32 to vector<16x64xf32>
    %358 = arith.mulf %357, %356 : vector<16x64xf32>
    %359 = math.tanh %358 : vector<16x64xf32>
    %cst_128 = arith.constant 5.000000e-01 : f32
    %360 = vector.broadcast %cst_128 : f32 to vector<16x64xf32>
    %361 = arith.mulf %360, %359 : vector<16x64xf32>
    %cst_129 = arith.constant 5.000000e-01 : f32
    %362 = vector.broadcast %cst_129 : f32 to vector<16x64xf32>
    %363 = arith.addf %361, %362 : vector<16x64xf32>
    %364 = vector.extract_strided_slice %363 {offsets = [0, 0], sizes = [16, 32], strides = [1, 1]} : vector<16x64xf32> to vector<16x32xf32>
    %365 = vector.extract_strided_slice %363 {offsets = [0, 32], sizes = [16, 32], strides = [1, 1]} : vector<16x64xf32> to vector<16x32xf32>
    %366 = vector.extract_strided_slice %355 {offsets = [0, 64], sizes = [16, 32], strides = [1, 1]} : vector<16x96xf32> to vector<16x32xf32>
    %367 = vector.extract_strided_slice %347 {offsets = [0, 96], sizes = [16, 32], strides = [1, 1]} : vector<16x128xf32> to vector<16x32xf32>
    %c0_130 = arith.constant 0 : index
    %c0_131 = arith.constant 0 : index
    %368 = vector.load %arg11[%c0_130, %c0_131] : memref<16x32xf32, #tpu.memory_space<vmem>>, vector<16x32xf32>
    %369 = arith.addf %367, %368 : vector<16x32xf32>
    %370 = arith.mulf %364, %369 : vector<16x32xf32>
    %371 = arith.addf %366, %370 : vector<16x32xf32>
    %372 = math.tanh %371 : vector<16x32xf32>
    %cst_132 = arith.constant 1.000000e+00 : f32
    %373 = vector.broadcast %cst_132 : f32 to vector<16x32xf32>
    %374 = arith.subf %373, %365 : vector<16x32xf32>
    %375 = arith.mulf %374, %372 : vector<16x32xf32>
    %376 = arith.mulf %365, %243 : vector<16x32xf32>
    %377 = arith.addf %375, %376 : vector<16x32xf32>
    %378 = tpu.concatenate %377, %272 in 1 : vector<16x32xf32>, vector<16x32xf32> -> vector<16x64xf32>
    %c0_133 = arith.constant 0 : index
    %c0_134 = arith.constant 0 : index
    %379 = vector.load %arg12[%c0_133, %c0_134] : memref<64x128xbf16, #tpu.memory_space<vmem>>, vector<64x128xbf16>
    %380 = arith.truncf %378 : vector<16x64xf32> to vector<16x64xbf16>
    %cst_135 = arith.constant dense<0.000000e+00> : vector<16x128xf32>
    %381 = tpu.matmul %380, %379, %cst_135 {dimension_numbers = #tpu.dot_dimension_numbers<[1], [0], [0], [1], [0, 0, 1, 1], [], []>} : vector<16x64xbf16>, vector<64x128xbf16>, vector<16x128xf32> -> vector<16x128xf32>
    %382 = vector.extract_strided_slice %381 {offsets = [0, 0], sizes = [16, 96], strides = [1, 1]} : vector<16x128xf32> to vector<16x96xf32>
    %c0_136 = arith.constant 0 : index
    %c0_137 = arith.constant 0 : index
    %383 = vector.load %arg13[%c0_136, %c0_137] : memref<16x96xf32, #tpu.memory_space<vmem>>, vector<16x96xf32>
    %384 = arith.addf %382, %383 : vector<16x96xf32>
    %385 = vector.extract_strided_slice %384 {offsets = [0, 0], sizes = [16, 64], strides = [1, 1]} : vector<16x96xf32> to vector<16x64xf32>
    %cst_138 = arith.constant 5.000000e-01 : f32
    %386 = vector.broadcast %cst_138 : f32 to vector<16x64xf32>
    %387 = arith.mulf %386, %385 : vector<16x64xf32>
    %388 = math.tanh %387 : vector<16x64xf32>
    %cst_139 = arith.constant 5.000000e-01 : f32
    %389 = vector.broadcast %cst_139 : f32 to vector<16x64xf32>
    %390 = arith.mulf %389, %388 : vector<16x64xf32>
    %cst_140 = arith.constant 5.000000e-01 : f32
    %391 = vector.broadcast %cst_140 : f32 to vector<16x64xf32>
    %392 = arith.addf %390, %391 : vector<16x64xf32>
    %393 = vector.extract_strided_slice %392 {offsets = [0, 0], sizes = [16, 32], strides = [1, 1]} : vector<16x64xf32> to vector<16x32xf32>
    %394 = vector.extract_strided_slice %392 {offsets = [0, 32], sizes = [16, 32], strides = [1, 1]} : vector<16x64xf32> to vector<16x32xf32>
    %395 = vector.extract_strided_slice %384 {offsets = [0, 64], sizes = [16, 32], strides = [1, 1]} : vector<16x96xf32> to vector<16x32xf32>
    %396 = vector.extract_strided_slice %381 {offsets = [0, 96], sizes = [16, 32], strides = [1, 1]} : vector<16x128xf32> to vector<16x32xf32>
    %c0_141 = arith.constant 0 : index
    %c0_142 = arith.constant 0 : index
    %397 = vector.load %arg14[%c0_141, %c0_142] : memref<16x32xf32, #tpu.memory_space<vmem>>, vector<16x32xf32>
    %398 = arith.addf %396, %397 : vector<16x32xf32>
    %399 = arith.mulf %393, %398 : vector<16x32xf32>
    %400 = arith.addf %395, %399 : vector<16x32xf32>
    %401 = math.tanh %400 : vector<16x32xf32>
    %cst_143 = arith.constant 1.000000e+00 : f32
    %402 = vector.broadcast %cst_143 : f32 to vector<16x32xf32>
    %403 = arith.subf %402, %394 : vector<16x32xf32>
    %404 = arith.mulf %403, %401 : vector<16x32xf32>
    %405 = arith.mulf %394, %272 : vector<16x32xf32>
    %406 = arith.addf %404, %405 : vector<16x32xf32>
    %c3_i32 = arith.constant 3 : i32
    %407 = arith.index_cast %c3_i32 : i32 to index
    %c0_144 = arith.constant 0 : index
    %c0_145 = arith.constant 0 : index
    %408 = vector.load %arg0[%407, %c0_144, %c0_145] : memref<8x16x1xf32, #tpu.memory_space<vmem>>, vector<1x16x1xf32>
    %409 = vector.shape_cast %408 : vector<1x16x1xf32> to vector<16x1xf32>
    %410 = arith.index_cast %c3_i32 : i32 to index
    %c0_146 = arith.constant 0 : index
    %c0_147 = arith.constant 0 : index
    %411 = vector.load %arg1[%410, %c0_146, %c0_147] : memref<8x8x1xf32, #tpu.memory_space<vmem>>, vector<1x8x1xf32>
    %412 = vector.shape_cast %411 : vector<1x8x1xf32> to vector<8x1xf32>
    %413 = arith.index_cast %c3_i32 : i32 to index
    %c0_148 = arith.constant 0 : index
    %c0_149 = arith.constant 0 : index
    %414 = vector.load %arg2[%413, %c0_148, %c0_149] : memref<8x8x1xf32, #tpu.memory_space<vmem>>, vector<1x8x1xf32>
    %415 = vector.shape_cast %414 : vector<1x8x1xf32> to vector<8x1xf32>
    %c0_150 = arith.constant 0 : index
    %c0_151 = arith.constant 0 : index
    %416 = vector.load %arg4[%c0_150, %c0_151] : memref<32x64xbf16, #tpu.memory_space<vmem>>, vector<32x64xbf16>
    %417 = arith.truncf %406 : vector<16x32xf32> to vector<16x32xbf16>
    %cst_152 = arith.constant dense<0.000000e+00> : vector<16x64xf32>
    %418 = tpu.matmul %417, %416, %cst_152 {dimension_numbers = #tpu.dot_dimension_numbers<[1], [0], [0], [1], [0, 0, 1, 1], [], []>} : vector<16x32xbf16>, vector<32x64xbf16>, vector<16x64xf32> -> vector<16x64xf32>
    %c0_153 = arith.constant 0 : index
    %c0_154 = arith.constant 0 : index
    %419 = vector.load %arg3[%c0_153, %c0_154] : memref<1x64xf32, #tpu.memory_space<vmem>>, vector<1x64xf32>
    %420 = vector.broadcast %409 : vector<16x1xf32> to vector<16x64xf32>
    %421 = vector.broadcast %419 : vector<1x64xf32> to vector<16x64xf32>
    %422 = arith.mulf %420, %421 : vector<16x64xf32>
    %423 = arith.addf %418, %422 : vector<16x64xf32>
    %c0_155 = arith.constant 0 : index
    %c0_156 = arith.constant 0 : index
    %424 = vector.load %arg5[%c0_155, %c0_156] : memref<16x64xf32, #tpu.memory_space<vmem>>, vector<16x64xf32>
    %425 = arith.addf %423, %424 : vector<16x64xf32>
    %cst_157 = arith.constant 0.000000e+00 : f32
    %426 = vector.broadcast %cst_157 : f32 to vector<16x64xf32>
    %427 = arith.maximumf %425, %426 : vector<16x64xf32>
    %c0_158 = arith.constant 0 : index
    %c0_159 = arith.constant 0 : index
    %428 = vector.load %arg6[%c0_158, %c0_159] : memref<64x4xbf16, #tpu.memory_space<vmem>>, vector<64x4xbf16>
    %429 = arith.truncf %427 : vector<16x64xf32> to vector<16x64xbf16>
    %cst_160 = arith.constant dense<0.000000e+00> : vector<16x4xf32>
    %430 = tpu.matmul %429, %428, %cst_160 {dimension_numbers = #tpu.dot_dimension_numbers<[1], [0], [0], [1], [0, 0, 1, 1], [], []>} : vector<16x64xbf16>, vector<64x4xbf16>, vector<16x4xf32> -> vector<16x4xf32>
    %c0_161 = arith.constant 0 : index
    %c0_162 = arith.constant 0 : index
    %431 = vector.load %arg7[%c0_161, %c0_162] : memref<16x4xf32, #tpu.memory_space<vmem>>, vector<16x4xf32>
    %432 = arith.addf %430, %431 : vector<16x4xf32>
    %433 = vector.extract_strided_slice %432 {offsets = [0, 2], sizes = [16, 2], strides = [1, 1]} : vector<16x4xf32> to vector<16x2xf32>
    %cst_163 = arith.constant 0.000000e+00 : f32
    %434 = vector.broadcast %cst_163 : f32 to vector<16x2xf32>
    %435 = arith.maximumf %433, %434 : vector<16x2xf32>
    %436 = math.absf %433 : vector<16x2xf32>
    %cst_164 = arith.constant 0.000000e+00 : f32
    %437 = vector.broadcast %cst_164 : f32 to vector<16x2xf32>
    %438 = arith.subf %437, %436 : vector<16x2xf32>
    %439 = math.exp %438 : vector<16x2xf32>
    %cst_165 = arith.constant 1.000000e+00 : f32
    %440 = vector.broadcast %cst_165 : f32 to vector<16x2xf32>
    %441 = arith.addf %440, %439 : vector<16x2xf32>
    %442 = math.log %441 : vector<16x2xf32>
    %443 = arith.addf %435, %442 : vector<16x2xf32>
    %444 = math.log %443 : vector<16x2xf32>
    %445 = vector.extract_strided_slice %432 {offsets = [0, 0], sizes = [8, 1], strides = [1, 1]} : vector<16x4xf32> to vector<8x1xf32>
    %446 = vector.extract_strided_slice %443 {offsets = [0, 0], sizes = [8, 1], strides = [1, 1]} : vector<16x2xf32> to vector<8x1xf32>
    %447 = vector.extract_strided_slice %444 {offsets = [0, 0], sizes = [8, 1], strides = [1, 1]} : vector<16x2xf32> to vector<8x1xf32>
    %448 = vector.extract_strided_slice %432 {offsets = [0, 1], sizes = [16, 1], strides = [1, 1]} : vector<16x4xf32> to vector<16x1xf32>
    %449 = vector.extract_strided_slice %443 {offsets = [0, 1], sizes = [16, 1], strides = [1, 1]} : vector<16x2xf32> to vector<16x1xf32>
    %450 = vector.extract_strided_slice %444 {offsets = [0, 1], sizes = [16, 1], strides = [1, 1]} : vector<16x2xf32> to vector<16x1xf32>
    %451 = vector.extract_strided_slice %450 {offsets = [0, 0], sizes = [8, 1], strides = [1, 1]} : vector<16x1xf32> to vector<8x1xf32>
    %452 = arith.subf %451, %447 : vector<8x1xf32>
    %453 = arith.mulf %446, %446 : vector<8x1xf32>
    %454 = vector.extract_strided_slice %448 {offsets = [0, 0], sizes = [8, 1], strides = [1, 1]} : vector<16x1xf32> to vector<8x1xf32>
    %455 = arith.subf %445, %454 : vector<8x1xf32>
    %456 = arith.mulf %455, %455 : vector<8x1xf32>
    %457 = arith.addf %453, %456 : vector<8x1xf32>
    %458 = vector.extract_strided_slice %449 {offsets = [0, 0], sizes = [8, 1], strides = [1, 1]} : vector<16x1xf32> to vector<8x1xf32>
    %cst_166 = arith.constant 2.000000e+00 : f32
    %459 = vector.broadcast %cst_166 : f32 to vector<8x1xf32>
    %460 = arith.mulf %459, %458 : vector<8x1xf32>
    %461 = vector.extract_strided_slice %449 {offsets = [0, 0], sizes = [8, 1], strides = [1, 1]} : vector<16x1xf32> to vector<8x1xf32>
    %462 = arith.mulf %460, %461 : vector<8x1xf32>
    %463 = arith.divf %457, %462 : vector<8x1xf32>
    %464 = arith.addf %452, %463 : vector<8x1xf32>
    %465 = arith.addf %331, %464 : vector<8x1xf32>
    %466 = arith.mulf %412, %446 : vector<8x1xf32>
    %467 = arith.addf %466, %445 : vector<8x1xf32>
    %468 = vector.extract_strided_slice %409 {offsets = [0, 0], sizes = [8, 1], strides = [1, 1]} : vector<16x1xf32> to vector<8x1xf32>
    %469 = arith.subf %468, %467 : vector<8x1xf32>
    %470 = arith.mulf %469, %469 : vector<8x1xf32>
    %471 = arith.addf %337, %470 : vector<8x1xf32>
    %472 = vector.extract_strided_slice %449 {offsets = [8, 0], sizes = [8, 1], strides = [1, 1]} : vector<16x1xf32> to vector<8x1xf32>
    %473 = arith.mulf %415, %472 : vector<8x1xf32>
    %474 = vector.extract_strided_slice %448 {offsets = [8, 0], sizes = [8, 1], strides = [1, 1]} : vector<16x1xf32> to vector<8x1xf32>
    %475 = arith.addf %473, %474 : vector<8x1xf32>
    %476 = vector.extract_strided_slice %450 {offsets = [8, 0], sizes = [8, 1], strides = [1, 1]} : vector<16x1xf32> to vector<8x1xf32>
    %477 = arith.addf %343, %476 : vector<8x1xf32>
    %478 = tpu.concatenate %467, %475 in 0 : vector<8x1xf32>, vector<8x1xf32> -> vector<16x1xf32>
    %c0_167 = arith.constant 0 : index
    %c0_168 = arith.constant 0 : index
    %479 = vector.load %arg8[%c0_167, %c0_168] : memref<32x128xbf16, #tpu.memory_space<vmem>>, vector<32x128xbf16>
    %480 = arith.truncf %377 : vector<16x32xf32> to vector<16x32xbf16>
    %cst_169 = arith.constant dense<0.000000e+00> : vector<16x128xf32>
    %481 = tpu.matmul %480, %479, %cst_169 {dimension_numbers = #tpu.dot_dimension_numbers<[1], [0], [0], [1], [0, 0, 1, 1], [], []>} : vector<16x32xbf16>, vector<32x128xbf16>, vector<16x128xf32> -> vector<16x128xf32>
    %482 = vector.extract_strided_slice %481 {offsets = [0, 0], sizes = [16, 96], strides = [1, 1]} : vector<16x128xf32> to vector<16x96xf32>
    %c0_170 = arith.constant 0 : index
    %c0_171 = arith.constant 0 : index
    %483 = vector.load %arg9[%c0_170, %c0_171] : memref<1x96xf32, #tpu.memory_space<vmem>>, vector<1x96xf32>
    %484 = vector.broadcast %478 : vector<16x1xf32> to vector<16x96xf32>
    %485 = vector.broadcast %483 : vector<1x96xf32> to vector<16x96xf32>
    %486 = arith.mulf %484, %485 : vector<16x96xf32>
    %487 = arith.addf %482, %486 : vector<16x96xf32>
    %c0_172 = arith.constant 0 : index
    %c0_173 = arith.constant 0 : index
    %488 = vector.load %arg10[%c0_172, %c0_173] : memref<16x96xf32, #tpu.memory_space<vmem>>, vector<16x96xf32>
    %489 = arith.addf %487, %488 : vector<16x96xf32>
    %490 = vector.extract_strided_slice %489 {offsets = [0, 0], sizes = [16, 64], strides = [1, 1]} : vector<16x96xf32> to vector<16x64xf32>
    %cst_174 = arith.constant 5.000000e-01 : f32
    %491 = vector.broadcast %cst_174 : f32 to vector<16x64xf32>
    %492 = arith.mulf %491, %490 : vector<16x64xf32>
    %493 = math.tanh %492 : vector<16x64xf32>
    %cst_175 = arith.constant 5.000000e-01 : f32
    %494 = vector.broadcast %cst_175 : f32 to vector<16x64xf32>
    %495 = arith.mulf %494, %493 : vector<16x64xf32>
    %cst_176 = arith.constant 5.000000e-01 : f32
    %496 = vector.broadcast %cst_176 : f32 to vector<16x64xf32>
    %497 = arith.addf %495, %496 : vector<16x64xf32>
    %498 = vector.extract_strided_slice %497 {offsets = [0, 0], sizes = [16, 32], strides = [1, 1]} : vector<16x64xf32> to vector<16x32xf32>
    %499 = vector.extract_strided_slice %497 {offsets = [0, 32], sizes = [16, 32], strides = [1, 1]} : vector<16x64xf32> to vector<16x32xf32>
    %500 = vector.extract_strided_slice %489 {offsets = [0, 64], sizes = [16, 32], strides = [1, 1]} : vector<16x96xf32> to vector<16x32xf32>
    %501 = vector.extract_strided_slice %481 {offsets = [0, 96], sizes = [16, 32], strides = [1, 1]} : vector<16x128xf32> to vector<16x32xf32>
    %c0_177 = arith.constant 0 : index
    %c0_178 = arith.constant 0 : index
    %502 = vector.load %arg11[%c0_177, %c0_178] : memref<16x32xf32, #tpu.memory_space<vmem>>, vector<16x32xf32>
    %503 = arith.addf %501, %502 : vector<16x32xf32>
    %504 = arith.mulf %498, %503 : vector<16x32xf32>
    %505 = arith.addf %500, %504 : vector<16x32xf32>
    %506 = math.tanh %505 : vector<16x32xf32>
    %cst_179 = arith.constant 1.000000e+00 : f32
    %507 = vector.broadcast %cst_179 : f32 to vector<16x32xf32>
    %508 = arith.subf %507, %499 : vector<16x32xf32>
    %509 = arith.mulf %508, %506 : vector<16x32xf32>
    %510 = arith.mulf %499, %377 : vector<16x32xf32>
    %511 = arith.addf %509, %510 : vector<16x32xf32>
    %512 = tpu.concatenate %511, %406 in 1 : vector<16x32xf32>, vector<16x32xf32> -> vector<16x64xf32>
    %c0_180 = arith.constant 0 : index
    %c0_181 = arith.constant 0 : index
    %513 = vector.load %arg12[%c0_180, %c0_181] : memref<64x128xbf16, #tpu.memory_space<vmem>>, vector<64x128xbf16>
    %514 = arith.truncf %512 : vector<16x64xf32> to vector<16x64xbf16>
    %cst_182 = arith.constant dense<0.000000e+00> : vector<16x128xf32>
    %515 = tpu.matmul %514, %513, %cst_182 {dimension_numbers = #tpu.dot_dimension_numbers<[1], [0], [0], [1], [0, 0, 1, 1], [], []>} : vector<16x64xbf16>, vector<64x128xbf16>, vector<16x128xf32> -> vector<16x128xf32>
    %516 = vector.extract_strided_slice %515 {offsets = [0, 0], sizes = [16, 96], strides = [1, 1]} : vector<16x128xf32> to vector<16x96xf32>
    %c0_183 = arith.constant 0 : index
    %c0_184 = arith.constant 0 : index
    %517 = vector.load %arg13[%c0_183, %c0_184] : memref<16x96xf32, #tpu.memory_space<vmem>>, vector<16x96xf32>
    %518 = arith.addf %516, %517 : vector<16x96xf32>
    %519 = vector.extract_strided_slice %518 {offsets = [0, 0], sizes = [16, 64], strides = [1, 1]} : vector<16x96xf32> to vector<16x64xf32>
    %cst_185 = arith.constant 5.000000e-01 : f32
    %520 = vector.broadcast %cst_185 : f32 to vector<16x64xf32>
    %521 = arith.mulf %520, %519 : vector<16x64xf32>
    %522 = math.tanh %521 : vector<16x64xf32>
    %cst_186 = arith.constant 5.000000e-01 : f32
    %523 = vector.broadcast %cst_186 : f32 to vector<16x64xf32>
    %524 = arith.mulf %523, %522 : vector<16x64xf32>
    %cst_187 = arith.constant 5.000000e-01 : f32
    %525 = vector.broadcast %cst_187 : f32 to vector<16x64xf32>
    %526 = arith.addf %524, %525 : vector<16x64xf32>
    %527 = vector.extract_strided_slice %526 {offsets = [0, 0], sizes = [16, 32], strides = [1, 1]} : vector<16x64xf32> to vector<16x32xf32>
    %528 = vector.extract_strided_slice %526 {offsets = [0, 32], sizes = [16, 32], strides = [1, 1]} : vector<16x64xf32> to vector<16x32xf32>
    %529 = vector.extract_strided_slice %518 {offsets = [0, 64], sizes = [16, 32], strides = [1, 1]} : vector<16x96xf32> to vector<16x32xf32>
    %530 = vector.extract_strided_slice %515 {offsets = [0, 96], sizes = [16, 32], strides = [1, 1]} : vector<16x128xf32> to vector<16x32xf32>
    %c0_188 = arith.constant 0 : index
    %c0_189 = arith.constant 0 : index
    %531 = vector.load %arg14[%c0_188, %c0_189] : memref<16x32xf32, #tpu.memory_space<vmem>>, vector<16x32xf32>
    %532 = arith.addf %530, %531 : vector<16x32xf32>
    %533 = arith.mulf %527, %532 : vector<16x32xf32>
    %534 = arith.addf %529, %533 : vector<16x32xf32>
    %535 = math.tanh %534 : vector<16x32xf32>
    %cst_190 = arith.constant 1.000000e+00 : f32
    %536 = vector.broadcast %cst_190 : f32 to vector<16x32xf32>
    %537 = arith.subf %536, %528 : vector<16x32xf32>
    %538 = arith.mulf %537, %535 : vector<16x32xf32>
    %539 = arith.mulf %528, %406 : vector<16x32xf32>
    %540 = arith.addf %538, %539 : vector<16x32xf32>
    %c4_i32 = arith.constant 4 : i32
    %541 = arith.index_cast %c4_i32 : i32 to index
    %c0_191 = arith.constant 0 : index
    %c0_192 = arith.constant 0 : index
    %542 = vector.load %arg0[%541, %c0_191, %c0_192] : memref<8x16x1xf32, #tpu.memory_space<vmem>>, vector<1x16x1xf32>
    %543 = vector.shape_cast %542 : vector<1x16x1xf32> to vector<16x1xf32>
    %544 = arith.index_cast %c4_i32 : i32 to index
    %c0_193 = arith.constant 0 : index
    %c0_194 = arith.constant 0 : index
    %545 = vector.load %arg1[%544, %c0_193, %c0_194] : memref<8x8x1xf32, #tpu.memory_space<vmem>>, vector<1x8x1xf32>
    %546 = vector.shape_cast %545 : vector<1x8x1xf32> to vector<8x1xf32>
    %547 = arith.index_cast %c4_i32 : i32 to index
    %c0_195 = arith.constant 0 : index
    %c0_196 = arith.constant 0 : index
    %548 = vector.load %arg2[%547, %c0_195, %c0_196] : memref<8x8x1xf32, #tpu.memory_space<vmem>>, vector<1x8x1xf32>
    %549 = vector.shape_cast %548 : vector<1x8x1xf32> to vector<8x1xf32>
    %c0_197 = arith.constant 0 : index
    %c0_198 = arith.constant 0 : index
    %550 = vector.load %arg4[%c0_197, %c0_198] : memref<32x64xbf16, #tpu.memory_space<vmem>>, vector<32x64xbf16>
    %551 = arith.truncf %540 : vector<16x32xf32> to vector<16x32xbf16>
    %cst_199 = arith.constant dense<0.000000e+00> : vector<16x64xf32>
    %552 = tpu.matmul %551, %550, %cst_199 {dimension_numbers = #tpu.dot_dimension_numbers<[1], [0], [0], [1], [0, 0, 1, 1], [], []>} : vector<16x32xbf16>, vector<32x64xbf16>, vector<16x64xf32> -> vector<16x64xf32>
    %c0_200 = arith.constant 0 : index
    %c0_201 = arith.constant 0 : index
    %553 = vector.load %arg3[%c0_200, %c0_201] : memref<1x64xf32, #tpu.memory_space<vmem>>, vector<1x64xf32>
    %554 = vector.broadcast %543 : vector<16x1xf32> to vector<16x64xf32>
    %555 = vector.broadcast %553 : vector<1x64xf32> to vector<16x64xf32>
    %556 = arith.mulf %554, %555 : vector<16x64xf32>
    %557 = arith.addf %552, %556 : vector<16x64xf32>
    %c0_202 = arith.constant 0 : index
    %c0_203 = arith.constant 0 : index
    %558 = vector.load %arg5[%c0_202, %c0_203] : memref<16x64xf32, #tpu.memory_space<vmem>>, vector<16x64xf32>
    %559 = arith.addf %557, %558 : vector<16x64xf32>
    %cst_204 = arith.constant 0.000000e+00 : f32
    %560 = vector.broadcast %cst_204 : f32 to vector<16x64xf32>
    %561 = arith.maximumf %559, %560 : vector<16x64xf32>
    %c0_205 = arith.constant 0 : index
    %c0_206 = arith.constant 0 : index
    %562 = vector.load %arg6[%c0_205, %c0_206] : memref<64x4xbf16, #tpu.memory_space<vmem>>, vector<64x4xbf16>
    %563 = arith.truncf %561 : vector<16x64xf32> to vector<16x64xbf16>
    %cst_207 = arith.constant dense<0.000000e+00> : vector<16x4xf32>
    %564 = tpu.matmul %563, %562, %cst_207 {dimension_numbers = #tpu.dot_dimension_numbers<[1], [0], [0], [1], [0, 0, 1, 1], [], []>} : vector<16x64xbf16>, vector<64x4xbf16>, vector<16x4xf32> -> vector<16x4xf32>
    %c0_208 = arith.constant 0 : index
    %c0_209 = arith.constant 0 : index
    %565 = vector.load %arg7[%c0_208, %c0_209] : memref<16x4xf32, #tpu.memory_space<vmem>>, vector<16x4xf32>
    %566 = arith.addf %564, %565 : vector<16x4xf32>
    %567 = vector.extract_strided_slice %566 {offsets = [0, 2], sizes = [16, 2], strides = [1, 1]} : vector<16x4xf32> to vector<16x2xf32>
    %cst_210 = arith.constant 0.000000e+00 : f32
    %568 = vector.broadcast %cst_210 : f32 to vector<16x2xf32>
    %569 = arith.maximumf %567, %568 : vector<16x2xf32>
    %570 = math.absf %567 : vector<16x2xf32>
    %cst_211 = arith.constant 0.000000e+00 : f32
    %571 = vector.broadcast %cst_211 : f32 to vector<16x2xf32>
    %572 = arith.subf %571, %570 : vector<16x2xf32>
    %573 = math.exp %572 : vector<16x2xf32>
    %cst_212 = arith.constant 1.000000e+00 : f32
    %574 = vector.broadcast %cst_212 : f32 to vector<16x2xf32>
    %575 = arith.addf %574, %573 : vector<16x2xf32>
    %576 = math.log %575 : vector<16x2xf32>
    %577 = arith.addf %569, %576 : vector<16x2xf32>
    %578 = math.log %577 : vector<16x2xf32>
    %579 = vector.extract_strided_slice %566 {offsets = [0, 0], sizes = [8, 1], strides = [1, 1]} : vector<16x4xf32> to vector<8x1xf32>
    %580 = vector.extract_strided_slice %577 {offsets = [0, 0], sizes = [8, 1], strides = [1, 1]} : vector<16x2xf32> to vector<8x1xf32>
    %581 = vector.extract_strided_slice %578 {offsets = [0, 0], sizes = [8, 1], strides = [1, 1]} : vector<16x2xf32> to vector<8x1xf32>
    %582 = vector.extract_strided_slice %566 {offsets = [0, 1], sizes = [16, 1], strides = [1, 1]} : vector<16x4xf32> to vector<16x1xf32>
    %583 = vector.extract_strided_slice %577 {offsets = [0, 1], sizes = [16, 1], strides = [1, 1]} : vector<16x2xf32> to vector<16x1xf32>
    %584 = vector.extract_strided_slice %578 {offsets = [0, 1], sizes = [16, 1], strides = [1, 1]} : vector<16x2xf32> to vector<16x1xf32>
    %585 = vector.extract_strided_slice %584 {offsets = [0, 0], sizes = [8, 1], strides = [1, 1]} : vector<16x1xf32> to vector<8x1xf32>
    %586 = arith.subf %585, %581 : vector<8x1xf32>
    %587 = arith.mulf %580, %580 : vector<8x1xf32>
    %588 = vector.extract_strided_slice %582 {offsets = [0, 0], sizes = [8, 1], strides = [1, 1]} : vector<16x1xf32> to vector<8x1xf32>
    %589 = arith.subf %579, %588 : vector<8x1xf32>
    %590 = arith.mulf %589, %589 : vector<8x1xf32>
    %591 = arith.addf %587, %590 : vector<8x1xf32>
    %592 = vector.extract_strided_slice %583 {offsets = [0, 0], sizes = [8, 1], strides = [1, 1]} : vector<16x1xf32> to vector<8x1xf32>
    %cst_213 = arith.constant 2.000000e+00 : f32
    %593 = vector.broadcast %cst_213 : f32 to vector<8x1xf32>
    %594 = arith.mulf %593, %592 : vector<8x1xf32>
    %595 = vector.extract_strided_slice %583 {offsets = [0, 0], sizes = [8, 1], strides = [1, 1]} : vector<16x1xf32> to vector<8x1xf32>
    %596 = arith.mulf %594, %595 : vector<8x1xf32>
    %597 = arith.divf %591, %596 : vector<8x1xf32>
    %598 = arith.addf %586, %597 : vector<8x1xf32>
    %599 = arith.addf %465, %598 : vector<8x1xf32>
    %600 = arith.mulf %546, %580 : vector<8x1xf32>
    %601 = arith.addf %600, %579 : vector<8x1xf32>
    %602 = vector.extract_strided_slice %543 {offsets = [0, 0], sizes = [8, 1], strides = [1, 1]} : vector<16x1xf32> to vector<8x1xf32>
    %603 = arith.subf %602, %601 : vector<8x1xf32>
    %604 = arith.mulf %603, %603 : vector<8x1xf32>
    %605 = arith.addf %471, %604 : vector<8x1xf32>
    %606 = vector.extract_strided_slice %583 {offsets = [8, 0], sizes = [8, 1], strides = [1, 1]} : vector<16x1xf32> to vector<8x1xf32>
    %607 = arith.mulf %549, %606 : vector<8x1xf32>
    %608 = vector.extract_strided_slice %582 {offsets = [8, 0], sizes = [8, 1], strides = [1, 1]} : vector<16x1xf32> to vector<8x1xf32>
    %609 = arith.addf %607, %608 : vector<8x1xf32>
    %610 = vector.extract_strided_slice %584 {offsets = [8, 0], sizes = [8, 1], strides = [1, 1]} : vector<16x1xf32> to vector<8x1xf32>
    %611 = arith.addf %477, %610 : vector<8x1xf32>
    %612 = tpu.concatenate %601, %609 in 0 : vector<8x1xf32>, vector<8x1xf32> -> vector<16x1xf32>
    %c0_214 = arith.constant 0 : index
    %c0_215 = arith.constant 0 : index
    %613 = vector.load %arg8[%c0_214, %c0_215] : memref<32x128xbf16, #tpu.memory_space<vmem>>, vector<32x128xbf16>
    %614 = arith.truncf %511 : vector<16x32xf32> to vector<16x32xbf16>
    %cst_216 = arith.constant dense<0.000000e+00> : vector<16x128xf32>
    %615 = tpu.matmul %614, %613, %cst_216 {dimension_numbers = #tpu.dot_dimension_numbers<[1], [0], [0], [1], [0, 0, 1, 1], [], []>} : vector<16x32xbf16>, vector<32x128xbf16>, vector<16x128xf32> -> vector<16x128xf32>
    %616 = vector.extract_strided_slice %615 {offsets = [0, 0], sizes = [16, 96], strides = [1, 1]} : vector<16x128xf32> to vector<16x96xf32>
    %c0_217 = arith.constant 0 : index
    %c0_218 = arith.constant 0 : index
    %617 = vector.load %arg9[%c0_217, %c0_218] : memref<1x96xf32, #tpu.memory_space<vmem>>, vector<1x96xf32>
    %618 = vector.broadcast %612 : vector<16x1xf32> to vector<16x96xf32>
    %619 = vector.broadcast %617 : vector<1x96xf32> to vector<16x96xf32>
    %620 = arith.mulf %618, %619 : vector<16x96xf32>
    %621 = arith.addf %616, %620 : vector<16x96xf32>
    %c0_219 = arith.constant 0 : index
    %c0_220 = arith.constant 0 : index
    %622 = vector.load %arg10[%c0_219, %c0_220] : memref<16x96xf32, #tpu.memory_space<vmem>>, vector<16x96xf32>
    %623 = arith.addf %621, %622 : vector<16x96xf32>
    %624 = vector.extract_strided_slice %623 {offsets = [0, 0], sizes = [16, 64], strides = [1, 1]} : vector<16x96xf32> to vector<16x64xf32>
    %cst_221 = arith.constant 5.000000e-01 : f32
    %625 = vector.broadcast %cst_221 : f32 to vector<16x64xf32>
    %626 = arith.mulf %625, %624 : vector<16x64xf32>
    %627 = math.tanh %626 : vector<16x64xf32>
    %cst_222 = arith.constant 5.000000e-01 : f32
    %628 = vector.broadcast %cst_222 : f32 to vector<16x64xf32>
    %629 = arith.mulf %628, %627 : vector<16x64xf32>
    %cst_223 = arith.constant 5.000000e-01 : f32
    %630 = vector.broadcast %cst_223 : f32 to vector<16x64xf32>
    %631 = arith.addf %629, %630 : vector<16x64xf32>
    %632 = vector.extract_strided_slice %631 {offsets = [0, 0], sizes = [16, 32], strides = [1, 1]} : vector<16x64xf32> to vector<16x32xf32>
    %633 = vector.extract_strided_slice %631 {offsets = [0, 32], sizes = [16, 32], strides = [1, 1]} : vector<16x64xf32> to vector<16x32xf32>
    %634 = vector.extract_strided_slice %623 {offsets = [0, 64], sizes = [16, 32], strides = [1, 1]} : vector<16x96xf32> to vector<16x32xf32>
    %635 = vector.extract_strided_slice %615 {offsets = [0, 96], sizes = [16, 32], strides = [1, 1]} : vector<16x128xf32> to vector<16x32xf32>
    %c0_224 = arith.constant 0 : index
    %c0_225 = arith.constant 0 : index
    %636 = vector.load %arg11[%c0_224, %c0_225] : memref<16x32xf32, #tpu.memory_space<vmem>>, vector<16x32xf32>
    %637 = arith.addf %635, %636 : vector<16x32xf32>
    %638 = arith.mulf %632, %637 : vector<16x32xf32>
    %639 = arith.addf %634, %638 : vector<16x32xf32>
    %640 = math.tanh %639 : vector<16x32xf32>
    %cst_226 = arith.constant 1.000000e+00 : f32
    %641 = vector.broadcast %cst_226 : f32 to vector<16x32xf32>
    %642 = arith.subf %641, %633 : vector<16x32xf32>
    %643 = arith.mulf %642, %640 : vector<16x32xf32>
    %644 = arith.mulf %633, %511 : vector<16x32xf32>
    %645 = arith.addf %643, %644 : vector<16x32xf32>
    %646 = tpu.concatenate %645, %540 in 1 : vector<16x32xf32>, vector<16x32xf32> -> vector<16x64xf32>
    %c0_227 = arith.constant 0 : index
    %c0_228 = arith.constant 0 : index
    %647 = vector.load %arg12[%c0_227, %c0_228] : memref<64x128xbf16, #tpu.memory_space<vmem>>, vector<64x128xbf16>
    %648 = arith.truncf %646 : vector<16x64xf32> to vector<16x64xbf16>
    %cst_229 = arith.constant dense<0.000000e+00> : vector<16x128xf32>
    %649 = tpu.matmul %648, %647, %cst_229 {dimension_numbers = #tpu.dot_dimension_numbers<[1], [0], [0], [1], [0, 0, 1, 1], [], []>} : vector<16x64xbf16>, vector<64x128xbf16>, vector<16x128xf32> -> vector<16x128xf32>
    %650 = vector.extract_strided_slice %649 {offsets = [0, 0], sizes = [16, 96], strides = [1, 1]} : vector<16x128xf32> to vector<16x96xf32>
    %c0_230 = arith.constant 0 : index
    %c0_231 = arith.constant 0 : index
    %651 = vector.load %arg13[%c0_230, %c0_231] : memref<16x96xf32, #tpu.memory_space<vmem>>, vector<16x96xf32>
    %652 = arith.addf %650, %651 : vector<16x96xf32>
    %653 = vector.extract_strided_slice %652 {offsets = [0, 0], sizes = [16, 64], strides = [1, 1]} : vector<16x96xf32> to vector<16x64xf32>
    %cst_232 = arith.constant 5.000000e-01 : f32
    %654 = vector.broadcast %cst_232 : f32 to vector<16x64xf32>
    %655 = arith.mulf %654, %653 : vector<16x64xf32>
    %656 = math.tanh %655 : vector<16x64xf32>
    %cst_233 = arith.constant 5.000000e-01 : f32
    %657 = vector.broadcast %cst_233 : f32 to vector<16x64xf32>
    %658 = arith.mulf %657, %656 : vector<16x64xf32>
    %cst_234 = arith.constant 5.000000e-01 : f32
    %659 = vector.broadcast %cst_234 : f32 to vector<16x64xf32>
    %660 = arith.addf %658, %659 : vector<16x64xf32>
    %661 = vector.extract_strided_slice %660 {offsets = [0, 0], sizes = [16, 32], strides = [1, 1]} : vector<16x64xf32> to vector<16x32xf32>
    %662 = vector.extract_strided_slice %660 {offsets = [0, 32], sizes = [16, 32], strides = [1, 1]} : vector<16x64xf32> to vector<16x32xf32>
    %663 = vector.extract_strided_slice %652 {offsets = [0, 64], sizes = [16, 32], strides = [1, 1]} : vector<16x96xf32> to vector<16x32xf32>
    %664 = vector.extract_strided_slice %649 {offsets = [0, 96], sizes = [16, 32], strides = [1, 1]} : vector<16x128xf32> to vector<16x32xf32>
    %c0_235 = arith.constant 0 : index
    %c0_236 = arith.constant 0 : index
    %665 = vector.load %arg14[%c0_235, %c0_236] : memref<16x32xf32, #tpu.memory_space<vmem>>, vector<16x32xf32>
    %666 = arith.addf %664, %665 : vector<16x32xf32>
    %667 = arith.mulf %661, %666 : vector<16x32xf32>
    %668 = arith.addf %663, %667 : vector<16x32xf32>
    %669 = math.tanh %668 : vector<16x32xf32>
    %cst_237 = arith.constant 1.000000e+00 : f32
    %670 = vector.broadcast %cst_237 : f32 to vector<16x32xf32>
    %671 = arith.subf %670, %662 : vector<16x32xf32>
    %672 = arith.mulf %671, %669 : vector<16x32xf32>
    %673 = arith.mulf %662, %540 : vector<16x32xf32>
    %674 = arith.addf %672, %673 : vector<16x32xf32>
    %c5_i32 = arith.constant 5 : i32
    %675 = arith.index_cast %c5_i32 : i32 to index
    %c0_238 = arith.constant 0 : index
    %c0_239 = arith.constant 0 : index
    %676 = vector.load %arg0[%675, %c0_238, %c0_239] : memref<8x16x1xf32, #tpu.memory_space<vmem>>, vector<1x16x1xf32>
    %677 = vector.shape_cast %676 : vector<1x16x1xf32> to vector<16x1xf32>
    %678 = arith.index_cast %c5_i32 : i32 to index
    %c0_240 = arith.constant 0 : index
    %c0_241 = arith.constant 0 : index
    %679 = vector.load %arg1[%678, %c0_240, %c0_241] : memref<8x8x1xf32, #tpu.memory_space<vmem>>, vector<1x8x1xf32>
    %680 = vector.shape_cast %679 : vector<1x8x1xf32> to vector<8x1xf32>
    %681 = arith.index_cast %c5_i32 : i32 to index
    %c0_242 = arith.constant 0 : index
    %c0_243 = arith.constant 0 : index
    %682 = vector.load %arg2[%681, %c0_242, %c0_243] : memref<8x8x1xf32, #tpu.memory_space<vmem>>, vector<1x8x1xf32>
    %683 = vector.shape_cast %682 : vector<1x8x1xf32> to vector<8x1xf32>
    %c0_244 = arith.constant 0 : index
    %c0_245 = arith.constant 0 : index
    %684 = vector.load %arg4[%c0_244, %c0_245] : memref<32x64xbf16, #tpu.memory_space<vmem>>, vector<32x64xbf16>
    %685 = arith.truncf %674 : vector<16x32xf32> to vector<16x32xbf16>
    %cst_246 = arith.constant dense<0.000000e+00> : vector<16x64xf32>
    %686 = tpu.matmul %685, %684, %cst_246 {dimension_numbers = #tpu.dot_dimension_numbers<[1], [0], [0], [1], [0, 0, 1, 1], [], []>} : vector<16x32xbf16>, vector<32x64xbf16>, vector<16x64xf32> -> vector<16x64xf32>
    %c0_247 = arith.constant 0 : index
    %c0_248 = arith.constant 0 : index
    %687 = vector.load %arg3[%c0_247, %c0_248] : memref<1x64xf32, #tpu.memory_space<vmem>>, vector<1x64xf32>
    %688 = vector.broadcast %677 : vector<16x1xf32> to vector<16x64xf32>
    %689 = vector.broadcast %687 : vector<1x64xf32> to vector<16x64xf32>
    %690 = arith.mulf %688, %689 : vector<16x64xf32>
    %691 = arith.addf %686, %690 : vector<16x64xf32>
    %c0_249 = arith.constant 0 : index
    %c0_250 = arith.constant 0 : index
    %692 = vector.load %arg5[%c0_249, %c0_250] : memref<16x64xf32, #tpu.memory_space<vmem>>, vector<16x64xf32>
    %693 = arith.addf %691, %692 : vector<16x64xf32>
    %cst_251 = arith.constant 0.000000e+00 : f32
    %694 = vector.broadcast %cst_251 : f32 to vector<16x64xf32>
    %695 = arith.maximumf %693, %694 : vector<16x64xf32>
    %c0_252 = arith.constant 0 : index
    %c0_253 = arith.constant 0 : index
    %696 = vector.load %arg6[%c0_252, %c0_253] : memref<64x4xbf16, #tpu.memory_space<vmem>>, vector<64x4xbf16>
    %697 = arith.truncf %695 : vector<16x64xf32> to vector<16x64xbf16>
    %cst_254 = arith.constant dense<0.000000e+00> : vector<16x4xf32>
    %698 = tpu.matmul %697, %696, %cst_254 {dimension_numbers = #tpu.dot_dimension_numbers<[1], [0], [0], [1], [0, 0, 1, 1], [], []>} : vector<16x64xbf16>, vector<64x4xbf16>, vector<16x4xf32> -> vector<16x4xf32>
    %c0_255 = arith.constant 0 : index
    %c0_256 = arith.constant 0 : index
    %699 = vector.load %arg7[%c0_255, %c0_256] : memref<16x4xf32, #tpu.memory_space<vmem>>, vector<16x4xf32>
    %700 = arith.addf %698, %699 : vector<16x4xf32>
    %701 = vector.extract_strided_slice %700 {offsets = [0, 2], sizes = [16, 2], strides = [1, 1]} : vector<16x4xf32> to vector<16x2xf32>
    %cst_257 = arith.constant 0.000000e+00 : f32
    %702 = vector.broadcast %cst_257 : f32 to vector<16x2xf32>
    %703 = arith.maximumf %701, %702 : vector<16x2xf32>
    %704 = math.absf %701 : vector<16x2xf32>
    %cst_258 = arith.constant 0.000000e+00 : f32
    %705 = vector.broadcast %cst_258 : f32 to vector<16x2xf32>
    %706 = arith.subf %705, %704 : vector<16x2xf32>
    %707 = math.exp %706 : vector<16x2xf32>
    %cst_259 = arith.constant 1.000000e+00 : f32
    %708 = vector.broadcast %cst_259 : f32 to vector<16x2xf32>
    %709 = arith.addf %708, %707 : vector<16x2xf32>
    %710 = math.log %709 : vector<16x2xf32>
    %711 = arith.addf %703, %710 : vector<16x2xf32>
    %712 = math.log %711 : vector<16x2xf32>
    %713 = vector.extract_strided_slice %700 {offsets = [0, 0], sizes = [8, 1], strides = [1, 1]} : vector<16x4xf32> to vector<8x1xf32>
    %714 = vector.extract_strided_slice %711 {offsets = [0, 0], sizes = [8, 1], strides = [1, 1]} : vector<16x2xf32> to vector<8x1xf32>
    %715 = vector.extract_strided_slice %712 {offsets = [0, 0], sizes = [8, 1], strides = [1, 1]} : vector<16x2xf32> to vector<8x1xf32>
    %716 = vector.extract_strided_slice %700 {offsets = [0, 1], sizes = [16, 1], strides = [1, 1]} : vector<16x4xf32> to vector<16x1xf32>
    %717 = vector.extract_strided_slice %711 {offsets = [0, 1], sizes = [16, 1], strides = [1, 1]} : vector<16x2xf32> to vector<16x1xf32>
    %718 = vector.extract_strided_slice %712 {offsets = [0, 1], sizes = [16, 1], strides = [1, 1]} : vector<16x2xf32> to vector<16x1xf32>
    %719 = vector.extract_strided_slice %718 {offsets = [0, 0], sizes = [8, 1], strides = [1, 1]} : vector<16x1xf32> to vector<8x1xf32>
    %720 = arith.subf %719, %715 : vector<8x1xf32>
    %721 = arith.mulf %714, %714 : vector<8x1xf32>
    %722 = vector.extract_strided_slice %716 {offsets = [0, 0], sizes = [8, 1], strides = [1, 1]} : vector<16x1xf32> to vector<8x1xf32>
    %723 = arith.subf %713, %722 : vector<8x1xf32>
    %724 = arith.mulf %723, %723 : vector<8x1xf32>
    %725 = arith.addf %721, %724 : vector<8x1xf32>
    %726 = vector.extract_strided_slice %717 {offsets = [0, 0], sizes = [8, 1], strides = [1, 1]} : vector<16x1xf32> to vector<8x1xf32>
    %cst_260 = arith.constant 2.000000e+00 : f32
    %727 = vector.broadcast %cst_260 : f32 to vector<8x1xf32>
    %728 = arith.mulf %727, %726 : vector<8x1xf32>
    %729 = vector.extract_strided_slice %717 {offsets = [0, 0], sizes = [8, 1], strides = [1, 1]} : vector<16x1xf32> to vector<8x1xf32>
    %730 = arith.mulf %728, %729 : vector<8x1xf32>
    %731 = arith.divf %725, %730 : vector<8x1xf32>
    %732 = arith.addf %720, %731 : vector<8x1xf32>
    %733 = arith.addf %599, %732 : vector<8x1xf32>
    %734 = arith.mulf %680, %714 : vector<8x1xf32>
    %735 = arith.addf %734, %713 : vector<8x1xf32>
    %736 = vector.extract_strided_slice %677 {offsets = [0, 0], sizes = [8, 1], strides = [1, 1]} : vector<16x1xf32> to vector<8x1xf32>
    %737 = arith.subf %736, %735 : vector<8x1xf32>
    %738 = arith.mulf %737, %737 : vector<8x1xf32>
    %739 = arith.addf %605, %738 : vector<8x1xf32>
    %740 = vector.extract_strided_slice %717 {offsets = [8, 0], sizes = [8, 1], strides = [1, 1]} : vector<16x1xf32> to vector<8x1xf32>
    %741 = arith.mulf %683, %740 : vector<8x1xf32>
    %742 = vector.extract_strided_slice %716 {offsets = [8, 0], sizes = [8, 1], strides = [1, 1]} : vector<16x1xf32> to vector<8x1xf32>
    %743 = arith.addf %741, %742 : vector<8x1xf32>
    %744 = vector.extract_strided_slice %718 {offsets = [8, 0], sizes = [8, 1], strides = [1, 1]} : vector<16x1xf32> to vector<8x1xf32>
    %745 = arith.addf %611, %744 : vector<8x1xf32>
    %746 = tpu.concatenate %735, %743 in 0 : vector<8x1xf32>, vector<8x1xf32> -> vector<16x1xf32>
    %c0_261 = arith.constant 0 : index
    %c0_262 = arith.constant 0 : index
    %747 = vector.load %arg8[%c0_261, %c0_262] : memref<32x128xbf16, #tpu.memory_space<vmem>>, vector<32x128xbf16>
    %748 = arith.truncf %645 : vector<16x32xf32> to vector<16x32xbf16>
    %cst_263 = arith.constant dense<0.000000e+00> : vector<16x128xf32>
    %749 = tpu.matmul %748, %747, %cst_263 {dimension_numbers = #tpu.dot_dimension_numbers<[1], [0], [0], [1], [0, 0, 1, 1], [], []>} : vector<16x32xbf16>, vector<32x128xbf16>, vector<16x128xf32> -> vector<16x128xf32>
    %750 = vector.extract_strided_slice %749 {offsets = [0, 0], sizes = [16, 96], strides = [1, 1]} : vector<16x128xf32> to vector<16x96xf32>
    %c0_264 = arith.constant 0 : index
    %c0_265 = arith.constant 0 : index
    %751 = vector.load %arg9[%c0_264, %c0_265] : memref<1x96xf32, #tpu.memory_space<vmem>>, vector<1x96xf32>
    %752 = vector.broadcast %746 : vector<16x1xf32> to vector<16x96xf32>
    %753 = vector.broadcast %751 : vector<1x96xf32> to vector<16x96xf32>
    %754 = arith.mulf %752, %753 : vector<16x96xf32>
    %755 = arith.addf %750, %754 : vector<16x96xf32>
    %c0_266 = arith.constant 0 : index
    %c0_267 = arith.constant 0 : index
    %756 = vector.load %arg10[%c0_266, %c0_267] : memref<16x96xf32, #tpu.memory_space<vmem>>, vector<16x96xf32>
    %757 = arith.addf %755, %756 : vector<16x96xf32>
    %758 = vector.extract_strided_slice %757 {offsets = [0, 0], sizes = [16, 64], strides = [1, 1]} : vector<16x96xf32> to vector<16x64xf32>
    %cst_268 = arith.constant 5.000000e-01 : f32
    %759 = vector.broadcast %cst_268 : f32 to vector<16x64xf32>
    %760 = arith.mulf %759, %758 : vector<16x64xf32>
    %761 = math.tanh %760 : vector<16x64xf32>
    %cst_269 = arith.constant 5.000000e-01 : f32
    %762 = vector.broadcast %cst_269 : f32 to vector<16x64xf32>
    %763 = arith.mulf %762, %761 : vector<16x64xf32>
    %cst_270 = arith.constant 5.000000e-01 : f32
    %764 = vector.broadcast %cst_270 : f32 to vector<16x64xf32>
    %765 = arith.addf %763, %764 : vector<16x64xf32>
    %766 = vector.extract_strided_slice %765 {offsets = [0, 0], sizes = [16, 32], strides = [1, 1]} : vector<16x64xf32> to vector<16x32xf32>
    %767 = vector.extract_strided_slice %765 {offsets = [0, 32], sizes = [16, 32], strides = [1, 1]} : vector<16x64xf32> to vector<16x32xf32>
    %768 = vector.extract_strided_slice %757 {offsets = [0, 64], sizes = [16, 32], strides = [1, 1]} : vector<16x96xf32> to vector<16x32xf32>
    %769 = vector.extract_strided_slice %749 {offsets = [0, 96], sizes = [16, 32], strides = [1, 1]} : vector<16x128xf32> to vector<16x32xf32>
    %c0_271 = arith.constant 0 : index
    %c0_272 = arith.constant 0 : index
    %770 = vector.load %arg11[%c0_271, %c0_272] : memref<16x32xf32, #tpu.memory_space<vmem>>, vector<16x32xf32>
    %771 = arith.addf %769, %770 : vector<16x32xf32>
    %772 = arith.mulf %766, %771 : vector<16x32xf32>
    %773 = arith.addf %768, %772 : vector<16x32xf32>
    %774 = math.tanh %773 : vector<16x32xf32>
    %cst_273 = arith.constant 1.000000e+00 : f32
    %775 = vector.broadcast %cst_273 : f32 to vector<16x32xf32>
    %776 = arith.subf %775, %767 : vector<16x32xf32>
    %777 = arith.mulf %776, %774 : vector<16x32xf32>
    %778 = arith.mulf %767, %645 : vector<16x32xf32>
    %779 = arith.addf %777, %778 : vector<16x32xf32>
    %780 = tpu.concatenate %779, %674 in 1 : vector<16x32xf32>, vector<16x32xf32> -> vector<16x64xf32>
    %c0_274 = arith.constant 0 : index
    %c0_275 = arith.constant 0 : index
    %781 = vector.load %arg12[%c0_274, %c0_275] : memref<64x128xbf16, #tpu.memory_space<vmem>>, vector<64x128xbf16>
    %782 = arith.truncf %780 : vector<16x64xf32> to vector<16x64xbf16>
    %cst_276 = arith.constant dense<0.000000e+00> : vector<16x128xf32>
    %783 = tpu.matmul %782, %781, %cst_276 {dimension_numbers = #tpu.dot_dimension_numbers<[1], [0], [0], [1], [0, 0, 1, 1], [], []>} : vector<16x64xbf16>, vector<64x128xbf16>, vector<16x128xf32> -> vector<16x128xf32>
    %784 = vector.extract_strided_slice %783 {offsets = [0, 0], sizes = [16, 96], strides = [1, 1]} : vector<16x128xf32> to vector<16x96xf32>
    %c0_277 = arith.constant 0 : index
    %c0_278 = arith.constant 0 : index
    %785 = vector.load %arg13[%c0_277, %c0_278] : memref<16x96xf32, #tpu.memory_space<vmem>>, vector<16x96xf32>
    %786 = arith.addf %784, %785 : vector<16x96xf32>
    %787 = vector.extract_strided_slice %786 {offsets = [0, 0], sizes = [16, 64], strides = [1, 1]} : vector<16x96xf32> to vector<16x64xf32>
    %cst_279 = arith.constant 5.000000e-01 : f32
    %788 = vector.broadcast %cst_279 : f32 to vector<16x64xf32>
    %789 = arith.mulf %788, %787 : vector<16x64xf32>
    %790 = math.tanh %789 : vector<16x64xf32>
    %cst_280 = arith.constant 5.000000e-01 : f32
    %791 = vector.broadcast %cst_280 : f32 to vector<16x64xf32>
    %792 = arith.mulf %791, %790 : vector<16x64xf32>
    %cst_281 = arith.constant 5.000000e-01 : f32
    %793 = vector.broadcast %cst_281 : f32 to vector<16x64xf32>
    %794 = arith.addf %792, %793 : vector<16x64xf32>
    %795 = vector.extract_strided_slice %794 {offsets = [0, 0], sizes = [16, 32], strides = [1, 1]} : vector<16x64xf32> to vector<16x32xf32>
    %796 = vector.extract_strided_slice %794 {offsets = [0, 32], sizes = [16, 32], strides = [1, 1]} : vector<16x64xf32> to vector<16x32xf32>
    %797 = vector.extract_strided_slice %786 {offsets = [0, 64], sizes = [16, 32], strides = [1, 1]} : vector<16x96xf32> to vector<16x32xf32>
    %798 = vector.extract_strided_slice %783 {offsets = [0, 96], sizes = [16, 32], strides = [1, 1]} : vector<16x128xf32> to vector<16x32xf32>
    %c0_282 = arith.constant 0 : index
    %c0_283 = arith.constant 0 : index
    %799 = vector.load %arg14[%c0_282, %c0_283] : memref<16x32xf32, #tpu.memory_space<vmem>>, vector<16x32xf32>
    %800 = arith.addf %798, %799 : vector<16x32xf32>
    %801 = arith.mulf %795, %800 : vector<16x32xf32>
    %802 = arith.addf %797, %801 : vector<16x32xf32>
    %803 = math.tanh %802 : vector<16x32xf32>
    %cst_284 = arith.constant 1.000000e+00 : f32
    %804 = vector.broadcast %cst_284 : f32 to vector<16x32xf32>
    %805 = arith.subf %804, %796 : vector<16x32xf32>
    %806 = arith.mulf %805, %803 : vector<16x32xf32>
    %807 = arith.mulf %796, %674 : vector<16x32xf32>
    %808 = arith.addf %806, %807 : vector<16x32xf32>
    %c6_i32 = arith.constant 6 : i32
    %809 = arith.index_cast %c6_i32 : i32 to index
    %c0_285 = arith.constant 0 : index
    %c0_286 = arith.constant 0 : index
    %810 = vector.load %arg0[%809, %c0_285, %c0_286] : memref<8x16x1xf32, #tpu.memory_space<vmem>>, vector<1x16x1xf32>
    %811 = vector.shape_cast %810 : vector<1x16x1xf32> to vector<16x1xf32>
    %812 = arith.index_cast %c6_i32 : i32 to index
    %c0_287 = arith.constant 0 : index
    %c0_288 = arith.constant 0 : index
    %813 = vector.load %arg1[%812, %c0_287, %c0_288] : memref<8x8x1xf32, #tpu.memory_space<vmem>>, vector<1x8x1xf32>
    %814 = vector.shape_cast %813 : vector<1x8x1xf32> to vector<8x1xf32>
    %815 = arith.index_cast %c6_i32 : i32 to index
    %c0_289 = arith.constant 0 : index
    %c0_290 = arith.constant 0 : index
    %816 = vector.load %arg2[%815, %c0_289, %c0_290] : memref<8x8x1xf32, #tpu.memory_space<vmem>>, vector<1x8x1xf32>
    %817 = vector.shape_cast %816 : vector<1x8x1xf32> to vector<8x1xf32>
    %c0_291 = arith.constant 0 : index
    %c0_292 = arith.constant 0 : index
    %818 = vector.load %arg4[%c0_291, %c0_292] : memref<32x64xbf16, #tpu.memory_space<vmem>>, vector<32x64xbf16>
    %819 = arith.truncf %808 : vector<16x32xf32> to vector<16x32xbf16>
    %cst_293 = arith.constant dense<0.000000e+00> : vector<16x64xf32>
    %820 = tpu.matmul %819, %818, %cst_293 {dimension_numbers = #tpu.dot_dimension_numbers<[1], [0], [0], [1], [0, 0, 1, 1], [], []>} : vector<16x32xbf16>, vector<32x64xbf16>, vector<16x64xf32> -> vector<16x64xf32>
    %c0_294 = arith.constant 0 : index
    %c0_295 = arith.constant 0 : index
    %821 = vector.load %arg3[%c0_294, %c0_295] : memref<1x64xf32, #tpu.memory_space<vmem>>, vector<1x64xf32>
    %822 = vector.broadcast %811 : vector<16x1xf32> to vector<16x64xf32>
    %823 = vector.broadcast %821 : vector<1x64xf32> to vector<16x64xf32>
    %824 = arith.mulf %822, %823 : vector<16x64xf32>
    %825 = arith.addf %820, %824 : vector<16x64xf32>
    %c0_296 = arith.constant 0 : index
    %c0_297 = arith.constant 0 : index
    %826 = vector.load %arg5[%c0_296, %c0_297] : memref<16x64xf32, #tpu.memory_space<vmem>>, vector<16x64xf32>
    %827 = arith.addf %825, %826 : vector<16x64xf32>
    %cst_298 = arith.constant 0.000000e+00 : f32
    %828 = vector.broadcast %cst_298 : f32 to vector<16x64xf32>
    %829 = arith.maximumf %827, %828 : vector<16x64xf32>
    %c0_299 = arith.constant 0 : index
    %c0_300 = arith.constant 0 : index
    %830 = vector.load %arg6[%c0_299, %c0_300] : memref<64x4xbf16, #tpu.memory_space<vmem>>, vector<64x4xbf16>
    %831 = arith.truncf %829 : vector<16x64xf32> to vector<16x64xbf16>
    %cst_301 = arith.constant dense<0.000000e+00> : vector<16x4xf32>
    %832 = tpu.matmul %831, %830, %cst_301 {dimension_numbers = #tpu.dot_dimension_numbers<[1], [0], [0], [1], [0, 0, 1, 1], [], []>} : vector<16x64xbf16>, vector<64x4xbf16>, vector<16x4xf32> -> vector<16x4xf32>
    %c0_302 = arith.constant 0 : index
    %c0_303 = arith.constant 0 : index
    %833 = vector.load %arg7[%c0_302, %c0_303] : memref<16x4xf32, #tpu.memory_space<vmem>>, vector<16x4xf32>
    %834 = arith.addf %832, %833 : vector<16x4xf32>
    %835 = vector.extract_strided_slice %834 {offsets = [0, 2], sizes = [16, 2], strides = [1, 1]} : vector<16x4xf32> to vector<16x2xf32>
    %cst_304 = arith.constant 0.000000e+00 : f32
    %836 = vector.broadcast %cst_304 : f32 to vector<16x2xf32>
    %837 = arith.maximumf %835, %836 : vector<16x2xf32>
    %838 = math.absf %835 : vector<16x2xf32>
    %cst_305 = arith.constant 0.000000e+00 : f32
    %839 = vector.broadcast %cst_305 : f32 to vector<16x2xf32>
    %840 = arith.subf %839, %838 : vector<16x2xf32>
    %841 = math.exp %840 : vector<16x2xf32>
    %cst_306 = arith.constant 1.000000e+00 : f32
    %842 = vector.broadcast %cst_306 : f32 to vector<16x2xf32>
    %843 = arith.addf %842, %841 : vector<16x2xf32>
    %844 = math.log %843 : vector<16x2xf32>
    %845 = arith.addf %837, %844 : vector<16x2xf32>
    %846 = math.log %845 : vector<16x2xf32>
    %847 = vector.extract_strided_slice %834 {offsets = [0, 0], sizes = [8, 1], strides = [1, 1]} : vector<16x4xf32> to vector<8x1xf32>
    %848 = vector.extract_strided_slice %845 {offsets = [0, 0], sizes = [8, 1], strides = [1, 1]} : vector<16x2xf32> to vector<8x1xf32>
    %849 = vector.extract_strided_slice %846 {offsets = [0, 0], sizes = [8, 1], strides = [1, 1]} : vector<16x2xf32> to vector<8x1xf32>
    %850 = vector.extract_strided_slice %834 {offsets = [0, 1], sizes = [16, 1], strides = [1, 1]} : vector<16x4xf32> to vector<16x1xf32>
    %851 = vector.extract_strided_slice %845 {offsets = [0, 1], sizes = [16, 1], strides = [1, 1]} : vector<16x2xf32> to vector<16x1xf32>
    %852 = vector.extract_strided_slice %846 {offsets = [0, 1], sizes = [16, 1], strides = [1, 1]} : vector<16x2xf32> to vector<16x1xf32>
    %853 = vector.extract_strided_slice %852 {offsets = [0, 0], sizes = [8, 1], strides = [1, 1]} : vector<16x1xf32> to vector<8x1xf32>
    %854 = arith.subf %853, %849 : vector<8x1xf32>
    %855 = arith.mulf %848, %848 : vector<8x1xf32>
    %856 = vector.extract_strided_slice %850 {offsets = [0, 0], sizes = [8, 1], strides = [1, 1]} : vector<16x1xf32> to vector<8x1xf32>
    %857 = arith.subf %847, %856 : vector<8x1xf32>
    %858 = arith.mulf %857, %857 : vector<8x1xf32>
    %859 = arith.addf %855, %858 : vector<8x1xf32>
    %860 = vector.extract_strided_slice %851 {offsets = [0, 0], sizes = [8, 1], strides = [1, 1]} : vector<16x1xf32> to vector<8x1xf32>
    %cst_307 = arith.constant 2.000000e+00 : f32
    %861 = vector.broadcast %cst_307 : f32 to vector<8x1xf32>
    %862 = arith.mulf %861, %860 : vector<8x1xf32>
    %863 = vector.extract_strided_slice %851 {offsets = [0, 0], sizes = [8, 1], strides = [1, 1]} : vector<16x1xf32> to vector<8x1xf32>
    %864 = arith.mulf %862, %863 : vector<8x1xf32>
    %865 = arith.divf %859, %864 : vector<8x1xf32>
    %866 = arith.addf %854, %865 : vector<8x1xf32>
    %867 = arith.addf %733, %866 : vector<8x1xf32>
    %868 = arith.mulf %814, %848 : vector<8x1xf32>
    %869 = arith.addf %868, %847 : vector<8x1xf32>
    %870 = vector.extract_strided_slice %811 {offsets = [0, 0], sizes = [8, 1], strides = [1, 1]} : vector<16x1xf32> to vector<8x1xf32>
    %871 = arith.subf %870, %869 : vector<8x1xf32>
    %872 = arith.mulf %871, %871 : vector<8x1xf32>
    %873 = arith.addf %739, %872 : vector<8x1xf32>
    %874 = vector.extract_strided_slice %851 {offsets = [8, 0], sizes = [8, 1], strides = [1, 1]} : vector<16x1xf32> to vector<8x1xf32>
    %875 = arith.mulf %817, %874 : vector<8x1xf32>
    %876 = vector.extract_strided_slice %850 {offsets = [8, 0], sizes = [8, 1], strides = [1, 1]} : vector<16x1xf32> to vector<8x1xf32>
    %877 = arith.addf %875, %876 : vector<8x1xf32>
    %878 = vector.extract_strided_slice %852 {offsets = [8, 0], sizes = [8, 1], strides = [1, 1]} : vector<16x1xf32> to vector<8x1xf32>
    %879 = arith.addf %745, %878 : vector<8x1xf32>
    %880 = tpu.concatenate %869, %877 in 0 : vector<8x1xf32>, vector<8x1xf32> -> vector<16x1xf32>
    %c0_308 = arith.constant 0 : index
    %c0_309 = arith.constant 0 : index
    %881 = vector.load %arg8[%c0_308, %c0_309] : memref<32x128xbf16, #tpu.memory_space<vmem>>, vector<32x128xbf16>
    %882 = arith.truncf %779 : vector<16x32xf32> to vector<16x32xbf16>
    %cst_310 = arith.constant dense<0.000000e+00> : vector<16x128xf32>
    %883 = tpu.matmul %882, %881, %cst_310 {dimension_numbers = #tpu.dot_dimension_numbers<[1], [0], [0], [1], [0, 0, 1, 1], [], []>} : vector<16x32xbf16>, vector<32x128xbf16>, vector<16x128xf32> -> vector<16x128xf32>
    %884 = vector.extract_strided_slice %883 {offsets = [0, 0], sizes = [16, 96], strides = [1, 1]} : vector<16x128xf32> to vector<16x96xf32>
    %c0_311 = arith.constant 0 : index
    %c0_312 = arith.constant 0 : index
    %885 = vector.load %arg9[%c0_311, %c0_312] : memref<1x96xf32, #tpu.memory_space<vmem>>, vector<1x96xf32>
    %886 = vector.broadcast %880 : vector<16x1xf32> to vector<16x96xf32>
    %887 = vector.broadcast %885 : vector<1x96xf32> to vector<16x96xf32>
    %888 = arith.mulf %886, %887 : vector<16x96xf32>
    %889 = arith.addf %884, %888 : vector<16x96xf32>
    %c0_313 = arith.constant 0 : index
    %c0_314 = arith.constant 0 : index
    %890 = vector.load %arg10[%c0_313, %c0_314] : memref<16x96xf32, #tpu.memory_space<vmem>>, vector<16x96xf32>
    %891 = arith.addf %889, %890 : vector<16x96xf32>
    %892 = vector.extract_strided_slice %891 {offsets = [0, 0], sizes = [16, 64], strides = [1, 1]} : vector<16x96xf32> to vector<16x64xf32>
    %cst_315 = arith.constant 5.000000e-01 : f32
    %893 = vector.broadcast %cst_315 : f32 to vector<16x64xf32>
    %894 = arith.mulf %893, %892 : vector<16x64xf32>
    %895 = math.tanh %894 : vector<16x64xf32>
    %cst_316 = arith.constant 5.000000e-01 : f32
    %896 = vector.broadcast %cst_316 : f32 to vector<16x64xf32>
    %897 = arith.mulf %896, %895 : vector<16x64xf32>
    %cst_317 = arith.constant 5.000000e-01 : f32
    %898 = vector.broadcast %cst_317 : f32 to vector<16x64xf32>
    %899 = arith.addf %897, %898 : vector<16x64xf32>
    %900 = vector.extract_strided_slice %899 {offsets = [0, 0], sizes = [16, 32], strides = [1, 1]} : vector<16x64xf32> to vector<16x32xf32>
    %901 = vector.extract_strided_slice %899 {offsets = [0, 32], sizes = [16, 32], strides = [1, 1]} : vector<16x64xf32> to vector<16x32xf32>
    %902 = vector.extract_strided_slice %891 {offsets = [0, 64], sizes = [16, 32], strides = [1, 1]} : vector<16x96xf32> to vector<16x32xf32>
    %903 = vector.extract_strided_slice %883 {offsets = [0, 96], sizes = [16, 32], strides = [1, 1]} : vector<16x128xf32> to vector<16x32xf32>
    %c0_318 = arith.constant 0 : index
    %c0_319 = arith.constant 0 : index
    %904 = vector.load %arg11[%c0_318, %c0_319] : memref<16x32xf32, #tpu.memory_space<vmem>>, vector<16x32xf32>
    %905 = arith.addf %903, %904 : vector<16x32xf32>
    %906 = arith.mulf %900, %905 : vector<16x32xf32>
    %907 = arith.addf %902, %906 : vector<16x32xf32>
    %908 = math.tanh %907 : vector<16x32xf32>
    %cst_320 = arith.constant 1.000000e+00 : f32
    %909 = vector.broadcast %cst_320 : f32 to vector<16x32xf32>
    %910 = arith.subf %909, %901 : vector<16x32xf32>
    %911 = arith.mulf %910, %908 : vector<16x32xf32>
    %912 = arith.mulf %901, %779 : vector<16x32xf32>
    %913 = arith.addf %911, %912 : vector<16x32xf32>
    %914 = tpu.concatenate %913, %808 in 1 : vector<16x32xf32>, vector<16x32xf32> -> vector<16x64xf32>
    %c0_321 = arith.constant 0 : index
    %c0_322 = arith.constant 0 : index
    %915 = vector.load %arg12[%c0_321, %c0_322] : memref<64x128xbf16, #tpu.memory_space<vmem>>, vector<64x128xbf16>
    %916 = arith.truncf %914 : vector<16x64xf32> to vector<16x64xbf16>
    %cst_323 = arith.constant dense<0.000000e+00> : vector<16x128xf32>
    %917 = tpu.matmul %916, %915, %cst_323 {dimension_numbers = #tpu.dot_dimension_numbers<[1], [0], [0], [1], [0, 0, 1, 1], [], []>} : vector<16x64xbf16>, vector<64x128xbf16>, vector<16x128xf32> -> vector<16x128xf32>
    %918 = vector.extract_strided_slice %917 {offsets = [0, 0], sizes = [16, 96], strides = [1, 1]} : vector<16x128xf32> to vector<16x96xf32>
    %c0_324 = arith.constant 0 : index
    %c0_325 = arith.constant 0 : index
    %919 = vector.load %arg13[%c0_324, %c0_325] : memref<16x96xf32, #tpu.memory_space<vmem>>, vector<16x96xf32>
    %920 = arith.addf %918, %919 : vector<16x96xf32>
    %921 = vector.extract_strided_slice %920 {offsets = [0, 0], sizes = [16, 64], strides = [1, 1]} : vector<16x96xf32> to vector<16x64xf32>
    %cst_326 = arith.constant 5.000000e-01 : f32
    %922 = vector.broadcast %cst_326 : f32 to vector<16x64xf32>
    %923 = arith.mulf %922, %921 : vector<16x64xf32>
    %924 = math.tanh %923 : vector<16x64xf32>
    %cst_327 = arith.constant 5.000000e-01 : f32
    %925 = vector.broadcast %cst_327 : f32 to vector<16x64xf32>
    %926 = arith.mulf %925, %924 : vector<16x64xf32>
    %cst_328 = arith.constant 5.000000e-01 : f32
    %927 = vector.broadcast %cst_328 : f32 to vector<16x64xf32>
    %928 = arith.addf %926, %927 : vector<16x64xf32>
    %929 = vector.extract_strided_slice %928 {offsets = [0, 0], sizes = [16, 32], strides = [1, 1]} : vector<16x64xf32> to vector<16x32xf32>
    %930 = vector.extract_strided_slice %928 {offsets = [0, 32], sizes = [16, 32], strides = [1, 1]} : vector<16x64xf32> to vector<16x32xf32>
    %931 = vector.extract_strided_slice %920 {offsets = [0, 64], sizes = [16, 32], strides = [1, 1]} : vector<16x96xf32> to vector<16x32xf32>
    %932 = vector.extract_strided_slice %917 {offsets = [0, 96], sizes = [16, 32], strides = [1, 1]} : vector<16x128xf32> to vector<16x32xf32>
    %c0_329 = arith.constant 0 : index
    %c0_330 = arith.constant 0 : index
    %933 = vector.load %arg14[%c0_329, %c0_330] : memref<16x32xf32, #tpu.memory_space<vmem>>, vector<16x32xf32>
    %934 = arith.addf %932, %933 : vector<16x32xf32>
    %935 = arith.mulf %929, %934 : vector<16x32xf32>
    %936 = arith.addf %931, %935 : vector<16x32xf32>
    %937 = math.tanh %936 : vector<16x32xf32>
    %cst_331 = arith.constant 1.000000e+00 : f32
    %938 = vector.broadcast %cst_331 : f32 to vector<16x32xf32>
    %939 = arith.subf %938, %930 : vector<16x32xf32>
    %940 = arith.mulf %939, %937 : vector<16x32xf32>
    %941 = arith.mulf %930, %808 : vector<16x32xf32>
    %942 = arith.addf %940, %941 : vector<16x32xf32>
    %c7_i32 = arith.constant 7 : i32
    %943 = arith.index_cast %c7_i32 : i32 to index
    %c0_332 = arith.constant 0 : index
    %c0_333 = arith.constant 0 : index
    %944 = vector.load %arg0[%943, %c0_332, %c0_333] : memref<8x16x1xf32, #tpu.memory_space<vmem>>, vector<1x16x1xf32>
    %945 = vector.shape_cast %944 : vector<1x16x1xf32> to vector<16x1xf32>
    %946 = arith.index_cast %c7_i32 : i32 to index
    %c0_334 = arith.constant 0 : index
    %c0_335 = arith.constant 0 : index
    %947 = vector.load %arg1[%946, %c0_334, %c0_335] : memref<8x8x1xf32, #tpu.memory_space<vmem>>, vector<1x8x1xf32>
    %948 = vector.shape_cast %947 : vector<1x8x1xf32> to vector<8x1xf32>
    %949 = arith.index_cast %c7_i32 : i32 to index
    %c0_336 = arith.constant 0 : index
    %c0_337 = arith.constant 0 : index
    %950 = vector.load %arg2[%949, %c0_336, %c0_337] : memref<8x8x1xf32, #tpu.memory_space<vmem>>, vector<1x8x1xf32>
    %951 = vector.shape_cast %950 : vector<1x8x1xf32> to vector<8x1xf32>
    %c0_338 = arith.constant 0 : index
    %c0_339 = arith.constant 0 : index
    %952 = vector.load %arg4[%c0_338, %c0_339] : memref<32x64xbf16, #tpu.memory_space<vmem>>, vector<32x64xbf16>
    %953 = arith.truncf %942 : vector<16x32xf32> to vector<16x32xbf16>
    %cst_340 = arith.constant dense<0.000000e+00> : vector<16x64xf32>
    %954 = tpu.matmul %953, %952, %cst_340 {dimension_numbers = #tpu.dot_dimension_numbers<[1], [0], [0], [1], [0, 0, 1, 1], [], []>} : vector<16x32xbf16>, vector<32x64xbf16>, vector<16x64xf32> -> vector<16x64xf32>
    %c0_341 = arith.constant 0 : index
    %c0_342 = arith.constant 0 : index
    %955 = vector.load %arg3[%c0_341, %c0_342] : memref<1x64xf32, #tpu.memory_space<vmem>>, vector<1x64xf32>
    %956 = vector.broadcast %945 : vector<16x1xf32> to vector<16x64xf32>
    %957 = vector.broadcast %955 : vector<1x64xf32> to vector<16x64xf32>
    %958 = arith.mulf %956, %957 : vector<16x64xf32>
    %959 = arith.addf %954, %958 : vector<16x64xf32>
    %c0_343 = arith.constant 0 : index
    %c0_344 = arith.constant 0 : index
    %960 = vector.load %arg5[%c0_343, %c0_344] : memref<16x64xf32, #tpu.memory_space<vmem>>, vector<16x64xf32>
    %961 = arith.addf %959, %960 : vector<16x64xf32>
    %cst_345 = arith.constant 0.000000e+00 : f32
    %962 = vector.broadcast %cst_345 : f32 to vector<16x64xf32>
    %963 = arith.maximumf %961, %962 : vector<16x64xf32>
    %c0_346 = arith.constant 0 : index
    %c0_347 = arith.constant 0 : index
    %964 = vector.load %arg6[%c0_346, %c0_347] : memref<64x4xbf16, #tpu.memory_space<vmem>>, vector<64x4xbf16>
    %965 = arith.truncf %963 : vector<16x64xf32> to vector<16x64xbf16>
    %cst_348 = arith.constant dense<0.000000e+00> : vector<16x4xf32>
    %966 = tpu.matmul %965, %964, %cst_348 {dimension_numbers = #tpu.dot_dimension_numbers<[1], [0], [0], [1], [0, 0, 1, 1], [], []>} : vector<16x64xbf16>, vector<64x4xbf16>, vector<16x4xf32> -> vector<16x4xf32>
    %c0_349 = arith.constant 0 : index
    %c0_350 = arith.constant 0 : index
    %967 = vector.load %arg7[%c0_349, %c0_350] : memref<16x4xf32, #tpu.memory_space<vmem>>, vector<16x4xf32>
    %968 = arith.addf %966, %967 : vector<16x4xf32>
    %969 = vector.extract_strided_slice %968 {offsets = [0, 2], sizes = [16, 2], strides = [1, 1]} : vector<16x4xf32> to vector<16x2xf32>
    %cst_351 = arith.constant 0.000000e+00 : f32
    %970 = vector.broadcast %cst_351 : f32 to vector<16x2xf32>
    %971 = arith.maximumf %969, %970 : vector<16x2xf32>
    %972 = math.absf %969 : vector<16x2xf32>
    %cst_352 = arith.constant 0.000000e+00 : f32
    %973 = vector.broadcast %cst_352 : f32 to vector<16x2xf32>
    %974 = arith.subf %973, %972 : vector<16x2xf32>
    %975 = math.exp %974 : vector<16x2xf32>
    %cst_353 = arith.constant 1.000000e+00 : f32
    %976 = vector.broadcast %cst_353 : f32 to vector<16x2xf32>
    %977 = arith.addf %976, %975 : vector<16x2xf32>
    %978 = math.log %977 : vector<16x2xf32>
    %979 = arith.addf %971, %978 : vector<16x2xf32>
    %980 = math.log %979 : vector<16x2xf32>
    %981 = vector.extract_strided_slice %968 {offsets = [0, 0], sizes = [8, 1], strides = [1, 1]} : vector<16x4xf32> to vector<8x1xf32>
    %982 = vector.extract_strided_slice %979 {offsets = [0, 0], sizes = [8, 1], strides = [1, 1]} : vector<16x2xf32> to vector<8x1xf32>
    %983 = vector.extract_strided_slice %980 {offsets = [0, 0], sizes = [8, 1], strides = [1, 1]} : vector<16x2xf32> to vector<8x1xf32>
    %984 = vector.extract_strided_slice %968 {offsets = [0, 1], sizes = [16, 1], strides = [1, 1]} : vector<16x4xf32> to vector<16x1xf32>
    %985 = vector.extract_strided_slice %979 {offsets = [0, 1], sizes = [16, 1], strides = [1, 1]} : vector<16x2xf32> to vector<16x1xf32>
    %986 = vector.extract_strided_slice %980 {offsets = [0, 1], sizes = [16, 1], strides = [1, 1]} : vector<16x2xf32> to vector<16x1xf32>
    %987 = vector.extract_strided_slice %986 {offsets = [0, 0], sizes = [8, 1], strides = [1, 1]} : vector<16x1xf32> to vector<8x1xf32>
    %988 = arith.subf %987, %983 : vector<8x1xf32>
    %989 = arith.mulf %982, %982 : vector<8x1xf32>
    %990 = vector.extract_strided_slice %984 {offsets = [0, 0], sizes = [8, 1], strides = [1, 1]} : vector<16x1xf32> to vector<8x1xf32>
    %991 = arith.subf %981, %990 : vector<8x1xf32>
    %992 = arith.mulf %991, %991 : vector<8x1xf32>
    %993 = arith.addf %989, %992 : vector<8x1xf32>
    %994 = vector.extract_strided_slice %985 {offsets = [0, 0], sizes = [8, 1], strides = [1, 1]} : vector<16x1xf32> to vector<8x1xf32>
    %cst_354 = arith.constant 2.000000e+00 : f32
    %995 = vector.broadcast %cst_354 : f32 to vector<8x1xf32>
    %996 = arith.mulf %995, %994 : vector<8x1xf32>
    %997 = vector.extract_strided_slice %985 {offsets = [0, 0], sizes = [8, 1], strides = [1, 1]} : vector<16x1xf32> to vector<8x1xf32>
    %998 = arith.mulf %996, %997 : vector<8x1xf32>
    %999 = arith.divf %993, %998 : vector<8x1xf32>
    %1000 = arith.addf %988, %999 : vector<8x1xf32>
    %1001 = arith.addf %867, %1000 : vector<8x1xf32>
    %1002 = arith.mulf %948, %982 : vector<8x1xf32>
    %1003 = arith.addf %1002, %981 : vector<8x1xf32>
    %1004 = vector.extract_strided_slice %945 {offsets = [0, 0], sizes = [8, 1], strides = [1, 1]} : vector<16x1xf32> to vector<8x1xf32>
    %1005 = arith.subf %1004, %1003 : vector<8x1xf32>
    %1006 = arith.mulf %1005, %1005 : vector<8x1xf32>
    %1007 = arith.addf %873, %1006 : vector<8x1xf32>
    %1008 = vector.extract_strided_slice %985 {offsets = [8, 0], sizes = [8, 1], strides = [1, 1]} : vector<16x1xf32> to vector<8x1xf32>
    %1009 = arith.mulf %951, %1008 : vector<8x1xf32>
    %1010 = vector.extract_strided_slice %984 {offsets = [8, 0], sizes = [8, 1], strides = [1, 1]} : vector<16x1xf32> to vector<8x1xf32>
    %1011 = arith.addf %1009, %1010 : vector<8x1xf32>
    %1012 = vector.extract_strided_slice %986 {offsets = [8, 0], sizes = [8, 1], strides = [1, 1]} : vector<16x1xf32> to vector<8x1xf32>
    %1013 = arith.addf %879, %1012 : vector<8x1xf32>
    %1014 = tpu.concatenate %1003, %1011 in 0 : vector<8x1xf32>, vector<8x1xf32> -> vector<16x1xf32>
    %c0_355 = arith.constant 0 : index
    %c0_356 = arith.constant 0 : index
    %1015 = vector.load %arg8[%c0_355, %c0_356] : memref<32x128xbf16, #tpu.memory_space<vmem>>, vector<32x128xbf16>
    %1016 = arith.truncf %913 : vector<16x32xf32> to vector<16x32xbf16>
    %cst_357 = arith.constant dense<0.000000e+00> : vector<16x128xf32>
    %1017 = tpu.matmul %1016, %1015, %cst_357 {dimension_numbers = #tpu.dot_dimension_numbers<[1], [0], [0], [1], [0, 0, 1, 1], [], []>} : vector<16x32xbf16>, vector<32x128xbf16>, vector<16x128xf32> -> vector<16x128xf32>
    %1018 = vector.extract_strided_slice %1017 {offsets = [0, 0], sizes = [16, 96], strides = [1, 1]} : vector<16x128xf32> to vector<16x96xf32>
    %c0_358 = arith.constant 0 : index
    %c0_359 = arith.constant 0 : index
    %1019 = vector.load %arg9[%c0_358, %c0_359] : memref<1x96xf32, #tpu.memory_space<vmem>>, vector<1x96xf32>
    %1020 = vector.broadcast %1014 : vector<16x1xf32> to vector<16x96xf32>
    %1021 = vector.broadcast %1019 : vector<1x96xf32> to vector<16x96xf32>
    %1022 = arith.mulf %1020, %1021 : vector<16x96xf32>
    %1023 = arith.addf %1018, %1022 : vector<16x96xf32>
    %c0_360 = arith.constant 0 : index
    %c0_361 = arith.constant 0 : index
    %1024 = vector.load %arg10[%c0_360, %c0_361] : memref<16x96xf32, #tpu.memory_space<vmem>>, vector<16x96xf32>
    %1025 = arith.addf %1023, %1024 : vector<16x96xf32>
    %1026 = vector.extract_strided_slice %1025 {offsets = [0, 0], sizes = [16, 64], strides = [1, 1]} : vector<16x96xf32> to vector<16x64xf32>
    %cst_362 = arith.constant 5.000000e-01 : f32
    %1027 = vector.broadcast %cst_362 : f32 to vector<16x64xf32>
    %1028 = arith.mulf %1027, %1026 : vector<16x64xf32>
    %1029 = math.tanh %1028 : vector<16x64xf32>
    %cst_363 = arith.constant 5.000000e-01 : f32
    %1030 = vector.broadcast %cst_363 : f32 to vector<16x64xf32>
    %1031 = arith.mulf %1030, %1029 : vector<16x64xf32>
    %cst_364 = arith.constant 5.000000e-01 : f32
    %1032 = vector.broadcast %cst_364 : f32 to vector<16x64xf32>
    %1033 = arith.addf %1031, %1032 : vector<16x64xf32>
    %1034 = vector.extract_strided_slice %1033 {offsets = [0, 0], sizes = [16, 32], strides = [1, 1]} : vector<16x64xf32> to vector<16x32xf32>
    %1035 = vector.extract_strided_slice %1033 {offsets = [0, 32], sizes = [16, 32], strides = [1, 1]} : vector<16x64xf32> to vector<16x32xf32>
    %1036 = vector.extract_strided_slice %1025 {offsets = [0, 64], sizes = [16, 32], strides = [1, 1]} : vector<16x96xf32> to vector<16x32xf32>
    %1037 = vector.extract_strided_slice %1017 {offsets = [0, 96], sizes = [16, 32], strides = [1, 1]} : vector<16x128xf32> to vector<16x32xf32>
    %c0_365 = arith.constant 0 : index
    %c0_366 = arith.constant 0 : index
    %1038 = vector.load %arg11[%c0_365, %c0_366] : memref<16x32xf32, #tpu.memory_space<vmem>>, vector<16x32xf32>
    %1039 = arith.addf %1037, %1038 : vector<16x32xf32>
    %1040 = arith.mulf %1034, %1039 : vector<16x32xf32>
    %1041 = arith.addf %1036, %1040 : vector<16x32xf32>
    %1042 = math.tanh %1041 : vector<16x32xf32>
    %cst_367 = arith.constant 1.000000e+00 : f32
    %1043 = vector.broadcast %cst_367 : f32 to vector<16x32xf32>
    %1044 = arith.subf %1043, %1035 : vector<16x32xf32>
    %1045 = arith.mulf %1044, %1042 : vector<16x32xf32>
    %1046 = arith.mulf %1035, %913 : vector<16x32xf32>
    %1047 = arith.addf %1045, %1046 : vector<16x32xf32>
    %1048 = tpu.concatenate %1047, %942 in 1 : vector<16x32xf32>, vector<16x32xf32> -> vector<16x64xf32>
    %c0_368 = arith.constant 0 : index
    %c0_369 = arith.constant 0 : index
    %1049 = vector.load %arg12[%c0_368, %c0_369] : memref<64x128xbf16, #tpu.memory_space<vmem>>, vector<64x128xbf16>
    %1050 = arith.truncf %1048 : vector<16x64xf32> to vector<16x64xbf16>
    %cst_370 = arith.constant dense<0.000000e+00> : vector<16x128xf32>
    %1051 = tpu.matmul %1050, %1049, %cst_370 {dimension_numbers = #tpu.dot_dimension_numbers<[1], [0], [0], [1], [0, 0, 1, 1], [], []>} : vector<16x64xbf16>, vector<64x128xbf16>, vector<16x128xf32> -> vector<16x128xf32>
    %1052 = vector.extract_strided_slice %1051 {offsets = [0, 0], sizes = [16, 96], strides = [1, 1]} : vector<16x128xf32> to vector<16x96xf32>
    %c0_371 = arith.constant 0 : index
    %c0_372 = arith.constant 0 : index
    %1053 = vector.load %arg13[%c0_371, %c0_372] : memref<16x96xf32, #tpu.memory_space<vmem>>, vector<16x96xf32>
    %1054 = arith.addf %1052, %1053 : vector<16x96xf32>
    %1055 = vector.extract_strided_slice %1054 {offsets = [0, 0], sizes = [16, 64], strides = [1, 1]} : vector<16x96xf32> to vector<16x64xf32>
    %cst_373 = arith.constant 5.000000e-01 : f32
    %1056 = vector.broadcast %cst_373 : f32 to vector<16x64xf32>
    %1057 = arith.mulf %1056, %1055 : vector<16x64xf32>
    %1058 = math.tanh %1057 : vector<16x64xf32>
    %cst_374 = arith.constant 5.000000e-01 : f32
    %1059 = vector.broadcast %cst_374 : f32 to vector<16x64xf32>
    %1060 = arith.mulf %1059, %1058 : vector<16x64xf32>
    %cst_375 = arith.constant 5.000000e-01 : f32
    %1061 = vector.broadcast %cst_375 : f32 to vector<16x64xf32>
    %1062 = arith.addf %1060, %1061 : vector<16x64xf32>
    %1063 = vector.extract_strided_slice %1062 {offsets = [0, 0], sizes = [16, 32], strides = [1, 1]} : vector<16x64xf32> to vector<16x32xf32>
    %1064 = vector.extract_strided_slice %1062 {offsets = [0, 32], sizes = [16, 32], strides = [1, 1]} : vector<16x64xf32> to vector<16x32xf32>
    %1065 = vector.extract_strided_slice %1054 {offsets = [0, 64], sizes = [16, 32], strides = [1, 1]} : vector<16x96xf32> to vector<16x32xf32>
    %1066 = vector.extract_strided_slice %1051 {offsets = [0, 96], sizes = [16, 32], strides = [1, 1]} : vector<16x128xf32> to vector<16x32xf32>
    %c0_376 = arith.constant 0 : index
    %c0_377 = arith.constant 0 : index
    %1067 = vector.load %arg14[%c0_376, %c0_377] : memref<16x32xf32, #tpu.memory_space<vmem>>, vector<16x32xf32>
    %1068 = arith.addf %1066, %1067 : vector<16x32xf32>
    %1069 = arith.mulf %1063, %1068 : vector<16x32xf32>
    %1070 = arith.addf %1065, %1069 : vector<16x32xf32>
    %1071 = math.tanh %1070 : vector<16x32xf32>
    %cst_378 = arith.constant 1.000000e+00 : f32
    %1072 = vector.broadcast %cst_378 : f32 to vector<16x32xf32>
    %1073 = arith.subf %1072, %1064 : vector<16x32xf32>
    %1074 = arith.mulf %1073, %1071 : vector<16x32xf32>
    %1075 = arith.mulf %1064, %942 : vector<16x32xf32>
    %1076 = arith.addf %1074, %1075 : vector<16x32xf32>
    %c8_i32 = arith.constant 8 : i32
    %1077 = vector.shape_cast %1001 : vector<8x1xf32> to vector<1x8x1xf32>
    %cst_379 = arith.constant dense<0.000000e+00> : vector<1xf32>
    %1078 = vector.multi_reduction <add>, %1077, %cst_379 [1, 2] : vector<1x8x1xf32> to vector<1xf32>
    %1079 = vector.shape_cast %1078 : vector<1xf32> to vector<1x1x1xf32>
    %1080 = vector.extract %1079[0, 0, 0] : f32 from vector<1x1x1xf32>
    %1081 = vector.broadcast %1080 : f32 to vector<1x1xf32>
    %cst_380 = arith.constant 1.250000e-01 : f32
    %1082 = vector.broadcast %cst_380 : f32 to vector<1x1xf32>
    %1083 = arith.mulf %1081, %1082 : vector<1x1xf32>
    %cst_381 = arith.constant 4.000000e+00 : f32
    %1084 = vector.broadcast %cst_381 : f32 to vector<1x1xf32>
    %1085 = arith.subf %1083, %1084 : vector<1x1xf32>
    %1086 = vector.shape_cast %1007 : vector<8x1xf32> to vector<1x8x1xf32>
    %cst_382 = arith.constant dense<0.000000e+00> : vector<1xf32>
    %1087 = vector.multi_reduction <add>, %1086, %cst_382 [1, 2] : vector<1x8x1xf32> to vector<1xf32>
    %1088 = vector.shape_cast %1087 : vector<1xf32> to vector<1x1x1xf32>
    %1089 = vector.extract %1088[0, 0, 0] : f32 from vector<1x1x1xf32>
    %1090 = vector.broadcast %1089 : f32 to vector<1x1xf32>
    %cst_383 = arith.constant 6.250000e+00 : f32
    %1091 = vector.broadcast %cst_383 : f32 to vector<1x1xf32>
    %1092 = arith.mulf %1090, %1091 : vector<1x1xf32>
    %cst_384 = arith.constant -11.0691729 : f32
    %1093 = vector.broadcast %cst_384 : f32 to vector<1x1xf32>
    %1094 = arith.addf %1092, %1093 : vector<1x1xf32>
    %1095 = vector.shape_cast %1013 : vector<8x1xf32> to vector<1x8x1xf32>
    %cst_385 = arith.constant dense<0.000000e+00> : vector<1xf32>
    %1096 = vector.multi_reduction <add>, %1095, %cst_385 [1, 2] : vector<1x8x1xf32> to vector<1xf32>
    %1097 = vector.shape_cast %1096 : vector<1xf32> to vector<1x1x1xf32>
    %1098 = vector.extract %1097[0, 0, 0] : f32 from vector<1x1x1xf32>
    %1099 = vector.broadcast %1098 : f32 to vector<1x1xf32>
    %cst_386 = arith.constant 1.250000e-01 : f32
    %1100 = vector.broadcast %cst_386 : f32 to vector<1x1xf32>
    %1101 = arith.mulf %1099, %1100 : vector<1x1xf32>
    %cst_387 = arith.constant 11.3515081 : f32
    %1102 = vector.broadcast %cst_387 : f32 to vector<1x1xf32>
    %1103 = arith.addf %1101, %1102 : vector<1x1xf32>
    %cst_388 = arith.constant 5.000000e-01 : f32
    %1104 = vector.broadcast %cst_388 : f32 to vector<1x1xf32>
    %1105 = arith.mulf %1104, %1103 : vector<1x1xf32>
    %1106 = tpu.iota {dimensions = array<i32: 1>} : vector<1x128xi32>
    %c0_i32_389 = arith.constant 0 : i32
    %1107 = vector.broadcast %c0_i32_389 : i32 to vector<1x128xi32>
    %1108 = arith.cmpi eq, %1106, %1107 : vector<1x128xi32>
    %c1_i32_390 = arith.constant 1 : i32
    %1109 = vector.broadcast %c1_i32_390 : i32 to vector<1x128xi32>
    %1110 = arith.cmpi eq, %1106, %1109 : vector<1x128xi32>
    %c2_i32_391 = arith.constant 2 : i32
    %1111 = vector.broadcast %c2_i32_391 : i32 to vector<1x128xi32>
    %1112 = arith.cmpi eq, %1106, %1111 : vector<1x128xi32>
    %cst_392 = arith.constant 0.000000e+00 : f32
    %1113 = vector.shape_cast %1105 : vector<1x1xf32> to vector<1x1xf32>
    %1114 = vector.broadcast %1113 : vector<1x1xf32> to vector<1x128xf32>
    %1115 = vector.broadcast %cst_392 : f32 to vector<1x128xf32>
    %1116 = arith.select %1112, %1114, %1115 : vector<1x128xi1>, vector<1x128xf32>
    %1117 = vector.shape_cast %1094 : vector<1x1xf32> to vector<1x1xf32>
    %1118 = vector.broadcast %1117 : vector<1x1xf32> to vector<1x128xf32>
    %1119 = arith.select %1110, %1118, %1116 : vector<1x128xi1>, vector<1x128xf32>
    %1120 = vector.shape_cast %1085 : vector<1x1xf32> to vector<1x1xf32>
    %1121 = vector.broadcast %1120 : vector<1x1xf32> to vector<1x128xf32>
    %1122 = arith.select %1108, %1121, %1119 : vector<1x128xi1>, vector<1x128xf32>
    %c0_393 = arith.constant 0 : index
    %c0_394 = arith.constant 0 : index
    %1123 = vector.load %arg15[%c0_393, %c0_394] : memref<1x128xf32, #tpu.memory_space<vmem>>, vector<1x128xf32>
    tpu.vector_store %arg15[%c0_393, %c0_394], %1122 {strides = array<i32>} : memref<1x128xf32, #tpu.memory_space<vmem>>, vector<1x128xf32>,
    return
  }
}

</mosaic_0001>

<bundles_post_ra>
// kernel: tpu_custom_call.1
= control target key start
LH: loop header
LB: loop body
LE: loop exit
PB: predicated region body
PF: predicated region fallthrough
CT: control target
= control target key end

     0   :  { %v3013_v2 = vmov 0   ;;  %s4307_s0 = inlined_call_operand.vmem [shape: f32[8,16,1], index: 0, kind: input, shape index: {}]   ;;  %s4308_s1 = inlined_call_operand.vmem [shape: f32[8,8,1], index: 1, kind: input, shape index: {}]   ;;  %s4309_s2 = inlined_call_operand.vmem [shape: f32[8,8,1], index: 2, kind: input, shape index: {}]   ;;  %s4310_s3 = inlined_call_operand.vmem [shape: f32[1,64], index: 3, kind: input, shape index: {}]   ;;  %s4311_s4 = inlined_call_operand.vmem [shape: bf16[32,64], index: 4, kind: input, shape index: {}]   ;;  %s4312_s5 = inlined_call_operand.vmem [shape: f32[16,64], index: 5, kind: input, shape index: {}]   ;;  %s4313_s6 = inlined_call_operand.vmem [shape: bf16[64,4], index: 6, kind: input, shape index: {}]   ;;  %s4314_s7 = inlined_call_operand.vmem [shape: f32[16,4], index: 7, kind: input, shape index: {}]   ;;  %s4315_s8 = inlined_call_operand.vmem [shape: bf16[32,128], index: 8, kind: input, shape index: {}]   ;;  %s4316_s9 = inlined_call_operand.vmem [shape: f32[1,96], index: 9, kind: input, shape index: {}]   ;;  %s4317_s10 = inlined_call_operand.vmem [shape: f32[16,96], index: 10, kind: input, shape index: {}]   ;;  %s4318_s11 = inlined_call_operand.vmem [shape: f32[16,32], index: 11, kind: input, shape index: {}]   ;;  %s4319_s12 = inlined_call_operand.vmem [shape: bf16[64,128], index: 12, kind: input, shape index: {}]   ;;  %s4320_s13 = inlined_call_operand.vmem [shape: f32[16,96], index: 13, kind: input, shape index: {}]   ;;  %s4321_s14 = inlined_call_operand.vmem [shape: f32[16,32], index: 14, kind: input, shape index: {}]   ;;  %s4322_s15 = inlined_call_operand.hbm [shape: f32[1,128], index: 15, kind: output, shape index: {}]  }
   0x1   :  { %v3106_v0 = vld [vmem:[%s4311_s4 + $0x8] sm:$0xff]  ;;  %v3111_v1 = vld [vmem:[%s4307_s0] sm:$0xff]  ;;  %2691 = vset.pattern.permute.xlu0 %v3013_v2  ;;  %2692 = vset.pattern.permute.xlu1 %v3013_v2 }
   0x2   :  { %98 = vmatpush.bf16.msra.mxu0 %v3106_v0  ;;  %v3117_v3 = vld [vmem:[%s4311_s4] sm:$0xff]  ;;  %63 = vperm.xlu0 %2691, %v3111_v1  }
   0x3   :  { %20 = vsyncpa [#allocation3], 0  ;;  %2693 = vset.pattern.permute.xlu2 %v3013_v2  ;;  %v53_v4 = vld [vmem:[%s4307_s0 + $0x8] sm:$0xff]  ;;  %v3131_v5 = vld [vmem:[%s4313_s6 + $0x18] sm:$0xff]  ;;  %vm147_vm0 = vcmask 523264   ;;  %s3014_s20 = smov 96  }
   0x4   :  { %155 = vmatpush.bf16.msra.mxu1 %v3131_v5  ;;  %v3137_v6 = vld [vmem:[%s4313_s6 + $0x10] sm:$0xff]  ;;  %v3143_v7 = vld [vmem:[%s4313_s6 + $0x8] sm:$0xff]  ;;  %v3149_v8 = vld [vmem:[%s4313_s6] sm:$0xff]  ;;  %s3015_s21 = smov 127   ;;  %s3016_s24 = smov 126   ;;  %vm88_vm1 = vcmask 261120  }
   0x5   :  { %v3155_v10 = vld [vmem:[%s4310_s3] ss:$0 sm:$0xff]  ;;  %v3167_v18 = vld [vmem:[%s4312_s5 + $0x8] sm:$0xff]  ;;  %s3018_s25 = smov 32   ;;  %s3019_s23 = smov 64  }
   0x6   :  { %99 = vmatpush.bf16.msra.mxu0 %v3117_v3  ;;  %v3161_v15 = vld [vmem:[%s4312_s5] sm:$0xff]  ;;  %v3175_v25 = vld [vmem:[%s4315_s8 + $0x8] sm:$0xff]  ;;  %s3022_s16 = smov [#allocation2]   ;;  %s2550_s18 = sshll.u32 %s4322_s15, 4  ;;  %s2551_s18 = int_to_ptr.hbm [resolvable:$true] %s2550_s18 }
   0x7   :  { %273 = vmatpush.bf16.msra.mxu2 %v3175_v25  ;;  %v3182_v26 = vld [vmem:[%s4315_s8] sm:$0xff]  ;;  %v3208_v32 = vld [vmem:[%s4314_s7 + $0x8] sm:$0xff] }
   0x8   :  { %156 = vmatpush.bf16.msra.mxu1 %v3137_v6  ;;  %v3197_v27 = vld [vmem:[%s4314_s7] sm:$0xff]  ;;  %v312_v33 = vld [vmem:[%s4318_s11 + $0x8] sm:$0xff] }
   0x9   :  { %100 = vmatmul.bf16.vlgmr.msra.gmra.mxu0 %v3013_v2  ;;  %v311_v42 = vld [vmem:[%s4318_s11] sm:$0xff]  ;;  %s3017_s11 = smov 125  }
   0xa   :  { %515 = vmatpush.bf16.msrb.mxu0 %v3106_v0  ;;  %68 = vperm.xlu0 %2691, %v53_v4   ;;  %v54_v57 = vld [vmem:[%s4308_s1] sm:$0xff] }
   0xb   :  { %274 = vmatpush.bf16.msra.mxu2 %v3182_v26  ;;  %v55_v61 = vld [vmem:[%s4309_s2] sm:$0xff] }
   0xc   :  { %157 = vmatpush.bf16.msra.mxu1 %v3143_v7 }
   0xe   :  { %516 = vmatpush.bf16.msrb.mxu0 %v3117_v3  ;;  %275 = vmatmul.bf16.vlgmr.msra.gmra.mxu2 %v3013_v2 }
   0xf   :  { %535 = vmatpush.bf16.msrb.mxu2 %v3131_v5 }
  0x10   :  { %158 = vmatpush.bf16.msra.mxu1 %v3149_v8 }
  0x12   :  { %826 = vmatpush.bf16.msra.mxu0 %v3106_v0  ;;  %317 = vrot.lane.b32.xlu0 %v312_v33, %s3014_s20 }
  0x13   :  { %536 = vmatpush.bf16.msrb.mxu2 %v3137_v6 }
  0x14   :  { %644 = vmatpush.bf16.msrb.mxu1 %v3175_v25 }
  0x16   :  { %827 = vmatpush.bf16.msra.mxu0 %v3117_v3 }
  0x17   :  { %537 = vmatpush.bf16.msrb.mxu2 %v3143_v7 }
  0x18   :  { %645 = vmatpush.bf16.msrb.mxu1 %v3182_v26 }
  0x1b   :  { %538 = vmatpush.bf16.msrb.mxu2 %v3149_v8 }
  0x1f   :  { %846 = vmatpush.bf16.msra.mxu2 %v3131_v5 }
  0x23   :  { %847 = vmatpush.bf16.msra.mxu2 %v3137_v6 }
  0x27   :  { %848 = vmatpush.bf16.msra.mxu2 %v3143_v7 }
  0x2b   :  { %849 = vmatpush.bf16.msra.mxu2 %v3149_v8 }
  0x74   :  { %v64_v9 = vpop.permute.xlu0 %63 }
  0x75   :  { %v74_v12 = vmul.f32 %v3155_v10, %v64_v9 }
  0x7c   :  { %v69_v13 = vpop.permute.xlu0 %68 }
  0x7d   :  { %v75_v16 = vmul.f32 %v3155_v10, %v69_v13 }
  0x84   :  { %v3243_v63 = vpop.permute.xlu0 %317 }
  0x86   :  { %v101_v11 = vpop.f32.mrf.mxu0 }
  0x87   :  { %v102_v14 = vadd.f32 %v101_v11, %v74_v12  ;;  %v3250_v12 = vld [vmem:[%s4316_s9] ss:$0 sm:$0xff] }
  0x89   :  { %v108_v19 = vadd.f32 %v3161_v15, %v102_v14 }
  0x8b   :  { %v110_v22 = vmax.f32 %v108_v19, 0.0 }
  0x8e   :  { %v103_v17 = vpop.f32.mrf.mxu0 }
  0x8f   :  { %v104_v20 = vadd.f32 %v103_v17, %v75_v16  ;;  %v3256_v16 = vld [vmem:[%s4317_s10 + $0x8] sm:$0xff] }
  0x91   :  { %v109_v21 = vadd.f32 %v3167_v18, %v104_v20  ;;  %v276_v55 = vpop.f32.mrf.mxu2 }
  0x93   :  { %v111_v23 = vmax.f32 %v109_v21, 0.0 }
  0x95   :  { %v120_v24 = vpack.c.bf16 %v111_v23, %v110_v22 }
  0x97   :  { %2583 = vmatmul.msk.bf16.vlgmr.msra.gmra.mxu1 %vm147_vm0, %v120_v24  ;;  %v3263_v24 = vld [vmem:[%s4317_s10] sm:$0xff] }
  0x98   :  { %955 = vmatpush.bf16.msra.mxu1 %v3175_v25 }
  0x99   :  { %v278_v62 = vpop.f32.mrf.mxu2 }
  0x9a   :  { %v322_v9 = vadd.f32 %v3243_v63, %v278_v62 }
  0x9c   :  { %956 = vmatpush.bf16.msra.mxu1 %v3182_v26 }
 0x114   :  { %v160_v28 = vpop.f32.mrf.mxu1 }
 0x115   :  { %v3200_v29 = vadd.f32 %v160_v28, %v3197_v27 }
 0x117   :  { %v167_v30 = vand.u32 2147483647, %v3200_v29  ;;  %v165_v46 = vmax.f32 %v3200_v29, 0.0 }
 0x119   :  { %v169_v31 = vsub.f32 0.0, %v167_v30 }
 0x11b   :  { %v171_v34 = vmul.f32 1.442695, %v169_v31 }
 0x11c   :  { %v162_v35 = vpop.f32.mrf.mxu1 }
 0x11d   :  { %2731 = vpow2.f32 %v171_v34  ;;  %v163_v36 = vadd.f32 %v162_v35, %v3208_v32 }
 0x11f   :  { %v168_v37 = vand.u32 2147483647, %v163_v36  ;;  %246 = vrot.lane.b32.xlu2 %v163_v36, %s3015_s21  ;;  %v166_v50 = vmax.f32 %v163_v36, 0.0 }
 0x121   :  { %v170_v38 = vsub.f32 0.0, %v168_v37 }
 0x123   :  { %v2732_v39 = vpop.eup %2731  ;;  %v173_v40 = vmul.f32 1.442695, %v170_v38 }
 0x124   :  { %v175_v41 = vadd.f32 1.0, %v2732_v39 }
 0x125   :  { %2733 = vpow2.f32 %v173_v40 }
 0x126   :  { %2735 = vlog2.f32 %v175_v41 }
 0x127   :  { %315 = vrot.lane.b32.xlu2 %v311_v42, %s3014_s20 }
 0x12b   :  { %v2734_v43 = vpop.eup %2733 }
 0x12c   :  { %v2736_v44 = vpop.eup %2735  ;;  %v176_v45 = vadd.f32 1.0, %v2734_v43 }
 0x12d   :  { %v178_v47 = vmul.f32 0.6931472, %v2736_v44 }
 0x12e   :  { %2737 = vlog2.f32 %v176_v45 }
 0x12f   :  { %v3221_v48 = vadd.f32 %v178_v47, %v165_v46 }
 0x131   :  { %232 = vrot.lane.b32.xlu1 %v3221_v48, %s3016_s24 }
 0x134   :  { %v2738_v49 = vpop.eup %2737 }
 0x135   :  { %v180_v51 = vmul.f32 0.6931472, %v2738_v49  ;;  %v3273_v49 = vld [vmem:[%s4319_s12 + $0x18] sm:$0xff] }
 0x136   :  { %411 = vmatpush.bf16.msra.mxu3 %v3273_v49 }
 0x137   :  { %v3225_v52 = vadd.f32 %v180_v51, %v166_v50  ;;  %v3279_v50 = vld [vmem:[%s4319_s12 + $0x10] sm:$0xff]  ;;  %v3285_v51 = vld [vmem:[%s4319_s12 + $0x8] sm:$0xff] }
 0x139   :  { %241 = vrot.lane.b32.xlu1 %v3225_v52, %s3017_s11 }
 0x13a   :  { %412 = vmatpush.bf16.msra.mxu3 %v3279_v50 }
 0x13e   :  { %413 = vmatpush.bf16.msra.mxu3 %v3285_v51 }
 0x179   :  { %v247_v53 = vpop.permute.xlu2 %246 }
 0x181   :  { %v3229_v54 = vpop.permute.xlu2 %315 }
 0x182   :  { %v321_v56 = vadd.f32 %v3229_v54, %v276_v55 }
 0x184   :  { %325 = vrot.lane.b32.xlu0 %v321_v56, %s3018_s25 }
 0x1a3   :  { %v233_v58 = vpop.permute.xlu1 %232 }
 0x1a4   :  { %v235_v59 = vmul.f32 %v233_v58, %v54_v57 }
 0x1a6   :  { %v3237_v60 = vadd.f32 %v235_v59, %v3200_v29 }
 0x1a8   :  { %284 = vperm.xlu1 %2692, %v3237_v60  }
 0x1ab   :  { %v242_v2 = vpop.permute.xlu1 %241 }
 0x1ac   :  { %v244_v4 = vmul.f32 %v242_v2, %v55_v61 }
 0x1ae   :  { %v249_v11 = vadd.f32 %v247_v53, %v244_v4 }
 0x1b0   :  { %289 = vperm.xlu2 %2693, %v249_v11   ;;  %327 = vrot.lane.b32.xlu1 %v322_v9, %s3018_s25  ;;  %v3298_v11 = vld [vmem:[%s4319_s12] sm:$0xff] }
 0x1b1   :  { %414 = vmatpush.bf16.msra.mxu3 %v3298_v11 }
 0x1b5   :  { %734 = vmatpush.bf16.msrb.mxu3 %v3273_v49 }
 0x1b9   :  { %735 = vmatpush.bf16.msrb.mxu3 %v3279_v50 }
 0x1bd   :  { %736 = vmatpush.bf16.msrb.mxu3 %v3285_v51 }
 0x1c1   :  { %737 = vmatpush.bf16.msrb.mxu3 %v3298_v11 }
 0x1f6   :  { %v326_v40 = vpop.permute.xlu0 %325 }
 0x20a   :  { %v290_v13 = vpop.permute.xlu2 %289 }
 0x20b   :  { %v296_v14 = vmul.f32 %v3250_v12, %v290_v13  ;;  %v433_v13 = vld [vmem:[%s4321_s14] sm:$0xff] }
 0x20d   :  { %v298_v17 = vadd.f32 %v296_v14, %v278_v62  ;;  %v434_v14 = vld [vmem:[%s4321_s14 + $0x8] sm:$0xff] }
 0x20f   :  { %v302_v19 = vadd.f32 %v3256_v16, %v298_v17 }
 0x211   :  { %v304_v20 = vmul.f32 0.5, %v302_v19 }
 0x213   :  { %2739 = vtanh.f32 %v304_v20 }
 0x219   :  { %v2740_v21 = vpop.eup %2739 }
 0x21a   :  { %v285_v22 = vpop.permute.xlu1 %284  ;;  %v308_v30 = vmul.f32 0.5, %v2740_v21 }
 0x21b   :  { %v295_v23 = vmul.f32 %v3250_v12, %v285_v22 }
 0x21c   :  { %v310_v34 = vadd.f32 0.5, %v308_v30 }
 0x21d   :  { %v297_v28 = vadd.f32 %v295_v23, %v276_v55 }
 0x21e   :  { %v346_v55 = vsub.f32 1.0, %v310_v34  ;;  %v358_v59 = vmul.f32 0.0, %v310_v34 }
 0x21f   :  { %v301_v31 = vadd.f32 %v3263_v24, %v297_v28 }
 0x221   :  { %v303_v33 = vmul.f32 0.5, %v301_v31 }
 0x222   :  { %v328_v35 = vpop.permute.xlu1 %327 }
 0x223   :  { %2741 = vtanh.f32 %v303_v33  ;;  %v332_v36 = vmul.f32 %v328_v35, %v310_v34 }
 0x225   :  { %337 = vrot.lane.b32.xlu0 %v332_v36, %s3019_s23  ;;  %v3331_v36 = vld [vmem:[%s4320_s13] sm:$0xff] }
 0x229   :  { %v2742_v37 = vpop.eup %2741 }
 0x22a   :  { %v307_v38 = vmul.f32 0.5, %v2742_v37 }
 0x22c   :  { %v309_v39 = vadd.f32 0.5, %v307_v38 }
 0x22e   :  { %v331_v41 = vmul.f32 %v326_v40, %v309_v39  ;;  %v345_v57 = vsub.f32 1.0, %v309_v39  ;;  %v357_v61 = vmul.f32 0.0, %v309_v39  ;;  %v3337_v39 = vld [vmem:[%s4320_s13 + $0x8] sm:$0xff] }
 0x230   :  { %335 = vrot.lane.b32.xlu2 %v331_v41, %s3019_s23 }
 0x28a   :  { %v336_v42 = vpop.permute.xlu2 %335 }
 0x28b   :  { %v341_v43 = vadd.f32 %v336_v42, %v301_v31 }
 0x28d   :  { %2743 = vtanh.f32 %v341_v43 }
 0x293   :  { %v2744_v44 = vpop.eup %2743 }
 0x294   :  { %349 = vrot.lane.b32.xlu1 %v2744_v44, %s3014_s20 }
 0x297   :  { %v338_v45 = vpop.permute.xlu0 %337 }
 0x298   :  { %v342_v46 = vadd.f32 %v338_v45, %v302_v19 }
 0x29a   :  { %2745 = vtanh.f32 %v342_v46 }
 0x29c   :  { %437 = vrot.lane.b32.xlu1 %v433_v13, %s3014_s20 }
 0x2a0   :  { %v2746_v47 = vpop.eup %2745 }
 0x2a1   :  { %351 = vrot.lane.b32.xlu2 %v2746_v47, %s3014_s20 }
 0x2a9   :  { %439 = vrot.lane.b32.xlu2 %v434_v14, %s3014_s20 }
 0x2fb   :  { %v352_v53 = vpop.permute.xlu2 %351 }
 0x2fc   :  { %v356_v56 = vmul.f32 %v352_v53, %v346_v55 }
 0x2fe   :  { %v3288_v2 = vadd.f32 %v358_v59, %v356_v56 }
 0x303   :  { %v3324_v33 = vpop.permute.xlu2 %439 }
 0x306   :  { %v350_v58 = vpop.permute.xlu1 %349 }
 0x307   :  { %v355_v62 = vmul.f32 %v350_v58, %v345_v57 }
 0x309   :  { %v3290_v4 = vadd.f32 %v357_v61, %v355_v62  ;;  %v3346_v62 = vld [vmem:[%s4307_s0 + $0x10] sm:$0xff] }
 0x30b   :  { %v2694_v9 = vpack.i.bf16 %v3288_v2, %v3290_v4 }
 0x30d   :  { %2695 = vrot.lane.b32.xlu0 %v2694_v9, %s3014_s20 }
 0x30e   :  { %v3320_v28 = vpop.permute.xlu1 %437 }
 0x37f   :  { %v2696_v17 = vpop.permute.xlu0 %2695 }
 0x380   :  { %v2698_v19 = vunpack.i.h.bf16 %v2696_v17  ;;  %v2697_v20 = vunpack.i.l.bf16 %v2696_v17  ;;  %v2610_v17 = vld [vmem:[%s4307_s0 + $0x18] sm:$0xff] }
 0x382   :  { %v369_v21 = vsel %vm88_vm1, %v2697_v20, 0.0  ;;  %v370_v22 = vsel %vm88_vm1, %v2698_v19, 0.0 }
 0x383   :  { %v379_v23 = vpack.c.bf16 %v370_v22, %v369_v21 }
 0x385   :  { %2608 = vmatmul.msk.bf16.vlgmr.msra.gmra.mxu3 %vm147_vm0, %v379_v23 }
 0x386   :  { %1045 = vmatpush.bf16.msra.mxu3 %v3273_v49 }
 0x38a   :  { %1046 = vmatpush.bf16.msra.mxu3 %v3279_v50 }
 0x38e   :  { %1047 = vmatpush.bf16.msra.mxu3 %v3285_v51 }
 0x392   :  { %1048 = vmatpush.bf16.msra.mxu3 %v3298_v11 }
 0x408   :  { %v416_v30 = vpop.f32.mrf.mxu3 }
 0x409   :  { %v443_v31 = vadd.f32 %v3320_v28, %v416_v30  ;;  %v423_v37 = vadd.f32 %v3331_v36, %v416_v30 }
 0x40b   :  { %447 = vrot.lane.b32.xlu0 %v443_v31, %s3018_s25  ;;  %v425_v38 = vmul.f32 0.5, %v423_v37 }
 0x40d   :  { %2747 = vtanh.f32 %v425_v38 }
 0x410   :  { %v418_v34 = vpop.f32.mrf.mxu3 }
 0x411   :  { %v444_v35 = vadd.f32 %v3324_v33, %v418_v34  ;;  %v424_v40 = vadd.f32 %v3337_v39, %v418_v34 }
 0x413   :  { %449 = vrot.lane.b32.xlu1 %v444_v35, %s3018_s25  ;;  %v426_v41 = vmul.f32 0.5, %v424_v40  ;;  %v2748_v42 = vpop.eup %2747 }
 0x414   :  { %v429_v43 = vmul.f32 0.5, %v2748_v42 }
 0x415   :  { %2749 = vtanh.f32 %v426_v41 }
 0x416   :  { %v431_v44 = vadd.f32 0.5, %v429_v43 }
 0x418   :  { %v467_v20 = vsub.f32 1.0, %v431_v44  ;;  %v479_v30 = vmul.f32 0.0, %v431_v44 }
 0x41b   :  { %v2750_v45 = vpop.eup %2749 }
 0x41c   :  { %v430_v53 = vmul.f32 0.5, %v2750_v45 }
 0x41e   :  { %v432_v55 = vadd.f32 0.5, %v430_v53 }
 0x420   :  { %v468_v22 = vsub.f32 1.0, %v432_v55  ;;  %v480_v31 = vmul.f32 0.0, %v432_v55 }
 0x47d   :  { %v448_v46 = vpop.permute.xlu0 %447 }
 0x47e   :  { %v453_v47 = vmul.f32 %v448_v46, %v431_v44 }
 0x480   :  { %457 = vrot.lane.b32.xlu2 %v453_v47, %s3019_s23 }
 0x485   :  { %v450_v56 = vpop.permute.xlu1 %449 }
 0x486   :  { %v454_v57 = vmul.f32 %v450_v56, %v432_v55 }
 0x488   :  { %459 = vrot.lane.b32.xlu0 %v454_v57, %s3019_s23 }
 0x4da   :  { %v458_v58 = vpop.permute.xlu2 %457 }
 0x4db   :  { %v463_v59 = vadd.f32 %v458_v58, %v423_v37 }
 0x4dd   :  { %2751 = vtanh.f32 %v463_v59 }
 0x4e3   :  { %v2752_v61 = vpop.eup %2751 }
 0x4e4   :  { %471 = vrot.lane.b32.xlu1 %v2752_v61, %s3014_s20 }
 0x4ec   :  { %493 = vperm.xlu1 %2692, %v3346_v62  }
 0x4fa   :  { %v460_v9 = vpop.permute.xlu0 %459 }
 0x4fb   :  { %v464_v13 = vadd.f32 %v460_v9, %v424_v40  ;;  %v631_v40 = vpack.c.bf16 %v3288_v2, %v3290_v4 }
 0x4fd   :  { %2753 = vtanh.f32 %v464_v13 }
 0x503   :  { %v2754_v14 = vpop.eup %2753 }
 0x504   :  { %473 = vrot.lane.b32.xlu2 %v2754_v14, %s3014_s20 }
 0x50c   :  { %498 = vperm.xlu2 %2693, %v2610_v17  }
 0x556   :  { %v472_v19 = vpop.permute.xlu1 %471 }
 0x557   :  { %v477_v21 = vmul.f32 %v472_v19, %v467_v20 }
 0x559   :  { %v3353_v35 = vadd.f32 %v479_v30, %v477_v21 }
 0x55e   :  { %v474_v23 = vpop.permute.xlu2 %473  ;;  %v494_v43 = vpop.permute.xlu1 %493 }
 0x55f   :  { %v478_v34 = vmul.f32 %v474_v23, %v468_v22  ;;  %v501_v45 = vmul.f32 %v3155_v10, %v494_v43 }
 0x561   :  { %v3355_v37 = vadd.f32 %v480_v31, %v478_v34 }
 0x563   :  { %v490_v38 = vpack.c.bf16 %v3355_v37, %v3353_v35 }
 0x565   :  { %504 = vrot.lane.b32.xlu0 %v490_v38, %s3014_s20 }
 0x566   :  { %v499_v46 = vpop.permute.xlu2 %498 }
 0x567   :  { %v502_v53 = vmul.f32 %v3155_v10, %v499_v46 }
 0x56d   :  { %633 = vrot.lane.b32.xlu0 %v631_v40, %s3014_s20 }
 0x5d7   :  { %v505_v41 = vpop.permute.xlu0 %504 }
 0x5d8   :  { %2613 = vmatmul.msk.bf16.vlgmr.msrb.gmra.mxu0 %vm88_vm1, %v505_v41 }
 0x5d9   :  { %1137 = vmatpush.bf16.msrb.mxu0 %v3106_v0 }
 0x5dd   :  { %1138 = vmatpush.bf16.msrb.mxu0 %v3117_v3 }
 0x5df   :  { %v634_v42 = vpop.permute.xlu0 %633 }
 0x5e0   :  { %2615 = vmatmul.msk.bf16.vlgmr.msrb.gmra.mxu1 %vm88_vm1, %v634_v42 }
 0x5e1   :  { %1266 = vmatpush.bf16.msrb.mxu1 %v3175_v25 }
 0x5e5   :  { %1267 = vmatpush.bf16.msrb.mxu1 %v3182_v26 }
 0x655   :  { %v518_v44 = vpop.f32.mrf.mxu0 }
 0x656   :  { %v519_v47 = vadd.f32 %v518_v44, %v501_v45 }
 0x658   :  { %v523_v56 = vadd.f32 %v519_v47, %v3161_v15 }
 0x65a   :  { %v525_v59 = vmax.f32 %v523_v56, 0.0 }
 0x65d   :  { %v520_v55 = vpop.f32.mrf.mxu0  ;;  %v647_v31 = vpop.f32.mrf.mxu1 }
 0x65e   :  { %v521_v57 = vadd.f32 %v520_v55, %v502_v53  ;;  %v676_v41 = vadd.f32 %v647_v31, %v3229_v54 }
 0x660   :  { %v524_v58 = vadd.f32 %v521_v57, %v3167_v18 }
 0x662   :  { %v526_v61 = vmax.f32 %v524_v58, 0.0 }
 0x664   :  { %v527_v9 = vpack.c.bf16 %v526_v61, %v525_v59 }
 0x666   :  { %2614 = vmatmul.msk.bf16.vlgmr.msrb.gmra.mxu2 %vm147_vm0, %v527_v9 }
 0x667   :  { %1157 = vmatpush.bf16.msrb.mxu2 %v3131_v5 }
 0x66b   :  { %1158 = vmatpush.bf16.msrb.mxu2 %v3137_v6 }
 0x66f   :  { %1159 = vmatpush.bf16.msrb.mxu2 %v3143_v7 }
 0x673   :  { %1160 = vmatpush.bf16.msrb.mxu2 %v3149_v8 }
 0x6e9   :  { %v540_v13 = vpop.f32.mrf.mxu2 }
 0x6ea   :  { %v3379_v14 = vadd.f32 %v540_v13, %v3197_v27 }
 0x6ec   :  { %v547_v17 = vand.u32 2147483647, %v3379_v14  ;;  %v545_v45 = vmax.f32 %v3379_v14, 0.0 }
 0x6ee   :  { %v549_v19 = vsub.f32 0.0, %v547_v17  ;;  %v2612_v17 = vld [vmem:[%s4309_s2 + $0x8] sm:$0xff] }
 0x6f0   :  { %v551_v20 = vmul.f32 1.442695, %v549_v19 }
 0x6f1   :  { %v542_v21 = vpop.f32.mrf.mxu2 }
 0x6f2   :  { %2755 = vpow2.f32 %v551_v20  ;;  %v543_v22 = vadd.f32 %v542_v21, %v3208_v32 }
 0x6f4   :  { %v548_v23 = vand.u32 2147483647, %v543_v22  ;;  %626 = vrot.lane.b32.xlu0 %v543_v22, %s3015_s21  ;;  %v546_v55 = vmax.f32 %v543_v22, 0.0 }
 0x6f6   :  { %v550_v30 = vsub.f32 0.0, %v548_v23 }
 0x6f8   :  { %v2756_v34 = vpop.eup %2755  ;;  %v553_v38 = vmul.f32 1.442695, %v550_v30 }
 0x6f9   :  { %v555_v40 = vadd.f32 1.0, %v2756_v34  ;;  %v237_v34 = vsub.f32 %v3111_v1, %v3237_v60 }
 0x6fa   :  { %2757 = vpow2.f32 %v553_v38 }
 0x6fb   :  { %2759 = vlog2.f32 %v555_v40 }
 0x6fc   :  { %680 = vrot.lane.b32.xlu0 %v676_v41, %s3018_s25  ;;  %v238_v41 = vmul.f32 %v237_v34, %v237_v34 }
 0x700   :  { %v2758_v42 = vpop.eup %2757 }
 0x701   :  { %v2760_v43 = vpop.eup %2759  ;;  %v556_v44 = vadd.f32 1.0, %v2758_v42 }
 0x702   :  { %v558_v46 = vmul.f32 0.6931472, %v2760_v43  ;;  %v649_v43 = vpop.f32.mrf.mxu1 }
 0x703   :  { %2761 = vlog2.f32 %v556_v44 }
 0x704   :  { %v3387_v47 = vadd.f32 %v558_v46, %v545_v45  ;;  %2763 = vlog2.f32 %v3225_v52  ;;  %v2611_v52 = vld [vmem:[%s4308_s1 + $0x8] sm:$0xff]  ;;  %v677_v45 = vadd.f32 %v649_v43, %v3243_v63 }
 0x706   :  { %612 = vrot.lane.b32.xlu1 %v3387_v47, %s3016_s24 }
 0x709   :  { %v2762_v53 = vpop.eup %2761 }
 0x70a   :  { %v560_v56 = vmul.f32 0.6931472, %v2762_v53  ;;  %v2764_v58 = vpop.eup %2763 }
 0x70b   :  { %v186_v61 = vmul.f32 0.6931472, %v2764_v58 }
 0x70c   :  { %v562_v57 = vadd.f32 %v560_v56, %v546_v55 }
 0x70e   :  { %621 = vrot.lane.b32.xlu2 %v562_v57, %s3017_s11  ;;  %2765 = vlog2.f32 %v562_v57 }
 0x714   :  { %v2766_v59 = vpop.eup %2765 }
 0x715   :  { %v566_v9 = vmul.f32 0.6931472, %v2766_v59 }
 0x717   :  { %v3393_v13 = vadd.f32 %v566_v9, %v186_v61 }
 0x766   :  { %v627_v21 = vpop.permute.xlu0 %626 }
 0x768   :  { %v622_v19 = vpop.permute.xlu2 %621 }
 0x769   :  { %v624_v20 = vmul.f32 %v2612_v17, %v622_v19 }
 0x76b   :  { %v629_v22 = vadd.f32 %v627_v21, %v624_v20 }
 0x76d   :  { %659 = vperm.xlu2 %2693, %v629_v22  }
 0x778   :  { %v613_v23 = vpop.permute.xlu1 %612 }
 0x779   :  { %v615_v30 = vmul.f32 %v2611_v52, %v613_v23  ;;  %v681_v23 = vpop.permute.xlu0 %680 }
 0x77b   :  { %v616_v38 = vadd.f32 %v615_v30, %v3379_v14 }
 0x77d   :  { %v617_v40 = vsub.f32 %v3346_v62, %v616_v38  ;;  %654 = vperm.xlu1 %2692, %v616_v38  }
 0x77f   :  { %v618_v42 = vmul.f32 %v617_v40, %v617_v40 }
 0x781   :  { %v3405_v44 = vadd.f32 %v618_v42, %v238_v41 }
 0x785   :  { %682 = vrot.lane.b32.xlu1 %v677_v45, %s3018_s25 }
 0x7c7   :  { %v660_v46 = vpop.permute.xlu2 %659 }
 0x7c8   :  { %v663_v53 = vmul.f32 %v3250_v12, %v660_v46 }
 0x7ca   :  { %v665_v55 = vadd.f32 %v663_v53, %v649_v43 }
 0x7cc   :  { %v667_v1 = vadd.f32 %v665_v55, %v3256_v16 }
 0x7ce   :  { %v669_v60 = vmul.f32 0.5, %v667_v1 }
 0x7d0   :  { %2767 = vtanh.f32 %v669_v60 }
 0x7d6   :  { %v2768_v56 = vpop.eup %2767 }
 0x7d7   :  { %v673_v59 = vmul.f32 0.5, %v2768_v56 }
 0x7d9   :  { %v675_v17 = vadd.f32 0.5, %v673_v59 }
 0x7db   :  { %v701_v45 = vsub.f32 1.0, %v675_v17  ;;  %v713_v60 = vmul.f32 %v675_v17, %v3288_v2 }
 0x7ef   :  { %v655_v62 = vpop.permute.xlu1 %654 }
 0x7f0   :  { %v662_v57 = vmul.f32 %v3250_v12, %v655_v62 }
 0x7f2   :  { %v664_v58 = vadd.f32 %v662_v57, %v647_v31 }
 0x7f4   :  { %v666_v61 = vadd.f32 %v664_v58, %v3263_v24 }
 0x7f6   :  { %v668_v9 = vmul.f32 0.5, %v666_v61 }
 0x7f7   :  { %v683_v19 = vpop.permute.xlu1 %682 }
 0x7f8   :  { %2769 = vtanh.f32 %v668_v9  ;;  %v687_v20 = vmul.f32 %v683_v19, %v675_v17 }
 0x7fa   :  { %692 = vrot.lane.b32.xlu0 %v687_v20, %s3019_s23 }
 0x7fe   :  { %v2770_v21 = vpop.eup %2769 }
 0x7ff   :  { %v672_v22 = vmul.f32 0.5, %v2770_v21 }
 0x801   :  { %v674_v52 = vadd.f32 0.5, %v672_v22 }
 0x803   :  { %v686_v30 = vmul.f32 %v681_v23, %v674_v52  ;;  %v700_v53 = vsub.f32 1.0, %v674_v52  ;;  %v712_v56 = vmul.f32 %v674_v52, %v3290_v4 }
 0x805   :  { %690 = vrot.lane.b32.xlu2 %v686_v30, %s3019_s23 }
 0x85f   :  { %v691_v34 = vpop.permute.xlu2 %690 }
 0x860   :  { %v696_v38 = vadd.f32 %v691_v34, %v666_v61 }
 0x862   :  { %2771 = vtanh.f32 %v696_v38 }
 0x868   :  { %v2772_v31 = vpop.eup %2771 }
 0x869   :  { %704 = vrot.lane.b32.xlu1 %v2772_v31, %s3014_s20 }
 0x86c   :  { %v693_v40 = vpop.permute.xlu0 %692 }
 0x86d   :  { %v697_v41 = vadd.f32 %v693_v40, %v667_v1 }
 0x86f   :  { %2773 = vtanh.f32 %v697_v41 }
 0x875   :  { %v2774_v42 = vpop.eup %2773 }
 0x876   :  { %706 = vrot.lane.b32.xlu2 %v2774_v42, %s3014_s20 }
 0x8d0   :  { %v707_v43 = vpop.permute.xlu2 %706 }
 0x8d1   :  { %v711_v46 = vmul.f32 %v707_v43, %v701_v45 }
 0x8d3   :  { %v3419_v57 = vadd.f32 %v713_v60, %v711_v46 }
 0x8db   :  { %v705_v55 = vpop.permute.xlu1 %704 }
 0x8dc   :  { %v710_v62 = vmul.f32 %v705_v55, %v700_v53 }
 0x8de   :  { %v3421_v58 = vadd.f32 %v712_v56, %v710_v62 }
 0x8e0   :  { %v2699_v1 = vpack.i.bf16 %v3419_v57, %v3421_v58 }
 0x8e2   :  { %2700 = vrot.lane.b32.xlu0 %v2699_v1, %s3014_s20  ;;  %v2618_v1 = vld [vmem:[%s4307_s0 + $0x28] sm:$0xff] }
 0x954   :  { %v2701_v59 = vpop.permute.xlu0 %2700 }
 0x955   :  { %v2703_v61 = vunpack.i.h.bf16 %v2701_v59  ;;  %v2702_v9 = vunpack.i.l.bf16 %v2701_v59 }
 0x957   :  { %v725_v19 = vsel %vm88_vm1, %v2703_v61, %v3355_v37  ;;  %v724_v2 = vsel %vm88_vm1, %v2702_v9, %v3353_v35 }
 0x958   :  { %v726_v4 = vpack.c.bf16 %v725_v19, %v724_v2  ;;  %v3451_v19 = vld [vmem:[%s4307_s0 + $0x20] sm:$0xff] }
 0x95a   :  { %2616 = vmatmul.msk.bf16.vlgmr.msrb.gmra.mxu3 %vm147_vm0, %v726_v4 }
 0x95b   :  { %1356 = vmatpush.bf16.msrb.mxu3 %v3273_v49 }
 0x95f   :  { %1357 = vmatpush.bf16.msrb.mxu3 %v3279_v50 }
 0x963   :  { %1358 = vmatpush.bf16.msrb.mxu3 %v3285_v51 }
 0x967   :  { %1359 = vmatpush.bf16.msrb.mxu3 %v3298_v11 }
 0x9dd   :  { %v739_v17 = vpop.f32.mrf.mxu3 }
 0x9de   :  { %v754_v20 = vadd.f32 %v739_v17, %v3320_v28  ;;  %v744_v34 = vadd.f32 %v739_v17, %v3331_v36 }
 0x9e0   :  { %758 = vrot.lane.b32.xlu1 %v754_v20, %s3018_s25  ;;  %v746_v31 = vmul.f32 0.5, %v744_v34 }
 0x9e5   :  { %v741_v21 = vpop.f32.mrf.mxu3 }
 0x9e6   :  { %v755_v22 = vadd.f32 %v741_v21, %v3324_v33  ;;  %v745_v52 = vadd.f32 %v741_v21, %v3337_v39 }
 0x9e8   :  { %760 = vrot.lane.b32.xlu2 %v755_v22, %s3018_s25  ;;  %v747_v23 = vmul.f32 0.5, %v745_v52 }
 0x9ea   :  { %2775 = vtanh.f32 %v747_v23 }
 0x9eb   :  { %2777 = vtanh.f32 %v746_v31  ;;  %v942_v31 = vpack.c.bf16 %v3419_v57, %v3421_v58 }
 0x9f0   :  { %v2776_v30 = vpop.eup %2775 }
 0x9f1   :  { %v751_v38 = vmul.f32 0.5, %v2776_v30  ;;  %v2778_v43 = vpop.eup %2777 }
 0x9f2   :  { %v750_v45 = vmul.f32 0.5, %v2778_v43 }
 0x9f3   :  { %v753_v40 = vadd.f32 0.5, %v751_v38 }
 0x9f4   :  { %v752_v46 = vadd.f32 0.5, %v750_v45 }
 0x9f5   :  { %v779_v20 = vsub.f32 1.0, %v753_v40 }
 0x9f6   :  { %v778_v4 = vsub.f32 1.0, %v752_v46  ;;  %v790_v22 = vmul.f32 %v752_v46, %v3353_v35 }
 0xa42   :  { %v761_v41 = vpop.permute.xlu2 %760 }
 0xa43   :  { %v765_v42 = vmul.f32 %v761_v41, %v753_v40 }
 0xa45   :  { %770 = vrot.lane.b32.xlu1 %v765_v42, %s3019_s23 }
 0xa52   :  { %v759_v53 = vpop.permute.xlu1 %758 }
 0xa53   :  { %v764_v55 = vmul.f32 %v759_v53, %v752_v46 }
 0xa55   :  { %768 = vrot.lane.b32.xlu0 %v764_v55, %s3019_s23 }
 0xab7   :  { %v771_v60 = vpop.permute.xlu1 %770 }
 0xab8   :  { %v775_v56 = vadd.f32 %v771_v60, %v745_v52  ;;  %v791_v52 = vmul.f32 %v753_v40, %v3355_v37 }
 0xaba   :  { %2779 = vtanh.f32 %v775_v56 }
 0xac0   :  { %v2780_v62 = vpop.eup %2779 }
 0xac1   :  { %784 = vrot.lane.b32.xlu0 %v2780_v62, %s3014_s20 }
 0xac7   :  { %v769_v59 = vpop.permute.xlu0 %768 }
 0xac8   :  { %v774_v61 = vadd.f32 %v769_v59, %v744_v34 }
 0xac9   :  { %809 = vperm.xlu0 %2691, %v2618_v1  }
 0xaca   :  { %2781 = vtanh.f32 %v774_v61 }
 0xad0   :  { %v2782_v9 = vpop.eup %2781 }
 0xad1   :  { %782 = vrot.lane.b32.xlu2 %v2782_v9, %s3014_s20 }
 0xad9   :  { %804 = vperm.xlu2 %2693, %v3451_v19  }
 0xb2b   :  { %v783_v2 = vpop.permute.xlu2 %782 }
 0xb2c   :  { %v788_v17 = vmul.f32 %v783_v2, %v778_v4 }
 0xb2e   :  { %v3456_v30 = vadd.f32 %v790_v22, %v788_v17 }
 0xb33   :  { %v785_v21 = vpop.permute.xlu0 %784  ;;  %v805_v37 = vpop.permute.xlu2 %804 }
 0xb34   :  { %v789_v23 = vmul.f32 %v785_v21, %v779_v20  ;;  %v812_v42 = vmul.f32 %v3155_v10, %v805_v37  ;;  %v2619_v37 = vld [vmem:[%s4308_s1 + $0x10] sm:$0xff] }
 0xb36   :  { %v3458_v34 = vadd.f32 %v791_v52, %v789_v23 }
 0xb38   :  { %v801_v38 = vpack.c.bf16 %v3458_v34, %v3456_v30 }
 0xb3a   :  { %815 = vrot.lane.b32.xlu1 %v801_v38, %s3014_s20 }
 0xb3b   :  { %v810_v43 = vpop.permute.xlu0 %809 }
 0xb3c   :  { %v813_v46 = vmul.f32 %v3155_v10, %v810_v43 }
 0xb42   :  { %944 = vrot.lane.b32.xlu1 %v942_v31, %s3014_s20 }
 0xbac   :  { %v816_v41 = vpop.permute.xlu1 %815 }
 0xbad   :  { %2621 = vmatmul.msk.bf16.vlgmr.msra.gmra.mxu0 %vm88_vm1, %v816_v41 }
 0xbae   :  { %1448 = vmatpush.bf16.msra.mxu0 %v3106_v0 }
 0xbb2   :  { %1449 = vmatpush.bf16.msra.mxu0 %v3117_v3 }
 0xbb4   :  { %v945_v35 = vpop.permute.xlu1 %944 }
 0xbb5   :  { %2623 = vmatmul.msk.bf16.vlgmr.msra.gmra.mxu1 %vm88_vm1, %v945_v35 }
 0xbb6   :  { %1577 = vmatpush.bf16.msra.mxu1 %v3175_v25 }
 0xbba   :  { %1578 = vmatpush.bf16.msra.mxu1 %v3182_v26 }
 0xc2a   :  { %v829_v40 = vpop.f32.mrf.mxu0 }
 0xc2b   :  { %v830_v45 = vadd.f32 %v829_v40, %v812_v42 }
 0xc2d   :  { %v834_v0 = vadd.f32 %v830_v45, %v3161_v15 }
 0xc2f   :  { %v836_v60 = vmax.f32 %v834_v0, 0.0 }
 0xc32   :  { %v831_v53 = vpop.f32.mrf.mxu0 }
 0xc33   :  { %v832_v55 = vadd.f32 %v831_v53, %v813_v46 }
 0xc35   :  { %v835_v3 = vadd.f32 %v832_v55, %v3167_v18 }
 0xc37   :  { %v837_v56 = vmax.f32 %v835_v3, 0.0 }
 0xc39   :  { %v838_v62 = vpack.c.bf16 %v837_v56, %v836_v60 }
 0xc3b   :  { %2622 = vmatmul.msk.bf16.vlgmr.msra.gmra.mxu2 %vm147_vm0, %v838_v62 }
 0xc3c   :  { %1468 = vmatpush.bf16.msra.mxu2 %v3131_v5 }
 0xc40   :  { %1469 = vmatpush.bf16.msra.mxu2 %v3137_v6  ;;  %v958_v6 = vpop.f32.mrf.mxu1 }
 0xc41   :  { %v987_v2 = vadd.f32 %v958_v6, %v3229_v54 }
 0xc44   :  { %1470 = vmatpush.bf16.msra.mxu2 %v3143_v7 }
 0xc48   :  { %1471 = vmatpush.bf16.msra.mxu2 %v3149_v8  ;;  %v960_v53 = vpop.f32.mrf.mxu1 }
 0xc49   :  { %v988_v55 = vadd.f32 %v960_v53, %v3243_v63 }
 0xcbe   :  { %v851_v10 = vpop.f32.mrf.mxu2 }
 0xcbf   :  { %v3482_v25 = vadd.f32 %v851_v10, %v3197_v27 }
 0xcc1   :  { %v858_v15 = vand.u32 2147483647, %v3482_v25  ;;  %v856_v20 = vmax.f32 %v3482_v25, 0.0 }
 0xcc3   :  { %v860_v18 = vsub.f32 0.0, %v858_v15 }
 0xcc5   :  { %v862_v26 = vmul.f32 1.442695, %v860_v18 }
 0xcc6   :  { %v853_v1 = vpop.f32.mrf.mxu2 }
 0xcc7   :  { %2783 = vpow2.f32 %v862_v26  ;;  %v854_v59 = vadd.f32 %v853_v1, %v3208_v32 }
 0xcc9   :  { %v859_v61 = vand.u32 2147483647, %v854_v59  ;;  %937 = vrot.lane.b32.xlu1 %v854_v59, %s3015_s21  ;;  %v857_v52 = vmax.f32 %v854_v59, 0.0 }
 0xccb   :  { %v861_v5 = vsub.f32 0.0, %v859_v61 }
 0xccd   :  { %v2784_v7 = vpop.eup %2783  ;;  %v864_v9 = vmul.f32 1.442695, %v861_v5 }
 0xcce   :  { %v866_v8 = vadd.f32 1.0, %v2784_v7 }
 0xccf   :  { %2785 = vpow2.f32 %v864_v9 }
 0xcd0   :  { %2787 = vlog2.f32 %v866_v8 }
 0xcd1   :  { %991 = vrot.lane.b32.xlu1 %v987_v2, %s3018_s25 }
 0xcd5   :  { %v2786_v27 = vpop.eup %2785 }
 0xcd6   :  { %v2788_v4 = vpop.eup %2787  ;;  %v867_v17 = vadd.f32 1.0, %v2786_v27 }
 0xcd7   :  { %v869_v32 = vmul.f32 0.6931472, %v2788_v4 }
 0xcd8   :  { %2789 = vlog2.f32 %v867_v17 }
 0xcd9   :  { %v3490_v21 = vadd.f32 %v869_v32, %v856_v20 }
 0xcdb   :  { %923 = vrot.lane.b32.xlu2 %v3490_v21, %s3016_s24 }
 0xcde   :  { %v2790_v22 = vpop.eup %2789 }
 0xcdf   :  { %v871_v23 = vmul.f32 0.6931472, %v2790_v22 }
 0xce1   :  { %v873_v38 = vadd.f32 %v871_v23, %v857_v52 }
 0xce3   :  { %932 = vrot.lane.b32.xlu0 %v873_v38, %s3017_s11  ;;  %2791 = vlog2.f32 %v873_v38 }
 0xce9   :  { %v2792_v31 = vpop.eup %2791 }
 0xcea   :  { %v877_v41 = vmul.f32 0.6931472, %v2792_v31 }
 0xcec   :  { %v3496_v35 = vadd.f32 %v877_v41, %v3393_v13  ;;  %v2620_v13 = vld [vmem:[%s4309_s2 + $0x10] sm:$0xff] }
 0xd35   :  { %v924_v40 = vpop.permute.xlu2 %923 }
 0xd36   :  { %v926_v42 = vmul.f32 %v2619_v37, %v924_v40 }
 0xd38   :  { %v927_v43 = vadd.f32 %v926_v42, %v3482_v25 }
 0xd3a   :  { %v928_v45 = vsub.f32 %v3451_v19, %v927_v43  ;;  %965 = vperm.xlu2 %2693, %v927_v43  }
 0xd3b   :  { %v938_v56 = vpop.permute.xlu1 %937 }
 0xd3c   :  { %v929_v46 = vmul.f32 %v928_v45, %v928_v45 }
 0xd3e   :  { %v3504_v0 = vadd.f32 %v929_v46, %v3405_v44 }
 0xd42   :  { %993 = vrot.lane.b32.xlu2 %v988_v55, %s3018_s25 }
 0xd43   :  { %v992_v61 = vpop.permute.xlu1 %991 }
 0xd55   :  { %v933_v3 = vpop.permute.xlu0 %932 }
 0xd56   :  { %v935_v60 = vmul.f32 %v2620_v13, %v933_v3 }
 0xd58   :  { %v940_v62 = vadd.f32 %v938_v56, %v935_v60 }
 0xd5a   :  { %970 = vperm.xlu0 %2691, %v940_v62  }
 0xd94   :  { %v966_v19 = vpop.permute.xlu2 %965 }
 0xd95   :  { %v973_v10 = vmul.f32 %v3250_v12, %v966_v19 }
 0xd97   :  { %v975_v15 = vadd.f32 %v973_v10, %v958_v6 }
 0xd99   :  { %v977_v44 = vadd.f32 %v975_v15, %v3263_v24 }
 0xd9b   :  { %v979_v18 = vmul.f32 0.5, %v977_v44 }
 0xd9c   :  { %v994_v17 = vpop.permute.xlu2 %993 }
 0xd9d   :  { %2793 = vtanh.f32 %v979_v18 }
 0xda3   :  { %v2794_v26 = vpop.eup %2793 }
 0xda4   :  { %v983_v1 = vmul.f32 0.5, %v2794_v26 }
 0xda6   :  { %v985_v59 = vadd.f32 0.5, %v983_v1 }
 0xda8   :  { %v997_v5 = vmul.f32 %v992_v61, %v985_v59  ;;  %v1011_v31 = vsub.f32 1.0, %v985_v59  ;;  %v1023_v42 = vmul.f32 %v985_v59, %v3421_v58 }
 0xdaa   :  { %1001 = vrot.lane.b32.xlu0 %v997_v5, %s3019_s23 }
 0xdcc   :  { %v971_v7 = vpop.permute.xlu0 %970 }
 0xdcd   :  { %v974_v9 = vmul.f32 %v3250_v12, %v971_v7 }
 0xdcf   :  { %v976_v8 = vadd.f32 %v974_v9, %v960_v53 }
 0xdd1   :  { %v978_v2 = vadd.f32 %v976_v8, %v3256_v16 }
 0xdd3   :  { %v980_v27 = vmul.f32 0.5, %v978_v2 }
 0xdd5   :  { %2795 = vtanh.f32 %v980_v27 }
 0xddb   :  { %v2796_v6 = vpop.eup %2795 }
 0xddc   :  { %v984_v4 = vmul.f32 0.5, %v2796_v6 }
 0xdde   :  { %v986_v24 = vadd.f32 0.5, %v984_v4 }
 0xde0   :  { %v998_v20 = vmul.f32 %v994_v17, %v986_v24  ;;  %v1012_v37 = vsub.f32 1.0, %v986_v24  ;;  %v1024_v43 = vmul.f32 %v986_v24, %v3419_v57  ;;  %v2626_v17 = vld [vmem:[%s4307_s0 + $0x38] sm:$0xff] }
 0xde2   :  { %1003 = vrot.lane.b32.xlu1 %v998_v20, %s3019_s23 }
 0xe1c   :  { %v1002_v32 = vpop.permute.xlu0 %1001 }
 0xe1d   :  { %v1007_v22 = vadd.f32 %v1002_v32, %v977_v44 }
 0xe1f   :  { %2797 = vtanh.f32 %v1007_v22 }
 0xe25   :  { %v2798_v52 = vpop.eup %2797 }
 0xe26   :  { %1015 = vrot.lane.b32.xlu2 %v2798_v52, %s3014_s20 }
 0xe54   :  { %v1004_v23 = vpop.permute.xlu1 %1003 }
 0xe55   :  { %v1008_v12 = vadd.f32 %v1004_v23, %v978_v2 }
 0xe57   :  { %2799 = vtanh.f32 %v1008_v12 }
 0xe5d   :  { %v2800_v38 = vpop.eup %2799 }
 0xe5e   :  { %1017 = vrot.lane.b32.xlu0 %v2800_v38, %s3014_s20 }
 0xe80   :  { %v1016_v16 = vpop.permute.xlu2 %1015 }
 0xe81   :  { %v1021_v41 = vmul.f32 %v1016_v16, %v1011_v31 }
 0xe83   :  { %v3521_v46 = vadd.f32 %v1023_v42, %v1021_v41 }
 0xed0   :  { %v1018_v40 = vpop.permute.xlu0 %1017 }
 0xed1   :  { %v1022_v45 = vmul.f32 %v1018_v40, %v1012_v37 }
 0xed3   :  { %v3523_v53 = vadd.f32 %v1024_v43, %v1022_v45  ;;  %v3585_v45 = vld [vmem:[%s4315_s8 + $0x8] sm:$0xff] }
 0xed5   :  { %v2704_v55 = vpack.i.bf16 %v3523_v53, %v3521_v46  ;;  %v1253_v40 = vpack.c.bf16 %v3523_v53, %v3521_v46 }
 0xed7   :  { %2705 = vrot.lane.b32.xlu1 %v2704_v55, %s3014_s20  ;;  %v3591_v55 = vld [vmem:[%s4315_s8] sm:$0xff] }
 0xf49   :  { %v2706_v13 = vpop.permute.xlu1 %2705 }
 0xf4a   :  { %v2708_v3 = vunpack.i.h.bf16 %v2706_v13  ;;  %v2707_v60 = vunpack.i.l.bf16 %v2706_v13 }
 0xf4c   :  { %v1036_v56 = vsel %vm88_vm1, %v2708_v3, %v3458_v34  ;;  %v1035_v58 = vsel %vm88_vm1, %v2707_v60, %v3456_v30  ;;  %v3597_v60 = vld [vmem:[%s4310_s3] ss:$0 sm:$0xff] }
 0xf4d   :  { %v1037_v57 = vpack.c.bf16 %v1036_v56, %v1035_v58 }
 0xf4f   :  { %2624 = vmatmul.msk.bf16.vlgmr.msra.gmra.mxu3 %vm147_vm0, %v1037_v57 }
 0xf50   :  { %1667 = vmatpush.bf16.msra.mxu3 %v3273_v49 }
 0xf54   :  { %1668 = vmatpush.bf16.msra.mxu3 %v3279_v50 }
 0xf58   :  { %1669 = vmatpush.bf16.msra.mxu3 %v3285_v51 }
 0xf5c   :  { %1670 = vmatpush.bf16.msra.mxu3 %v3298_v11 }
 0xfd2   :  { %v1050_v62 = vpop.f32.mrf.mxu3 }
 0xfd3   :  { %v1065_v19 = vadd.f32 %v1050_v62, %v3320_v28  ;;  %v1055_v44 = vadd.f32 %v1050_v62, %v3331_v36 }
 0xfd5   :  { %1069 = vrot.lane.b32.xlu2 %v1065_v19, %s3018_s25  ;;  %v1057_v18 = vmul.f32 0.5, %v1055_v44 }
 0xfd7   :  { %2801 = vtanh.f32 %v1057_v18  ;;  %v3610_v18 = vld [vmem:[%s4312_s5 + $0x8] sm:$0xff] }
 0xfda   :  { %v1052_v10 = vpop.f32.mrf.mxu3 }
 0xfdb   :  { %v1066_v15 = vadd.f32 %v1052_v10, %v3324_v33  ;;  %v1056_v11 = vadd.f32 %v1052_v10, %v3337_v39  ;;  %v3549_v39 = vld [vmem:[%s4307_s0 + $0x30] sm:$0xff]  ;;  %v3604_v10 = vld [vmem:[%s4312_s5] sm:$0xff] }
 0xfdd   :  { %1071 = vrot.lane.b32.xlu0 %v1066_v15, %s3018_s25  ;;  %v2802_v49 = vpop.eup %2801  ;;  %v1058_v59 = vmul.f32 0.5, %v1056_v11 }
 0xfde   :  { %v1061_v50 = vmul.f32 0.5, %v2802_v49 }
 0xfdf   :  { %2803 = vtanh.f32 %v1058_v59  ;;  %v3629_v59 = vld [vmem:[%s4313_s6 + $0x8] sm:$0xff] }
 0xfe0   :  { %v1063_v26 = vadd.f32 0.5, %v1061_v50 }
 0xfe2   :  { %v1089_v32 = vsub.f32 1.0, %v1063_v26  ;;  %v1101_v12 = vmul.f32 %v1063_v26, %v3456_v30  ;;  %v3572_v30 = vld [vmem:[%s4311_s4 + $0x8] sm:$0xff] }
 0xfe5   :  { %v2804_v61 = vpop.eup %2803 }
 0xfe6   :  { %v1062_v5 = vmul.f32 0.5, %v2804_v61  ;;  %v3635_v61 = vld [vmem:[%s4313_s6] sm:$0xff] }
 0xfe8   :  { %v1064_v7 = vadd.f32 0.5, %v1062_v5 }
 0xfea   :  { %v1090_v52 = vsub.f32 1.0, %v1064_v7  ;;  %v1102_v38 = vmul.f32 %v1064_v7, %v3458_v34  ;;  %v3578_v34 = vld [vmem:[%s4311_s4] sm:$0xff] }
0x102f   :  { %v1070_v51 = vpop.permute.xlu2 %1069 }
0x1030   :  { %v1075_v1 = vmul.f32 %v1070_v51, %v1063_v26 }
0x1032   :  { %1079 = vrot.lane.b32.xlu1 %v1075_v1, %s3019_s23  ;;  %v3617_v1 = vld [vmem:[%s4313_s6 + $0x18] sm:$0xff] }
0x104f   :  { %v1072_v9 = vpop.permute.xlu0 %1071 }
0x1050   :  { %v1076_v8 = vmul.f32 %v1072_v9, %v1064_v7  ;;  %v3641_v7 = vld [vmem:[%s4314_s7] sm:$0xff] }
0x1052   :  { %1081 = vrot.lane.b32.xlu2 %v1076_v8, %s3019_s23 }
0x10a4   :  { %v1080_v36 = vpop.permute.xlu1 %1079 }
0x10a5   :  { %v1085_v2 = vadd.f32 %v1080_v36, %v1055_v44 }
0x10a7   :  { %2805 = vtanh.f32 %v1085_v2 }
0x10ac   :  { %v1082_v27 = vpop.permute.xlu2 %1081 }
0x10ad   :  { %v2806_v6 = vpop.eup %2805  ;;  %v1086_v4 = vadd.f32 %v1082_v27, %v1056_v11  ;;  %v3623_v11 = vld [vmem:[%s4313_s6 + $0x10] sm:$0xff] }
0x10ae   :  { %1093 = vrot.lane.b32.xlu0 %v2806_v6, %s3014_s20  ;;  %v3650_v6 = vld [vmem:[%s4314_s7 + $0x8] sm:$0xff] }
0x10af   :  { %2807 = vtanh.f32 %v1086_v4 }
0x10b5   :  { %v2808_v24 = vpop.eup %2807 }
0x10b6   :  { %1115 = vperm.xlu0 %2691, %v3549_v39   ;;  %1095 = vrot.lane.b32.xlu1 %v2808_v24, %s3014_s20 }
0x10be   :  { %1120 = vperm.xlu1 %2692, %v2626_v17  }
0x1120   :  { %v1094_v20 = vpop.permute.xlu0 %1093 }
0x1121   :  { %v1099_v22 = vmul.f32 %v1094_v20, %v1089_v32 }
0x1123   :  { %v3558_v31 = vadd.f32 %v1101_v12, %v1099_v22 }
0x1128   :  { %v1096_v23 = vpop.permute.xlu1 %1095  ;;  %v1116_v13 = vpop.permute.xlu0 %1115 }
0x1129   :  { %v1100_v16 = vmul.f32 %v1096_v23, %v1090_v52  ;;  %v1123_v56 = vmul.f32 %v3597_v60, %v1116_v13 }
0x112b   :  { %v3560_v41 = vadd.f32 %v1102_v38, %v1100_v16 }
0x112d   :  { %v1112_v37 = vpack.c.bf16 %v3560_v41, %v3558_v31 }
0x112f   :  { %1126 = vrot.lane.b32.xlu2 %v1112_v37, %s3014_s20 }
0x1130   :  { %v1121_v58 = vpop.permute.xlu1 %1120 }
0x1131   :  { %v1124_v62 = vmul.f32 %v3597_v60, %v1121_v58 }
0x1137   :  { %1255 = vrot.lane.b32.xlu2 %v1253_v40, %s3014_s20 }
0x1189   :  { %v1127_v42 = vpop.permute.xlu2 %1126 }
0x118a   :  { %2629 = vmatmul.msk.bf16.vlgmr.msrb.gmra.mxu0 %vm88_vm1, %v1127_v42 }
0x118b   :  { %1759 = vmatpush.bf16.msrb.mxu0 %v3572_v30 }
0x118f   :  { %1760 = vmatpush.bf16.msrb.mxu0 %v3578_v34 }
0x1191   :  { %v1256_v43 = vpop.permute.xlu2 %1255 }
0x1192   :  { %2631 = vmatmul.msk.bf16.vlgmr.msrb.gmra.mxu1 %vm88_vm1, %v1256_v43 }
0x1193   :  { %1888 = vmatpush.bf16.msrb.mxu1 %v3585_v45 }
0x1197   :  { %1889 = vmatpush.bf16.msrb.mxu1 %v3591_v55 }
0x1207   :  { %v1140_v3 = vpop.f32.mrf.mxu0 }
0x1208   :  { %v1141_v57 = vadd.f32 %v1140_v3, %v1123_v56 }
0x120a   :  { %v1145_v15 = vadd.f32 %v3604_v10, %v1141_v57 }
0x120c   :  { %v1147_v50 = vmax.f32 %v1145_v15, 0.0 }
0x120f   :  { %v1142_v19 = vpop.f32.mrf.mxu0  ;;  %v1269_v20 = vpop.f32.mrf.mxu1 }
0x1210   :  { %v1143_v44 = vadd.f32 %v1142_v19, %v1124_v62  ;;  %v1298_v23 = vadd.f32 %v1269_v20, %v3229_v54  ;;  %v2627_v19 = vld [vmem:[%s4308_s1 + $0x18] sm:$0xff] }
0x1212   :  { %v1146_v49 = vadd.f32 %v3610_v18, %v1143_v44 }
0x1214   :  { %v1148_v26 = vmax.f32 %v1146_v49, 0.0 }
0x1216   :  { %v1149_v51 = vpack.c.bf16 %v1148_v26, %v1147_v50  ;;  %v2628_v26 = vld [vmem:[%s4309_s2 + $0x18] sm:$0xff] }
0x1218   :  { %2630 = vmatmul.msk.bf16.vlgmr.msrb.gmra.mxu2 %vm147_vm0, %v1149_v51 }
0x1219   :  { %1779 = vmatpush.bf16.msrb.mxu2 %v3617_v1 }
0x121d   :  { %1780 = vmatpush.bf16.msrb.mxu2 %v3623_v11 }
0x1221   :  { %1781 = vmatpush.bf16.msrb.mxu2 %v3629_v59 }
0x1225   :  { %1782 = vmatpush.bf16.msrb.mxu2 %v3635_v61 }
0x129b   :  { %v1162_v5 = vpop.f32.mrf.mxu2 }
0x129c   :  { %v3644_v9 = vadd.f32 %v3641_v7, %v1162_v5  ;;  %v1271_v5 = vpop.f32.mrf.mxu1 }
0x129e   :  { %v1169_v8 = vand.u32 2147483647, %v3644_v9  ;;  %v1167_v37 = vmax.f32 %v3644_v9, 0.0 }
0x12a0   :  { %v1171_v36 = vsub.f32 0.0, %v1169_v8 }
0x12a2   :  { %v1173_v2 = vmul.f32 1.442695, %v1171_v36 }
0x12a3   :  { %v1164_v27 = vpop.f32.mrf.mxu2 }
0x12a4   :  { %2809 = vpow2.f32 %v1173_v2  ;;  %v1165_v4 = vadd.f32 %v3650_v6, %v1164_v27  ;;  %v1299_v27 = vadd.f32 %v1271_v5, %v3243_v63 }
0x12a6   :  { %v1170_v24 = vand.u32 2147483647, %v1165_v4  ;;  %1248 = vrot.lane.b32.xlu2 %v1165_v4, %s3015_s21  ;;  %v1168_v13 = vmax.f32 %v1165_v4, 0.0 }
0x12a8   :  { %v1172_v17 = vsub.f32 0.0, %v1170_v24  ;;  %v3681_v24 = vld [vmem:[%s4316_s9] ss:$0 sm:$0xff] }
0x12aa   :  { %v2810_v32 = vpop.eup %2809  ;;  %v1175_v22 = vmul.f32 1.442695, %v1172_v17 }
0x12ab   :  { %v1177_v52 = vadd.f32 1.0, %v2810_v32 }
0x12ac   :  { %2811 = vpow2.f32 %v1175_v22 }
0x12ad   :  { %2813 = vlog2.f32 %v1177_v52 }
0x12ae   :  { %1302 = vrot.lane.b32.xlu2 %v1298_v23, %s3018_s25 }
0x12b2   :  { %v2812_v12 = vpop.eup %2811 }
0x12b3   :  { %v2814_v38 = vpop.eup %2813  ;;  %v1178_v16 = vadd.f32 1.0, %v2812_v12 }
0x12b4   :  { %v1180_v40 = vmul.f32 0.6931472, %v2814_v38 }
0x12b5   :  { %2815 = vlog2.f32 %v1178_v16  ;;  %v3694_v16 = vld [vmem:[%s4317_s10 + $0x8] sm:$0xff] }
0x12b6   :  { %v3657_v42 = vadd.f32 %v1180_v40, %v1167_v37 }
0x12b8   :  { %1234 = vrot.lane.b32.xlu0 %v3657_v42, %s3016_s24 }
0x12bb   :  { %v2816_v43 = vpop.eup %2815 }
0x12bc   :  { %v1182_v3 = vmul.f32 0.6931472, %v2816_v43 }
0x12be   :  { %v1184_v56 = vadd.f32 %v1182_v3, %v1168_v13 }
0x12c0   :  { %1243 = vrot.lane.b32.xlu1 %v1184_v56, %s3017_s11  ;;  %2817 = vlog2.f32 %v1184_v56 }
0x12c6   :  { %v2818_v58 = vpop.eup %2817 }
0x12c7   :  { %v1188_v57 = vmul.f32 0.6931472, %v2818_v58 }
0x12c9   :  { %v3663_v62 = vadd.f32 %v1188_v57, %v3496_v35 }
0x1300   :  { %v1249_v2 = vpop.permute.xlu2 %1248 }
0x1308   :  { %v1303_v3 = vpop.permute.xlu2 %1302 }
0x132a   :  { %v1235_v15 = vpop.permute.xlu0 %1234 }
0x132b   :  { %v1237_v44 = vmul.f32 %v2627_v19, %v1235_v15 }
0x132d   :  { %v1238_v49 = vadd.f32 %v1237_v44, %v3644_v9 }
0x132f   :  { %v1239_v50 = vsub.f32 %v3549_v39, %v1238_v49  ;;  %1276 = vperm.xlu0 %2691, %v1238_v49  }
0x1331   :  { %v1240_v51 = vmul.f32 %v1239_v50, %v1239_v50 }
0x1332   :  { %v1244_v8 = vpop.permute.xlu1 %1243 }
0x1333   :  { %v3674_v35 = vadd.f32 %v1240_v51, %v3504_v0  ;;  %v1246_v36 = vmul.f32 %v2628_v26, %v1244_v8  ;;  %v3687_v0 = vld [vmem:[%s4317_s10] sm:$0xff] }
0x1335   :  { %v1251_v4 = vadd.f32 %v1249_v2, %v1246_v36 }
0x1337   :  { %1304 = vrot.lane.b32.xlu0 %v1299_v27, %s3018_s25  ;;  %1281 = vperm.xlu1 %2692, %v1251_v4  }
0x13a1   :  { %v1277_v39 = vpop.permute.xlu0 %1276 }
0x13a2   :  { %v1284_v17 = vmul.f32 %v3681_v24, %v1277_v39 }
0x13a4   :  { %v1286_v32 = vadd.f32 %v1284_v17, %v1269_v20 }
0x13a6   :  { %v1288_v22 = vadd.f32 %v3687_v0, %v1286_v32 }
0x13a8   :  { %v1290_v52 = vmul.f32 0.5, %v1288_v22 }
0x13a9   :  { %v1282_v23 = vpop.permute.xlu1 %1281  ;;  %v1305_v15 = vpop.permute.xlu0 %1304 }
0x13aa   :  { %2819 = vtanh.f32 %v1290_v52  ;;  %v1285_v12 = vmul.f32 %v3681_v24, %v1282_v23 }
0x13ac   :  { %v1287_v38 = vadd.f32 %v1285_v12, %v1271_v5 }
0x13ae   :  { %v1289_v20 = vadd.f32 %v3694_v16, %v1287_v38 }
0x13b0   :  { %v2820_v37 = vpop.eup %2819  ;;  %v1291_v40 = vmul.f32 0.5, %v1289_v20 }
0x13b1   :  { %v1294_v43 = vmul.f32 0.5, %v2820_v37 }
0x13b2   :  { %2821 = vtanh.f32 %v1291_v40 }
0x13b3   :  { %v1296_v13 = vadd.f32 0.5, %v1294_v43  ;;  %v3718_v43 = vld [vmem:[%s4319_s12 + $0x18] sm:$0xff] }
0x13b5   :  { %v1308_v56 = vmul.f32 %v1303_v3, %v1296_v13  ;;  %v1322_v4 = vsub.f32 1.0, %v1296_v13  ;;  %v1334_v32 = vmul.f32 %v1296_v13, %v3521_v46  ;;  %v3724_v13 = vld [vmem:[%s4319_s12 + $0x10] sm:$0xff]  ;;  %v3730_v3 = vld [vmem:[%s4319_s12 + $0x8] sm:$0xff] }
0x13b7   :  { %1312 = vrot.lane.b32.xlu1 %v1308_v56, %s3019_s23  ;;  %v3736_v56 = vld [vmem:[%s4319_s12] sm:$0xff] }
0x13b8   :  { %v2822_v58 = vpop.eup %2821 }
0x13b9   :  { %v1295_v57 = vmul.f32 0.5, %v2822_v58 }
0x13bb   :  { %v1297_v19 = vadd.f32 0.5, %v1295_v57 }
0x13bd   :  { %v1309_v44 = vmul.f32 %v1305_v15, %v1297_v19  ;;  %v1323_v2 = vsub.f32 1.0, %v1297_v19  ;;  %v1335_v17 = vmul.f32 %v1297_v19, %v3523_v53 }
0x13bf   :  { %1314 = vrot.lane.b32.xlu2 %v1309_v44, %s3019_s23  ;;  %v3746_v44 = vld [vmem:[%s4320_s13] sm:$0xff] }
0x1419   :  { %v1315_v49 = vpop.permute.xlu2 %1314 }
0x141a   :  { %v1319_v50 = vadd.f32 %v1315_v49, %v1289_v20 }
0x141c   :  { %2823 = vtanh.f32 %v1319_v50 }
0x1422   :  { %v2824_v26 = vpop.eup %2823 }
0x1423   :  { %1328 = vrot.lane.b32.xlu1 %v2824_v26, %s3014_s20  ;;  %v3752_v26 = vld [vmem:[%s4320_s13 + $0x8] sm:$0xff] }
0x1429   :  { %v1313_v51 = vpop.permute.xlu1 %1312 }
0x142a   :  { %v1318_v5 = vadd.f32 %v1313_v51, %v1288_v22 }
0x142c   :  { %2825 = vtanh.f32 %v1318_v5 }
0x1432   :  { %v2826_v8 = vpop.eup %2825 }
0x1433   :  { %1326 = vrot.lane.b32.xlu0 %v2826_v8, %s3014_s20 }
0x1495   :  { %v1329_v36 = vpop.permute.xlu1 %1328 }
0x1496   :  { %v1333_v27 = vmul.f32 %v1329_v36, %v1323_v2 }
0x1498   :  { %v3703_v23 = vadd.f32 %v1335_v17, %v1333_v27 }
0x14a5   :  { %v1327_v39 = vpop.permute.xlu0 %1326 }
0x14a6   :  { %v1332_v52 = vmul.f32 %v1327_v39, %v1322_v4 }
0x14a8   :  { %v3705_v12 = vadd.f32 %v1334_v32, %v1332_v52 }
0x14aa   :  { %v2709_v22 = vpack.i.bf16 %v3703_v23, %v3705_v12 }
0x14ac   :  { %2710 = vrot.lane.b32.xlu2 %v2709_v22, %s3014_s20 }
0x1506   :  { %v2711_v38 = vpop.permute.xlu2 %2710 }
0x1507   :  { %v2713_v20 = vunpack.i.h.bf16 %v2711_v38  ;;  %v2712_v37 = vunpack.i.l.bf16 %v2711_v38 }
0x1509   :  { %v1347_v40 = vsel %vm88_vm1, %v2713_v20, %v3560_v41  ;;  %v1346_v53 = vsel %vm88_vm1, %v2712_v37, %v3558_v31 }
0x150a   :  { %v1348_v46 = vpack.c.bf16 %v1347_v40, %v1346_v53  ;;  %v3761_v40 = vld [vmem:[%s4307_s0 + $0x40] sm:$0xff] }
0x150c   :  { %2632 = vmatmul.msk.bf16.vlgmr.msrb.gmra.mxu3 %vm147_vm0, %v1348_v46 }
0x150d   :  { %1978 = vmatpush.bf16.msrb.mxu3 %v3718_v43 }
0x1511   :  { %1979 = vmatpush.bf16.msrb.mxu3 %v3724_v13 }
0x1515   :  { %1980 = vmatpush.bf16.msrb.mxu3 %v3730_v3 }
0x1519   :  { %1981 = vmatpush.bf16.msrb.mxu3 %v3736_v56 }
0x158f   :  { %v1361_v58 = vpop.f32.mrf.mxu3 }
0x1590   :  { %v1376_v57 = vadd.f32 %v1361_v58, %v3320_v28  ;;  %v1366_v49 = vadd.f32 %v3746_v44, %v1361_v58 }
0x1592   :  { %1380 = vrot.lane.b32.xlu0 %v1376_v57, %s3018_s25  ;;  %v1368_v50 = vmul.f32 0.5, %v1366_v49  ;;  %v2634_v57 = vld [vmem:[%s4307_s0 + $0x48] sm:$0xff] }
0x1594   :  { %2827 = vtanh.f32 %v1368_v50 }
0x1597   :  { %v1363_v19 = vpop.f32.mrf.mxu3 }
0x1598   :  { %v1377_v15 = vadd.f32 %v1363_v19, %v3324_v33  ;;  %v1367_v51 = vadd.f32 %v3752_v26, %v1363_v19 }
0x159a   :  { %1382 = vrot.lane.b32.xlu1 %v1377_v15, %s3018_s25  ;;  %v1369_v5 = vmul.f32 0.5, %v1367_v51  ;;  %v2828_v8 = vpop.eup %2827 }
0x159b   :  { %v1372_v36 = vmul.f32 0.5, %v2828_v8 }
0x159c   :  { %2829 = vtanh.f32 %v1369_v5 }
0x159d   :  { %v1374_v2 = vadd.f32 0.5, %v1372_v36 }
0x159f   :  { %v1400_v15 = vsub.f32 1.0, %v1374_v2  ;;  %v1412_v8 = vmul.f32 %v1374_v2, %v3558_v31 }
0x15a2   :  { %v2830_v27 = vpop.eup %2829 }
0x15a3   :  { %v1373_v17 = vmul.f32 0.5, %v2830_v27 }
0x15a5   :  { %v1375_v32 = vadd.f32 0.5, %v1373_v17  ;;  %v1564_v17 = vpack.c.bf16 %v3703_v23, %v3705_v12 }
0x15a7   :  { %v1401_v50 = vsub.f32 1.0, %v1375_v32  ;;  %v1413_v36 = vmul.f32 %v1375_v32, %v3560_v41 }
0x1604   :  { %v1381_v4 = vpop.permute.xlu0 %1380 }
0x1605   :  { %v1386_v39 = vmul.f32 %v1381_v4, %v1374_v2 }
0x1607   :  { %1390 = vrot.lane.b32.xlu2 %v1386_v39, %s3019_s23 }
0x160c   :  { %v1383_v52 = vpop.permute.xlu1 %1382 }
0x160d   :  { %v1387_v22 = vmul.f32 %v1383_v52, %v1375_v32 }
0x160f   :  { %1392 = vrot.lane.b32.xlu0 %v1387_v22, %s3019_s23 }
0x1661   :  { %v1391_v38 = vpop.permute.xlu2 %1390 }
0x1662   :  { %v1396_v20 = vadd.f32 %v1391_v38, %v1366_v49 }
0x1664   :  { %2831 = vtanh.f32 %v1396_v20 }
0x166a   :  { %v2832_v37 = vpop.eup %2831 }
0x166b   :  { %1404 = vrot.lane.b32.xlu1 %v2832_v37, %s3014_s20 }
0x1673   :  { %1426 = vperm.xlu1 %2692, %v3761_v40  }
0x1681   :  { %v1393_v53 = vpop.permute.xlu0 %1392 }
0x1682   :  { %v1397_v46 = vadd.f32 %v1393_v53, %v1367_v51 }
0x1684   :  { %2833 = vtanh.f32 %v1397_v46 }
0x168a   :  { %v2834_v58 = vpop.eup %2833 }
0x168b   :  { %1406 = vrot.lane.b32.xlu2 %v2834_v58, %s3014_s20 }
0x1693   :  { %1431 = vperm.xlu2 %2693, %v2634_v57  }
0x16dd   :  { %v1405_v19 = vpop.permute.xlu1 %1404 }
0x16de   :  { %v1410_v49 = vmul.f32 %v1405_v19, %v1400_v15 }
0x16e0   :  { %v3770_v51 = vadd.f32 %v1412_v8, %v1410_v49 }
0x16e5   :  { %v1407_v5 = vpop.permute.xlu2 %1406  ;;  %v1427_v41 = vpop.permute.xlu1 %1426 }
0x16e6   :  { %v1411_v27 = vmul.f32 %v1407_v5, %v1401_v50  ;;  %v1434_v32 = vmul.f32 %v3597_v60, %v1427_v41 }
0x16e8   :  { %v3772_v4 = vadd.f32 %v1413_v36, %v1411_v27 }
0x16ea   :  { %v1423_v39 = vpack.c.bf16 %v3772_v4, %v3770_v51 }
0x16ec   :  { %1437 = vrot.lane.b32.xlu0 %v1423_v39, %s3014_s20 }
0x16ed   :  { %v1432_v22 = vpop.permute.xlu2 %1431 }
0x16ee   :  { %v1435_v20 = vmul.f32 %v3597_v60, %v1432_v22 }
0x16f4   :  { %1566 = vrot.lane.b32.xlu0 %v1564_v17, %s3014_s20 }
0x175e   :  { %v1438_v52 = vpop.permute.xlu0 %1437 }
0x175f   :  { %2637 = vmatmul.msk.bf16.vlgmr.msra.gmra.mxu0 %vm88_vm1, %v1438_v52 }
0x1760   :  { %2070 = vmatpush.bf16.msra.mxu0 %v3572_v30 }
0x1764   :  { %2071 = vmatpush.bf16.msra.mxu0 %v3578_v34 }
0x1766   :  { %v1567_v31 = vpop.permute.xlu0 %1566 }
0x1767   :  { %2639 = vmatmul.msk.bf16.vlgmr.msra.gmra.mxu1 %vm88_vm1, %v1567_v31 }
0x1768   :  { %2199 = vmatpush.bf16.msra.mxu1 %v3585_v45 }
0x176c   :  { %2200 = vmatpush.bf16.msra.mxu1 %v3591_v55 }
0x17dc   :  { %v1451_v2 = vpop.f32.mrf.mxu0 }
0x17dd   :  { %v1452_v38 = vadd.f32 %v1451_v2, %v1434_v32 }
0x17df   :  { %v1456_v53 = vadd.f32 %v3604_v10, %v1452_v38 }
0x17e1   :  { %v1458_v57 = vmax.f32 %v1456_v53, 0.0 }
0x17e4   :  { %v1453_v37 = vpop.f32.mrf.mxu0  ;;  %v1580_v17 = vpop.f32.mrf.mxu1 }
0x17e5   :  { %v1454_v46 = vadd.f32 %v1453_v37, %v1435_v20  ;;  %v1609_v2 = vadd.f32 %v1580_v17, %v3229_v54 }
0x17e7   :  { %v1457_v58 = vadd.f32 %v3610_v18, %v1454_v46 }
0x17e9   :  { %v1459_v19 = vmax.f32 %v1457_v58, 0.0 }
0x17eb   :  { %v1460_v15 = vpack.c.bf16 %v1459_v19, %v1458_v57 }
0x17ed   :  { %2638 = vmatmul.msk.bf16.vlgmr.msra.gmra.mxu2 %vm147_vm0, %v1460_v15 }
0x17ee   :  { %2090 = vmatpush.bf16.msra.mxu2 %v3617_v1 }
0x17f2   :  { %2091 = vmatpush.bf16.msra.mxu2 %v3623_v11 }
0x17f6   :  { %2092 = vmatpush.bf16.msra.mxu2 %v3629_v59 }
0x17fa   :  { %2093 = vmatpush.bf16.msra.mxu2 %v3635_v61 }
0x1870   :  { %v1473_v45 = vpop.f32.mrf.mxu2 }
0x1871   :  { %v3796_v55 = vadd.f32 %v3641_v7, %v1473_v45 }
0x1873   :  { %v1480_v49 = vand.u32 2147483647, %v3796_v55  ;;  %v1478_v20 = vmax.f32 %v3796_v55, 0.0 }
0x1875   :  { %v1482_v50 = vsub.f32 0.0, %v1480_v49 }
0x1877   :  { %v1484_v5 = vmul.f32 1.442695, %v1482_v50  ;;  %v2636_v50 = vld [vmem:[%s4309_s2 + $0x20] sm:$0xff] }
0x1878   :  { %v1475_v8 = vpop.f32.mrf.mxu2 }
0x1879   :  { %2835 = vpow2.f32 %v1484_v5  ;;  %v1476_v36 = vadd.f32 %v3650_v6, %v1475_v8 }
0x187b   :  { %v1481_v27 = vand.u32 2147483647, %v1476_v36  ;;  %1559 = vrot.lane.b32.xlu0 %v1476_v36, %s3015_s21  ;;  %v1479_v58 = vmax.f32 %v1476_v36, 0.0  ;;  %v2635_v36 = vld [vmem:[%s4308_s1 + $0x20] sm:$0xff] }
0x187d   :  { %v1483_v39 = vsub.f32 0.0, %v1481_v27 }
0x187f   :  { %v2836_v52 = vpop.eup %2835  ;;  %v1486_v31 = vmul.f32 1.442695, %v1483_v39 }
0x1880   :  { %v1488_v41 = vadd.f32 1.0, %v2836_v52 }
0x1881   :  { %2837 = vpow2.f32 %v1486_v31 }
0x1882   :  { %2839 = vlog2.f32 %v1488_v41 }
0x1883   :  { %1613 = vrot.lane.b32.xlu0 %v1609_v2, %s3018_s25 }
0x1887   :  { %v2838_v32 = vpop.eup %2837 }
0x1888   :  { %v2840_v22 = vpop.eup %2839  ;;  %v1489_v38 = vadd.f32 1.0, %v2838_v32  ;;  %v1582_v32 = vpop.f32.mrf.mxu1 }
0x1889   :  { %v1491_v37 = vmul.f32 0.6931472, %v2840_v22 }
0x188a   :  { %2841 = vlog2.f32 %v1489_v38  ;;  %v1610_v38 = vadd.f32 %v1582_v32, %v3243_v63 }
0x188b   :  { %v3804_v53 = vadd.f32 %v1491_v37, %v1478_v20 }
0x188d   :  { %1545 = vrot.lane.b32.xlu1 %v3804_v53, %s3016_s24 }
0x1890   :  { %v2842_v46 = vpop.eup %2841 }
0x1891   :  { %v1493_v57 = vmul.f32 0.6931472, %v2842_v46 }
0x1893   :  { %v1495_v19 = vadd.f32 %v1493_v57, %v1479_v58 }
0x1895   :  { %1554 = vrot.lane.b32.xlu2 %v1495_v19, %s3017_s11  ;;  %2843 = vlog2.f32 %v1495_v19 }
0x189b   :  { %v2844_v15 = vpop.eup %2843 }
0x189c   :  { %v1499_v45 = vmul.f32 0.6931472, %v2844_v15 }
0x189e   :  { %v3810_v49 = vadd.f32 %v1499_v45, %v3663_v62 }
0x18ed   :  { %v1560_v27 = vpop.permute.xlu0 %1559 }
0x18ef   :  { %v1555_v5 = vpop.permute.xlu2 %1554 }
0x18f0   :  { %v1557_v8 = vmul.f32 %v2636_v50, %v1555_v5 }
0x18f2   :  { %v1562_v39 = vadd.f32 %v1560_v27, %v1557_v8 }
0x18f4   :  { %1592 = vperm.xlu2 %2693, %v1562_v39  }
0x18ff   :  { %v1546_v52 = vpop.permute.xlu1 %1545 }
0x1900   :  { %v1548_v31 = vmul.f32 %v2635_v36, %v1546_v52 }
0x1902   :  { %v1549_v41 = vadd.f32 %v1548_v31, %v3796_v55 }
0x1904   :  { %v1550_v62 = vsub.f32 %v3761_v40, %v1549_v41  ;;  %1587 = vperm.xlu1 %2692, %v1549_v41   ;;  %v1614_v41 = vpop.permute.xlu0 %1613 }
0x1906   :  { %v1551_v2 = vmul.f32 %v1550_v62, %v1550_v62 }
0x1908   :  { %v3821_v22 = vadd.f32 %v1551_v2, %v3674_v35 }
0x190c   :  { %1615 = vrot.lane.b32.xlu1 %v1610_v38, %s3018_s25 }
0x194e   :  { %v1593_v20 = vpop.permute.xlu2 %1592 }
0x194f   :  { %v1596_v37 = vmul.f32 %v3681_v24, %v1593_v20 }
0x1951   :  { %v1598_v46 = vadd.f32 %v1596_v37, %v1582_v32 }
0x1953   :  { %v1600_v58 = vadd.f32 %v3694_v16, %v1598_v46 }
0x1955   :  { %v1602_v57 = vmul.f32 0.5, %v1600_v58 }
0x1957   :  { %2845 = vtanh.f32 %v1602_v57 }
0x195d   :  { %v2846_v19 = vpop.eup %2845 }
0x195e   :  { %v1606_v50 = vmul.f32 0.5, %v2846_v19 }
0x1960   :  { %v1608_v8 = vadd.f32 0.5, %v1606_v50 }
0x1962   :  { %v1634_v57 = vsub.f32 1.0, %v1608_v8 }
0x1976   :  { %v1588_v40 = vpop.permute.xlu1 %1587 }
0x1977   :  { %v1595_v15 = vmul.f32 %v3681_v24, %v1588_v40 }
0x1979   :  { %v1597_v45 = vadd.f32 %v1595_v15, %v1580_v17 }
0x197b   :  { %v1599_v35 = vadd.f32 %v3687_v0, %v1597_v45  ;;  %v1646_v45 = vmul.f32 %v1608_v8, %v3703_v23 }
0x197d   :  { %v1601_v5 = vmul.f32 0.5, %v1599_v35 }
0x197e   :  { %v1616_v27 = vpop.permute.xlu1 %1615 }
0x197f   :  { %2847 = vtanh.f32 %v1601_v5  ;;  %v1620_v39 = vmul.f32 %v1616_v27, %v1608_v8 }
0x1981   :  { %1625 = vrot.lane.b32.xlu0 %v1620_v39, %s3019_s23 }
0x1985   :  { %v2848_v36 = vpop.eup %2847 }
0x1986   :  { %v1605_v52 = vmul.f32 0.5, %v2848_v36 }
0x1988   :  { %v1607_v31 = vadd.f32 0.5, %v1605_v52 }
0x198a   :  { %v1619_v62 = vmul.f32 %v1614_v41, %v1607_v31  ;;  %v1633_v40 = vsub.f32 1.0, %v1607_v31  ;;  %v1645_v50 = vmul.f32 %v1607_v31, %v3705_v12 }
0x198c   :  { %1623 = vrot.lane.b32.xlu2 %v1619_v62, %s3019_s23 }
0x19e6   :  { %v1624_v2 = vpop.permute.xlu2 %1623 }
0x19e7   :  { %v1629_v32 = vadd.f32 %v1624_v2, %v1599_v35 }
0x19e9   :  { %2849 = vtanh.f32 %v1629_v32 }
0x19ef   :  { %v2850_v17 = vpop.eup %2849 }
0x19f0   :  { %1637 = vrot.lane.b32.xlu1 %v2850_v17, %s3014_s20 }
0x19f3   :  { %v1626_v38 = vpop.permute.xlu0 %1625 }
0x19f4   :  { %v1630_v20 = vadd.f32 %v1626_v38, %v1600_v58 }
0x19f6   :  { %2851 = vtanh.f32 %v1630_v20 }
0x19fc   :  { %v2852_v37 = vpop.eup %2851 }
0x19fd   :  { %1639 = vrot.lane.b32.xlu2 %v2852_v37, %s3014_s20 }
0x1a57   :  { %v1640_v46 = vpop.permute.xlu2 %1639 }
0x1a58   :  { %v1644_v19 = vmul.f32 %v1640_v46, %v1634_v57 }
0x1a5a   :  { %v3835_v5 = vadd.f32 %v1646_v45, %v1644_v19 }
0x1a62   :  { %v1638_v15 = vpop.permute.xlu1 %1637 }
0x1a63   :  { %v1643_v35 = vmul.f32 %v1638_v15, %v1633_v40 }
0x1a65   :  { %v3837_v27 = vadd.f32 %v1645_v50, %v1643_v35 }
0x1a67   :  { %v2714_v58 = vpack.i.bf16 %v3835_v5, %v3837_v27 }
0x1a69   :  { %2715 = vrot.lane.b32.xlu0 %v2714_v58, %s3014_s20  ;;  %v2642_v58 = vld [vmem:[%s4307_s0 + $0x58] sm:$0xff] }
0x1adb   :  { %v2716_v39 = vpop.permute.xlu0 %2715 }
0x1adc   :  { %v2718_v36 = vunpack.i.h.bf16 %v2716_v39  ;;  %v2717_v52 = vunpack.i.l.bf16 %v2716_v39 }
0x1ade   :  { %v1658_v41 = vsel %vm88_vm1, %v2718_v36, %v3772_v4  ;;  %v1657_v23 = vsel %vm88_vm1, %v2717_v52, %v3770_v51 }
0x1adf   :  { %v1659_v12 = vpack.c.bf16 %v1658_v41, %v1657_v23  ;;  %v3867_v41 = vld [vmem:[%s4307_s0 + $0x50] sm:$0xff] }
0x1ae1   :  { %2640 = vmatmul.msk.bf16.vlgmr.msra.gmra.mxu3 %vm147_vm0, %v1659_v12 }
0x1ae2   :  { %2289 = vmatpush.bf16.msra.mxu3 %v3718_v43 }
0x1ae6   :  { %2290 = vmatpush.bf16.msra.mxu3 %v3724_v13 }
0x1aea   :  { %2291 = vmatpush.bf16.msra.mxu3 %v3730_v3 }
0x1aee   :  { %2292 = vmatpush.bf16.msra.mxu3 %v3736_v56 }
0x1b64   :  { %v1672_v8 = vpop.f32.mrf.mxu3 }
0x1b65   :  { %v1687_v31 = vadd.f32 %v1672_v8, %v3320_v28  ;;  %v1677_v13 = vadd.f32 %v3746_v44, %v1672_v8 }
0x1b67   :  { %1691 = vrot.lane.b32.xlu1 %v1687_v31, %s3018_s25  ;;  %v1679_v38 = vmul.f32 0.5, %v1677_v13 }
0x1b6c   :  { %v1674_v62 = vpop.f32.mrf.mxu3 }
0x1b6d   :  { %v1688_v2 = vadd.f32 %v1674_v62, %v3324_v33  ;;  %v1678_v32 = vadd.f32 %v3752_v26, %v1674_v62 }
0x1b6f   :  { %1693 = vrot.lane.b32.xlu2 %v1688_v2, %s3018_s25  ;;  %v1680_v17 = vmul.f32 0.5, %v1678_v32 }
0x1b71   :  { %2853 = vtanh.f32 %v1680_v17 }
0x1b72   :  { %2855 = vtanh.f32 %v1679_v38  ;;  %v1875_v38 = vpack.c.bf16 %v3835_v5, %v3837_v27 }
0x1b77   :  { %v2854_v43 = vpop.eup %2853 }
0x1b78   :  { %v1684_v3 = vmul.f32 0.5, %v2854_v43  ;;  %v2856_v46 = vpop.eup %2855 }
0x1b79   :  { %v1683_v57 = vmul.f32 0.5, %v2856_v46 }
0x1b7a   :  { %v1686_v56 = vadd.f32 0.5, %v1684_v3 }
0x1b7b   :  { %v1685_v19 = vadd.f32 0.5, %v1683_v57 }
0x1b7c   :  { %v1712_v31 = vsub.f32 1.0, %v1686_v56 }
0x1b7d   :  { %v1711_v12 = vsub.f32 1.0, %v1685_v19  ;;  %v1723_v2 = vmul.f32 %v1685_v19, %v3770_v51 }
0x1bc9   :  { %v1694_v20 = vpop.permute.xlu2 %1693 }
0x1bca   :  { %v1698_v37 = vmul.f32 %v1694_v20, %v1686_v56 }
0x1bcc   :  { %1703 = vrot.lane.b32.xlu1 %v1698_v37, %s3019_s23 }
0x1bd9   :  { %v1692_v40 = vpop.permute.xlu1 %1691 }
0x1bda   :  { %v1697_v15 = vmul.f32 %v1692_v40, %v1685_v19 }
0x1bdc   :  { %1701 = vrot.lane.b32.xlu0 %v1697_v15, %s3019_s23 }
0x1c3e   :  { %v1704_v45 = vpop.permute.xlu1 %1703 }
0x1c3f   :  { %v1708_v50 = vadd.f32 %v1704_v45, %v1678_v32  ;;  %v1724_v32 = vmul.f32 %v1686_v56, %v3772_v4 }
0x1c41   :  { %2857 = vtanh.f32 %v1708_v50 }
0x1c47   :  { %v2858_v35 = vpop.eup %2857 }
0x1c48   :  { %1717 = vrot.lane.b32.xlu0 %v2858_v35, %s3014_s20 }
0x1c4e   :  { %v1702_v39 = vpop.permute.xlu0 %1701 }
0x1c4f   :  { %v1707_v36 = vadd.f32 %v1702_v39, %v1677_v13 }
0x1c50   :  { %1742 = vperm.xlu0 %2691, %v2642_v58  }
0x1c51   :  { %2859 = vtanh.f32 %v1707_v36 }
0x1c57   :  { %v2860_v52 = vpop.eup %2859 }
0x1c58   :  { %1715 = vrot.lane.b32.xlu2 %v2860_v52, %s3014_s20 }
0x1c60   :  { %1737 = vperm.xlu2 %2693, %v3867_v41  }
0x1cb2   :  { %v1716_v23 = vpop.permute.xlu2 %1715 }
0x1cb3   :  { %v1721_v8 = vmul.f32 %v1716_v23, %v1711_v12 }
0x1cb5   :  { %v3872_v43 = vadd.f32 %v1723_v2, %v1721_v8 }
0x1cba   :  { %v1718_v62 = vpop.permute.xlu0 %1717  ;;  %v1738_v4 = vpop.permute.xlu2 %1737 }
0x1cbb   :  { %v1722_v17 = vmul.f32 %v1718_v62, %v1712_v31  ;;  %v1745_v37 = vmul.f32 %v3597_v60, %v1738_v4 }
0x1cbd   :  { %v3874_v13 = vadd.f32 %v1724_v32, %v1722_v17 }
0x1cbf   :  { %v1734_v3 = vpack.c.bf16 %v3874_v13, %v3872_v43 }
0x1cc1   :  { %1748 = vrot.lane.b32.xlu1 %v1734_v3, %s3014_s20 }
0x1cc2   :  { %v1743_v46 = vpop.permute.xlu0 %1742 }
0x1cc3   :  { %v1746_v19 = vmul.f32 %v3597_v60, %v1743_v46 }
0x1cc9   :  { %1877 = vrot.lane.b32.xlu1 %v1875_v38, %s3014_s20 }
0x1d33   :  { %v1749_v20 = vpop.permute.xlu1 %1748 }
0x1d34   :  { %2645 = vmatmul.msk.bf16.vlgmr.msrb.gmra.mxu0 %vm88_vm1, %v1749_v20 }
0x1d35   :  { %2379 = vmatpush.bf16.msrb.mxu0 %v3572_v30 }
0x1d39   :  { %2380 = vmatpush.bf16.msrb.mxu0 %v3578_v34 }
0x1d3b   :  { %v1878_v51 = vpop.permute.xlu1 %1877 }
0x1d3c   :  { %2647 = vmatmul.msk.bf16.vlgmr.msrb.gmra.mxu1 %vm88_vm1, %v1878_v51 }
0x1db1   :  { %v1762_v56 = vpop.f32.mrf.mxu0 }
0x1db2   :  { %v1763_v57 = vadd.f32 %v1762_v56, %v1745_v37  ;;  %v2643_v37 = vld [vmem:[%s4308_s1 + $0x28] sm:$0xff] }
0x1db4   :  { %v1767_v15 = vadd.f32 %v3604_v10, %v1763_v57 }
0x1db6   :  { %v1769_v30 = vmax.f32 %v1767_v15, 0.0 }
0x1db9   :  { %v1764_v40 = vpop.f32.mrf.mxu0 }
0x1dba   :  { %v1765_v45 = vadd.f32 %v1764_v40, %v1746_v19 }
0x1dbc   :  { %v1768_v50 = vadd.f32 %v3610_v18, %v1765_v45 }
0x1dbe   :  { %v1770_v35 = vmax.f32 %v1768_v50, 0.0 }
0x1dc0   :  { %v1771_v34 = vpack.c.bf16 %v1770_v35, %v1769_v30 }
0x1dc2   :  { %2646 = vmatmul.msk.bf16.vlgmr.msrb.gmra.mxu2 %vm147_vm0, %v1771_v34 }
0x1dc3   :  { %2399 = vmatpush.bf16.msrb.mxu2 %v3617_v1 }
0x1dc7   :  { %2400 = vmatpush.bf16.msrb.mxu2 %v3623_v11  ;;  %v1891_v11 = vpop.f32.mrf.mxu1 }
0x1dc8   :  { %v1920_v8 = vadd.f32 %v1891_v11, %v3229_v54 }
0x1dcb   :  { %2401 = vmatpush.bf16.msrb.mxu2 %v3629_v59 }
0x1dcf   :  { %2402 = vmatpush.bf16.msrb.mxu2 %v3635_v61  ;;  %v1893_v45 = vpop.f32.mrf.mxu1 }
0x1dd0   :  { %v1921_v30 = vadd.f32 %v1893_v45, %v3243_v63 }
0x1e45   :  { %v1784_v60 = vpop.f32.mrf.mxu2 }
0x1e46   :  { %v3896_v58 = vadd.f32 %v3641_v7, %v1784_v60 }
0x1e48   :  { %v1791_v10 = vand.u32 2147483647, %v3896_v58  ;;  %v1789_v2 = vmax.f32 %v3896_v58, 0.0 }
0x1e4a   :  { %v1793_v18 = vsub.f32 0.0, %v1791_v10 }
0x1e4c   :  { %v1795_v39 = vmul.f32 1.442695, %v1793_v18 }
0x1e4d   :  { %v1786_v36 = vpop.f32.mrf.mxu2 }
0x1e4e   :  { %2861 = vpow2.f32 %v1795_v39  ;;  %v1787_v52 = vadd.f32 %v3650_v6, %v1786_v36 }
0x1e50   :  { %v1792_v23 = vand.u32 2147483647, %v1787_v52  ;;  %1870 = vrot.lane.b32.xlu1 %v1787_v52, %s3015_s21  ;;  %v1790_v3 = vmax.f32 %v1787_v52, 0.0 }
0x1e52   :  { %v1794_v1 = vsub.f32 0.0, %v1792_v23 }
0x1e54   :  { %v2862_v59 = vpop.eup %2861  ;;  %v1797_v12 = vmul.f32 1.442695, %v1794_v1 }
0x1e55   :  { %v1799_v61 = vadd.f32 1.0, %v2862_v59 }
0x1e56   :  { %2863 = vpow2.f32 %v1797_v12 }
0x1e57   :  { %2865 = vlog2.f32 %v1799_v61 }
0x1e58   :  { %1924 = vrot.lane.b32.xlu1 %v1920_v8, %s3018_s25 }
0x1e5c   :  { %v2864_v7 = vpop.eup %2863 }
0x1e5d   :  { %v2866_v31 = vpop.eup %2865  ;;  %v1800_v62 = vadd.f32 1.0, %v2864_v7 }
0x1e5e   :  { %v1802_v6 = vmul.f32 0.6931472, %v2866_v31 }
0x1e5f   :  { %2867 = vlog2.f32 %v1800_v62 }
0x1e60   :  { %v3904_v32 = vadd.f32 %v1802_v6, %v1789_v2 }
0x1e62   :  { %1856 = vrot.lane.b32.xlu2 %v3904_v32, %s3016_s24 }
0x1e65   :  { %v2868_v17 = vpop.eup %2867 }
0x1e66   :  { %v1804_v38 = vmul.f32 0.6931472, %v2868_v17 }
0x1e68   :  { %v1806_v20 = vadd.f32 %v1804_v38, %v1790_v3 }
0x1e6a   :  { %1865 = vrot.lane.b32.xlu0 %v1806_v20, %s3017_s11  ;;  %2869 = vlog2.f32 %v1806_v20 }
0x1e70   :  { %v2870_v51 = vpop.eup %2869 }
0x1e71   :  { %v1810_v4 = vmul.f32 0.6931472, %v2870_v51 }
0x1e73   :  { %v3910_v56 = vadd.f32 %v1810_v4, %v3810_v49  ;;  %v2644_v49 = vld [vmem:[%s4309_s2 + $0x28] sm:$0xff] }
0x1ebc   :  { %v1857_v46 = vpop.permute.xlu2 %1856 }
0x1ebd   :  { %v1859_v57 = vmul.f32 %v2643_v37, %v1857_v46 }
0x1ebf   :  { %v1860_v19 = vadd.f32 %v1859_v57, %v3896_v58 }
0x1ec1   :  { %v1861_v40 = vsub.f32 %v3867_v41, %v1860_v19  ;;  %1898 = vperm.xlu2 %2693, %v1860_v19  }
0x1ec2   :  { %v1871_v60 = vpop.permute.xlu1 %1870 }
0x1ec3   :  { %v1862_v15 = vmul.f32 %v1861_v40, %v1861_v40 }
0x1ec5   :  { %v3918_v50 = vadd.f32 %v1862_v15, %v3821_v22 }
0x1ec9   :  { %1926 = vrot.lane.b32.xlu2 %v1921_v30, %s3018_s25 }
0x1eca   :  { %v1925_v59 = vpop.permute.xlu1 %1924 }
0x1edc   :  { %v1866_v35 = vpop.permute.xlu0 %1865 }
0x1edd   :  { %v1868_v34 = vmul.f32 %v2644_v49, %v1866_v35 }
0x1edf   :  { %v1873_v10 = vadd.f32 %v1871_v60, %v1868_v34 }
0x1ee1   :  { %1903 = vperm.xlu0 %2691, %v1873_v10  }
0x1f1b   :  { %v1899_v41 = vpop.permute.xlu2 %1898 }
0x1f1c   :  { %v1906_v18 = vmul.f32 %v3681_v24, %v1899_v41 }
0x1f1e   :  { %v1908_v39 = vadd.f32 %v1906_v18, %v1891_v11 }
0x1f20   :  { %v1910_v22 = vadd.f32 %v3687_v0, %v1908_v39 }
0x1f22   :  { %v1912_v36 = vmul.f32 0.5, %v1910_v22 }
0x1f23   :  { %v1927_v6 = vpop.permute.xlu2 %1926 }
0x1f24   :  { %2871 = vtanh.f32 %v1912_v36 }
0x1f2a   :  { %v2872_v52 = vpop.eup %2871 }
0x1f2b   :  { %v1916_v23 = vmul.f32 0.5, %v2872_v52 }
0x1f2d   :  { %v1918_v1 = vadd.f32 0.5, %v1916_v23 }
0x1f2f   :  { %v1930_v12 = vmul.f32 %v1925_v59, %v1918_v1  ;;  %v1944_v37 = vsub.f32 1.0, %v1918_v1  ;;  %v1956_v40 = vmul.f32 %v1918_v1, %v3837_v27 }
0x1f31   :  { %1934 = vrot.lane.b32.xlu0 %v1930_v12, %s3019_s23 }
0x1f53   :  { %v1904_v61 = vpop.permute.xlu0 %1903 }
0x1f54   :  { %v1907_v8 = vmul.f32 %v3681_v24, %v1904_v61 }
0x1f56   :  { %v1909_v7 = vadd.f32 %v1907_v8, %v1893_v45 }
0x1f58   :  { %v1911_v31 = vadd.f32 %v3694_v16, %v1909_v7 }
0x1f5a   :  { %v1913_v62 = vmul.f32 0.5, %v1911_v31 }
0x1f5c   :  { %2873 = vtanh.f32 %v1913_v62 }
0x1f62   :  { %v2874_v11 = vpop.eup %2873 }
0x1f63   :  { %v1917_v2 = vmul.f32 0.5, %v2874_v11 }
0x1f65   :  { %v1919_v0 = vadd.f32 0.5, %v1917_v2 }
0x1f67   :  { %v1931_v17 = vmul.f32 %v1927_v6, %v1919_v0  ;;  %v1945_v57 = vsub.f32 1.0, %v1919_v0  ;;  %v1957_v15 = vmul.f32 %v1919_v0, %v3835_v5 }
0x1f69   :  { %1936 = vrot.lane.b32.xlu1 %v1931_v17, %s3019_s23 }
0x1fa3   :  { %v1935_v3 = vpop.permute.xlu0 %1934 }
0x1fa4   :  { %v1940_v38 = vadd.f32 %v1935_v3, %v1910_v22 }
0x1fa6   :  { %2875 = vtanh.f32 %v1940_v38 }
0x1fac   :  { %v2876_v20 = vpop.eup %2875 }
0x1fad   :  { %1948 = vrot.lane.b32.xlu2 %v2876_v20, %s3014_s20 }
0x1fdb   :  { %v1937_v51 = vpop.permute.xlu1 %1936 }
0x1fdc   :  { %v1941_v24 = vadd.f32 %v1937_v51, %v1911_v31 }
0x1fde   :  { %2877 = vtanh.f32 %v1941_v24  ;;  %v2650_v24 = vld [vmem:[%s4307_s0 + $0x68] sm:$0xff] }
0x1fe4   :  { %v2878_v4 = vpop.eup %2877 }
0x1fe5   :  { %1950 = vrot.lane.b32.xlu0 %v2878_v4, %s3014_s20 }
0x2007   :  { %v1949_v16 = vpop.permute.xlu2 %1948 }
0x2008   :  { %v1954_v46 = vmul.f32 %v1949_v16, %v1944_v37 }
0x200a   :  { %v3935_v30 = vadd.f32 %v1956_v40, %v1954_v46 }
0x2057   :  { %v1951_v19 = vpop.permute.xlu0 %1950 }
0x2058   :  { %v1955_v45 = vmul.f32 %v1951_v19, %v1945_v57 }
0x205a   :  { %v3937_v49 = vadd.f32 %v1957_v15, %v1955_v45 }
0x205c   :  { %v2719_v35 = vpack.i.bf16 %v3937_v49, %v3935_v30 }
0x205e   :  { %2720 = vrot.lane.b32.xlu1 %v2719_v35, %s3014_s20 }
0x20d0   :  { %v2721_v34 = vpop.permute.xlu1 %2720 }
0x20d1   :  { %v2723_v60 = vunpack.i.h.bf16 %v2721_v34  ;;  %v2722_v10 = vunpack.i.l.bf16 %v2721_v34 }
0x20d3   :  { %v1969_v41 = vsel %vm88_vm1, %v2723_v60, %v3874_v13  ;;  %v1968_v27 = vsel %vm88_vm1, %v2722_v10, %v3872_v43  ;;  %v2186_v60 = vpack.c.bf16 %v3937_v49, %v3935_v30 }
0x20d4   :  { %v1970_v5 = vpack.c.bf16 %v1969_v41, %v1968_v27  ;;  %v3983_v27 = vld [vmem:[%s4310_s3] ss:$0 sm:$0xff]  ;;  %s2548_s3 = sshll.u32 %s3022_s16, 4  ;;  %s2549_s3 = int_to_ptr.vmem [resolvable:$true] %s2548_s3 }
0x20d6   :  { %2648 = vmatmul.msk.bf16.vlgmr.msrb.gmra.mxu3 %vm147_vm0, %v1970_v5 }
0x2159   :  { %v1983_v18 = vpop.f32.mrf.mxu3 }
0x215a   :  { %v1998_v39 = vadd.f32 %v1983_v18, %v3320_v28  ;;  %v1988_v52 = vadd.f32 %v3746_v44, %v1983_v18 }
0x215c   :  { %2002 = vrot.lane.b32.xlu2 %v1998_v39, %s3018_s25  ;;  %v1990_v23 = vmul.f32 0.5, %v1988_v52 }
0x215e   :  { %2879 = vtanh.f32 %v1990_v23 }
0x2161   :  { %v1985_v22 = vpop.f32.mrf.mxu3 }
0x2162   :  { %v1999_v36 = vadd.f32 %v1985_v22, %v3324_v33  ;;  %v1989_v7 = vadd.f32 %v3752_v26, %v1985_v22  ;;  %v3959_v26 = vld [vmem:[%s4307_s0 + $0x60] sm:$0xff] }
0x2164   :  { %2004 = vrot.lane.b32.xlu0 %v1999_v36, %s3018_s25  ;;  %v2880_v1 = vpop.eup %2879  ;;  %v1991_v31 = vmul.f32 0.5, %v1989_v7 }
0x2165   :  { %v1994_v59 = vmul.f32 0.5, %v2880_v1 }
0x2166   :  { %2881 = vtanh.f32 %v1991_v31 }
0x2167   :  { %v1996_v12 = vadd.f32 0.5, %v1994_v59  ;;  %v3996_v59 = vld [vmem:[%s4312_s5 + $0x8] sm:$0xff] }
0x2169   :  { %v2022_v16 = vsub.f32 1.0, %v1996_v12  ;;  %v2034_v19 = vmul.f32 %v1996_v12, %v3872_v43 }
0x216c   :  { %v2882_v62 = vpop.eup %2881 }
0x216d   :  { %v1995_v11 = vmul.f32 0.5, %v2882_v62  ;;  %v4003_v62 = vld [vmem:[%s4314_s7] sm:$0xff] }
0x216f   :  { %v1997_v2 = vadd.f32 0.5, %v1995_v11 }
0x2171   :  { %v2023_v46 = vsub.f32 1.0, %v1997_v2  ;;  %v2035_v40 = vmul.f32 %v1997_v2, %v3874_v13 }
0x21b6   :  { %v2003_v61 = vpop.permute.xlu2 %2002 }
0x21b7   :  { %v2008_v8 = vmul.f32 %v2003_v61, %v1996_v12 }
0x21b9   :  { %2012 = vrot.lane.b32.xlu1 %v2008_v8, %s3019_s23 }
0x21d6   :  { %v2005_v0 = vpop.permute.xlu0 %2004 }
0x21d7   :  { %v2009_v6 = vmul.f32 %v2005_v0, %v1997_v2 }
0x21d9   :  { %2014 = vrot.lane.b32.xlu2 %v2009_v6, %s3019_s23 }
0x222b   :  { %v2013_v44 = vpop.permute.xlu1 %2012 }
0x222c   :  { %v2018_v17 = vadd.f32 %v2013_v44, %v1988_v52  ;;  %v3990_v52 = vld [vmem:[%s4312_s5] sm:$0xff] }
0x222e   :  { %2883 = vtanh.f32 %v2018_v17  ;;  %v4012_v17 = vld [vmem:[%s4314_s7 + $0x8] sm:$0xff] }
0x2233   :  { %v2015_v3 = vpop.permute.xlu2 %2014 }
0x2234   :  { %v2884_v38 = vpop.eup %2883  ;;  %v2019_v20 = vadd.f32 %v2015_v3, %v1989_v7 }
0x2235   :  { %2026 = vrot.lane.b32.xlu0 %v2884_v38, %s3014_s20 }
0x2236   :  { %2885 = vtanh.f32 %v2019_v20 }
0x223c   :  { %v2886_v51 = vpop.eup %2885 }
0x223d   :  { %2048 = vperm.xlu0 %2691, %v3959_v26   ;;  %2028 = vrot.lane.b32.xlu1 %v2886_v51, %s3014_s20 }
0x2245   :  { %2053 = vperm.xlu1 %2692, %v2650_v24  }
0x22a7   :  { %v2027_v4 = vpop.permute.xlu0 %2026 }
0x22a8   :  { %v2032_v37 = vmul.f32 %v2027_v4, %v2022_v16 }
0x22aa   :  { %v3968_v45 = vadd.f32 %v2034_v19, %v2032_v37 }
0x22af   :  { %v2029_v57 = vpop.permute.xlu1 %2028  ;;  %v2049_v13 = vpop.permute.xlu0 %2048 }
0x22b0   :  { %v2033_v15 = vmul.f32 %v2029_v57, %v2023_v46  ;;  %v2056_v5 = vmul.f32 %v3983_v27, %v2049_v13 }
0x22b2   :  { %v3970_v35 = vadd.f32 %v2035_v40, %v2033_v15 }
0x22b4   :  { %v2045_v34 = vpack.c.bf16 %v3970_v35, %v3968_v45 }
0x22b6   :  { %2059 = vrot.lane.b32.xlu2 %v2045_v34, %s3014_s20 }
0x22b7   :  { %v2054_v18 = vpop.permute.xlu1 %2053 }
0x22b8   :  { %v2057_v22 = vmul.f32 %v3983_v27, %v2054_v18  ;;  %v2651_v18 = vld [vmem:[%s4308_s1 + $0x30] sm:$0xff] }
0x22be   :  { %2188 = vrot.lane.b32.xlu2 %v2186_v60, %s3014_s20 }
0x2310   :  { %v2060_v10 = vpop.permute.xlu2 %2059 }
0x2311   :  { %2653 = vmatmul.msk.bf16.vlgmr.msra.gmra.mxu0 %vm88_vm1, %v2060_v10 }
0x2318   :  { %v2189_v43 = vpop.permute.xlu2 %2188 }
0x2319   :  { %2655 = vmatmul.msk.bf16.vlgmr.msra.gmra.mxu1 %vm88_vm1, %v2189_v43 }
0x238e   :  { %v2073_v41 = vpop.f32.mrf.mxu0 }
0x238f   :  { %v2074_v39 = vadd.f32 %v2073_v41, %v2056_v5 }
0x2391   :  { %v2078_v23 = vadd.f32 %v3990_v52, %v2074_v39 }
0x2393   :  { %v2080_v61 = vmax.f32 %v2078_v23, 0.0 }
0x2396   :  { %v2075_v36 = vpop.f32.mrf.mxu0  ;;  %v2202_v51 = vpop.f32.mrf.mxu1 }
0x2397   :  { %v2076_v1 = vadd.f32 %v2075_v36, %v2057_v22  ;;  %v2231_v37 = vadd.f32 %v2202_v51, %v3229_v54 }
0x2399   :  { %v2079_v12 = vadd.f32 %v3996_v59, %v2076_v1  ;;  %v2652_v1 = vld [vmem:[%s4309_s2 + $0x30] sm:$0xff] }
0x239b   :  { %v2081_v8 = vmax.f32 %v2079_v12, 0.0 }
0x239d   :  { %v2082_v7 = vpack.c.bf16 %v2081_v8, %v2080_v61 }
0x239e   :  { %v2204_v61 = vpop.f32.mrf.mxu1 }
0x239f   :  { %2654 = vmatmul.msk.bf16.vlgmr.msra.gmra.mxu2 %vm147_vm0, %v2082_v7 }
0x2422   :  { %v2095_v31 = vpop.f32.mrf.mxu2 }
0x2423   :  { %v4006_v11 = vadd.f32 %v4003_v62, %v2095_v31 }
0x2425   :  { %v2102_v2 = vand.u32 2147483647, %v4006_v11  ;;  %v2100_v40 = vmax.f32 %v4006_v11, 0.0 }
0x2427   :  { %v2104_v0 = vsub.f32 0.0, %v2102_v2  ;;  %v2232_v2 = vadd.f32 %v2204_v61, %v3243_v63 }
0x2429   :  { %v2106_v6 = vmul.f32 1.442695, %v2104_v0 }
0x242a   :  { %v2097_v44 = vpop.f32.mrf.mxu2 }
0x242b   :  { %2887 = vpow2.f32 %v2106_v6  ;;  %v2098_v3 = vadd.f32 %v4012_v17, %v2097_v44  ;;  %v2982_v6 = vld [vmem:[%s4316_s9] ss:$0 sm:$0xff] }
0x242d   :  { %v2103_v38 = vand.u32 2147483647, %v2098_v3  ;;  %2181 = vrot.lane.b32.xlu2 %v2098_v3, %s3015_s21  ;;  %v2101_v10 = vmax.f32 %v2098_v3, 0.0 }
0x242f   :  { %v2105_v20 = vsub.f32 0.0, %v2103_v38  ;;  %v2983_v38 = vld [vmem:[%s4317_s10] sm:$0xff] }
0x2431   :  { %v2888_v24 = vpop.eup %2887  ;;  %v2108_v4 = vmul.f32 1.442695, %v2105_v20 }
0x2432   :  { %v2110_v16 = vadd.f32 1.0, %v2888_v24 }
0x2433   :  { %2889 = vpow2.f32 %v2108_v4 }
0x2434   :  { %2891 = vlog2.f32 %v2110_v16  ;;  %v2984_v16 = vld [vmem:[%s4317_s10 + $0x8] sm:$0xff] }
0x2435   :  { %2235 = vrot.lane.b32.xlu2 %v2231_v37, %s3018_s25 }
0x2439   :  { %v2890_v46 = vpop.eup %2889 }
0x243a   :  { %v2892_v57 = vpop.eup %2891  ;;  %v2111_v19 = vadd.f32 1.0, %v2890_v46 }
0x243b   :  { %v2113_v15 = vmul.f32 0.6931472, %v2892_v57 }
0x243c   :  { %2893 = vlog2.f32 %v2111_v19 }
0x243d   :  { %v4019_v34 = vadd.f32 %v2113_v15, %v2100_v40 }
0x243f   :  { %2167 = vrot.lane.b32.xlu0 %v4019_v34, %s3016_s24 }
0x2442   :  { %v2894_v60 = vpop.eup %2893 }
0x2443   :  { %v2115_v43 = vmul.f32 0.6931472, %v2894_v60 }
0x2445   :  { %v2117_v54 = vadd.f32 %v2115_v43, %v2101_v10 }
0x2447   :  { %2176 = vrot.lane.b32.xlu1 %v2117_v54, %s3017_s11  ;;  %2895 = vlog2.f32 %v2117_v54 }
0x244d   :  { %v2896_v13 = vpop.eup %2895 }
0x244e   :  { %v2121_v41 = vmul.f32 0.6931472, %v2896_v13 }
0x2450   :  { %v4025_v5 = vadd.f32 %v2121_v41, %v3910_v56 }
0x2487   :  { %v2182_v31 = vpop.permute.xlu2 %2181 }
0x248f   :  { %v2236_v40 = vpop.permute.xlu2 %2235 }
0x24b1   :  { %v2168_v39 = vpop.permute.xlu0 %2167 }
0x24b2   :  { %v2170_v22 = vmul.f32 %v2651_v18, %v2168_v39 }
0x24b4   :  { %v2171_v36 = vadd.f32 %v2170_v22, %v4006_v11 }
0x24b6   :  { %v2172_v23 = vsub.f32 %v3959_v26, %v2171_v36  ;;  %2209 = vperm.xlu0 %2691, %v2171_v36  }
0x24b8   :  { %v2173_v12 = vmul.f32 %v2172_v23, %v2172_v23 }
0x24b9   :  { %v2177_v8 = vpop.permute.xlu1 %2176 }
0x24ba   :  { %v2179_v56 = vmul.f32 %v2652_v1, %v2177_v8  ;;  %v4036_v7 = vadd.f32 %v2173_v12, %v3918_v50 }
0x24bc   :  { %v2184_v0 = vadd.f32 %v2182_v31, %v2179_v56 }
0x24be   :  { %2237 = vrot.lane.b32.xlu0 %v2232_v2, %s3018_s25  ;;  %2214 = vperm.xlu1 %2692, %v2184_v0  }
0x2528   :  { %v2210_v26 = vpop.permute.xlu0 %2209 }
0x2529   :  { %v2217_v44 = vmul.f32 %v2982_v6, %v2210_v26 }
0x252b   :  { %v2219_v3 = vadd.f32 %v2217_v44, %v2202_v51 }
0x252d   :  { %v2221_v50 = vadd.f32 %v2983_v38, %v2219_v3 }
0x252f   :  { %v2223_v20 = vmul.f32 0.5, %v2221_v50 }
0x2530   :  { %v2215_v24 = vpop.permute.xlu1 %2214  ;;  %v2238_v54 = vpop.permute.xlu0 %2237 }
0x2531   :  { %2897 = vtanh.f32 %v2223_v20  ;;  %v2218_v63 = vmul.f32 %v2982_v6, %v2215_v24 }
0x2533   :  { %v2220_v4 = vadd.f32 %v2218_v63, %v2204_v61 }
0x2535   :  { %v2222_v37 = vadd.f32 %v2984_v16, %v2220_v4 }
0x2537   :  { %v2898_v46 = vpop.eup %2897  ;;  %v2224_v57 = vmul.f32 0.5, %v2222_v37 }
0x2538   :  { %v2227_v19 = vmul.f32 0.5, %v2898_v46 }
0x2539   :  { %2899 = vtanh.f32 %v2224_v57 }
0x253a   :  { %v2229_v51 = vadd.f32 0.5, %v2227_v19  ;;  %v2986_v19 = vld [vmem:[%s4320_s13 + $0x8] sm:$0xff] }
0x253c   :  { %v2241_v15 = vmul.f32 %v2236_v40, %v2229_v51  ;;  %v2255_v8 = vsub.f32 1.0, %v2229_v51  ;;  %v2267_v2 = vmul.f32 %v2229_v51, %v3935_v30 }
0x253e   :  { %2245 = vrot.lane.b32.xlu1 %v2241_v15, %s3019_s23 }
0x253f   :  { %v2900_v60 = vpop.eup %2899 }
0x2540   :  { %v2228_v10 = vmul.f32 0.5, %v2900_v60 }
0x2542   :  { %v2230_v43 = vadd.f32 0.5, %v2228_v10 }
0x2544   :  { %v2242_v13 = vmul.f32 %v2238_v54, %v2230_v43  ;;  %v2256_v12 = vsub.f32 1.0, %v2230_v43  ;;  %v2268_v31 = vmul.f32 %v2230_v43, %v3937_v49 }
0x2546   :  { %2247 = vrot.lane.b32.xlu2 %v2242_v13, %s3019_s23 }
0x25a0   :  { %v2248_v41 = vpop.permute.xlu2 %2247 }
0x25a1   :  { %v2252_v18 = vadd.f32 %v2248_v41, %v2222_v37  ;;  %v2985_v37 = vld [vmem:[%s4320_s13] sm:$0xff] }
0x25a3   :  { %2901 = vtanh.f32 %v2252_v18 }
0x25a9   :  { %v2902_v39 = vpop.eup %2901 }
0x25aa   :  { %2261 = vrot.lane.b32.xlu1 %v2902_v39, %s3014_s20 }
0x25b0   :  { %v2246_v22 = vpop.permute.xlu1 %2245 }
0x25b1   :  { %v2251_v36 = vadd.f32 %v2246_v22, %v2221_v50 }
0x25b3   :  { %2903 = vtanh.f32 %v2251_v36 }
0x25b9   :  { %v2904_v23 = vpop.eup %2903 }
0x25ba   :  { %2259 = vrot.lane.b32.xlu0 %v2904_v23, %s3014_s20  ;;  %v4077_v23 = vld [vmem:[%s4307_s0 + $0x70] sm:$0xff] }
0x261c   :  { %v2262_v1 = vpop.permute.xlu1 %2261 }
0x261d   :  { %v2266_v61 = vmul.f32 %v2262_v1, %v2256_v12 }
0x261f   :  { %v2270_v26 = vadd.f32 %v2268_v31, %v2266_v61 }
0x262c   :  { %v2260_v56 = vpop.permute.xlu0 %2259 }
0x262d   :  { %v2265_v0 = vmul.f32 %v2260_v56, %v2255_v8  ;;  %v2658_v8 = vld [vmem:[%s4307_s0 + $0x78] sm:$0xff]  ;;  %v204_v56 = vmul.f32 2.0, %v3221_v48  ;;  %s3020_s0 = smov 2  }
0x262f   :  { %v2269_v6 = vadd.f32 %v2267_v2, %v2265_v0  ;;  %v205_v31 = vmul.f32 %v204_v56, %v3221_v48  ;;  %v1206_v2 = vmul.f32 2.0, %v3657_v42 }
0x2631   :  { %v2724_v44 = vpack.i.bf16 %v2270_v26, %v2269_v6  ;;  %v1207_v0 = vmul.f32 %v1206_v2, %v3657_v42  ;;  %v2139_v26 = vmul.f32 2.0, %v4019_v34 }
0x2633   :  { %2725 = vrot.lane.b32.xlu2 %v2724_v44, %s3014_s20  ;;  %v2140_v6 = vmul.f32 %v2139_v26, %v4019_v34  ;;  %v1828_v26 = vmul.f32 2.0, %v3904_v32 }
0x268d   :  { %v2726_v3 = vpop.permute.xlu2 %2725 }
0x268e   :  { %v2728_v38 = vunpack.i.h.bf16 %v2726_v3  ;;  %v2727_v50 = vunpack.i.l.bf16 %v2726_v3 }
0x2690   :  { %v2280_v20 = vsel %vm88_vm1, %v2728_v38, %v3970_v35  ;;  %v2279_v24 = vsel %vm88_vm1, %v2727_v50, %v3968_v45 }
0x2691   :  { %v2281_v63 = vpack.c.bf16 %v2280_v20, %v2279_v24 }
0x2693   :  { %2656 = vmatmul.msk.bf16.vlgmr.msra.gmra.mxu3 %vm147_vm0, %v2281_v63 }
0x2716   :  { %v2294_v49 = vpop.f32.mrf.mxu3 }
0x2717   :  { %v2309_v30 = vadd.f32 %v2294_v49, %v3320_v28  ;;  %v2299_v46 = vadd.f32 %v2985_v37, %v2294_v49 }
0x2719   :  { %2313 = vrot.lane.b32.xlu0 %v2309_v30, %s3018_s25  ;;  %v2301_v57 = vmul.f32 0.5, %v2299_v46 }
0x271b   :  { %2905 = vtanh.f32 %v2301_v57 }
0x271e   :  { %v2296_v4 = vpop.f32.mrf.mxu3 }
0x271f   :  { %v2310_v16 = vadd.f32 %v2296_v4, %v3324_v33  ;;  %v2300_v51 = vadd.f32 %v2986_v19, %v2296_v4 }
0x2721   :  { %2315 = vrot.lane.b32.xlu1 %v2310_v16, %s3018_s25  ;;  %v2302_v28 = vmul.f32 0.5, %v2300_v51  ;;  %v2906_v40 = vpop.eup %2905 }
0x2722   :  { %v2305_v15 = vmul.f32 0.5, %v2906_v40  ;;  %v1517_v40 = vmul.f32 2.0, %v3804_v53 }
0x2723   :  { %2907 = vtanh.f32 %v2302_v28 }
0x2724   :  { %v2307_v60 = vadd.f32 0.5, %v2305_v15  ;;  %v1518_v15 = vmul.f32 %v1517_v40, %v3804_v53 }
0x2726   :  { %v2333_v3 = vsub.f32 1.0, %v2307_v60  ;;  %v2345_v63 = vmul.f32 %v2307_v60, %v3968_v45 }
0x2729   :  { %v2908_v33 = vpop.eup %2907 }
0x272a   :  { %v2306_v54 = vmul.f32 0.5, %v2908_v33 }
0x272c   :  { %v2308_v13 = vadd.f32 0.5, %v2306_v54 }
0x272e   :  { %v2334_v50 = vsub.f32 1.0, %v2308_v13  ;;  %v2346_v49 = vmul.f32 %v2308_v13, %v3970_v35 }
0x278b   :  { %v2314_v10 = vpop.permute.xlu0 %2313 }
0x278c   :  { %v2319_v43 = vmul.f32 %v2314_v10, %v2307_v60 }
0x278e   :  { %2323 = vrot.lane.b32.xlu2 %v2319_v43, %s3019_s23 }
0x2793   :  { %v2316_v41 = vpop.permute.xlu1 %2315 }
0x2794   :  { %v2320_v18 = vmul.f32 %v2316_v41, %v2308_v13 }
0x2796   :  { %2325 = vrot.lane.b32.xlu0 %v2320_v18, %s3019_s23 }
0x27e8   :  { %v2324_v39 = vpop.permute.xlu2 %2323 }
0x27e9   :  { %v2329_v22 = vadd.f32 %v2324_v39, %v2299_v46 }
0x27eb   :  { %2909 = vtanh.f32 %v2329_v22 }
0x27f1   :  { %v2910_v36 = vpop.eup %2909 }
0x27f2   :  { %2337 = vrot.lane.b32.xlu1 %v2910_v36, %s3014_s20 }
0x27fa   :  { %2357 = vperm.xlu1 %2692, %v4077_v23  }
0x2802   :  { %574 = vrot.lane.b32.xlu1 %v3379_v14, %s3015_s21 }
0x2808   :  { %v2326_v1 = vpop.permute.xlu0 %2325 }
0x2809   :  { %v2330_v12 = vadd.f32 %v2326_v1, %v2300_v51 }
0x280a   :  { %1507 = vrot.lane.b32.xlu1 %v3796_v55, %s3015_s21 }
0x280b   :  { %2911 = vtanh.f32 %v2330_v12 }
0x2811   :  { %v2912_v61 = vpop.eup %2911 }
0x2812   :  { %2339 = vrot.lane.b32.xlu2 %v2912_v61, %s3014_s20 }
0x281a   :  { %2362 = vperm.xlu2 %2693, %v2658_v8  }
0x2822   :  { %885 = vrot.lane.b32.xlu2 %v3482_v25, %s3015_s21 }
0x282a   :  { %1818 = vrot.lane.b32.xlu2 %v3896_v58, %s3015_s21 }
0x2832   :  { %207 = vrot.lane.b32.xlu2 %v205_v31, %s3015_s21 }
0x283a   :  { %1209 = vrot.lane.b32.xlu2 %v1207_v0, %s3015_s21 }
0x2842   :  { %2142 = vrot.lane.b32.xlu2 %v2140_v6, %s3015_s21 }
0x2864   :  { %v2338_v44 = vpop.permute.xlu1 %2337 }
0x2865   :  { %v2343_v38 = vmul.f32 %v2338_v44, %v2333_v3  ;;  %v1829_v44 = vmul.f32 %v1828_v26, %v3904_v32 }
0x2867   :  { %v2347_v4 = vadd.f32 %v2345_v63, %v2343_v38 }
0x286c   :  { %v2358_v20 = vpop.permute.xlu1 %2357  ;;  %v2340_v24 = vpop.permute.xlu2 %2339 }
0x286d   :  { %v2344_v30 = vmul.f32 %v2340_v24, %v2334_v50  ;;  %v2365_v33 = vmul.f32 %v3983_v27, %v2358_v20 }
0x286f   :  { %v2348_v16 = vadd.f32 %v2346_v49, %v2344_v30 }
0x2871   :  { %v2354_v37 = vpack.c.bf16 %v2348_v16, %v2347_v4 }
0x2873   :  { %2368 = vrot.lane.b32.xlu0 %v2354_v37, %s3014_s20  ;;  %s3021_s20 = smov 1  }
0x2874   :  { %v575_v46 = vpop.permute.xlu1 %574  ;;  %v2363_v10 = vpop.permute.xlu2 %2362 }
0x2875   :  { %v577_v57 = vsub.f32 %v3379_v14, %v575_v46  ;;  %v584_v14 = vmul.f32 2.0, %v3387_v47  ;;  %v2366_v54 = vmul.f32 %v3983_v27, %v2363_v10 }
0x2877   :  { %v578_v19 = vmul.f32 %v577_v57, %v577_v57  ;;  %v585_v28 = vmul.f32 %v584_v14, %v3387_v47 }
0x2879   :  { %580 = vrot.lane.b32.xlu2 %v578_v19, %s3020_s0 }
0x287b   :  { %194 = vrot.lane.b32.xlu0 %v3200_v29, %s3015_s21 }
0x287c   :  { %v1508_v51 = vpop.permute.xlu1 %1507  ;;  %v886_v0 = vpop.permute.xlu2 %885 }
0x287d   :  { %v1510_v45 = vsub.f32 %v3796_v55, %v1508_v51  ;;  %v888_v19 = vsub.f32 %v3482_v25, %v886_v0 }
0x287f   :  { %v1511_v35 = vmul.f32 %v1510_v45, %v1510_v45 }
0x2881   :  { %1513 = vrot.lane.b32.xlu2 %v1511_v35, %s3020_s0  ;;  %v889_v35 = vmul.f32 %v888_v19, %v888_v19 }
0x2883   :  { %1196 = vrot.lane.b32.xlu0 %v3644_v9, %s3015_s21 }
0x2884   :  { %v1819_v38 = vpop.permute.xlu2 %1818 }
0x2885   :  { %v1821_v40 = vsub.f32 %v3896_v58, %v1819_v38 }
0x288b   :  { %2129 = vrot.lane.b32.xlu0 %v4006_v11, %s3015_s21 }
0x288c   :  { %v4145_v46 = vpop.permute.xlu2 %207 }
0x288d   :  { %vm215_vm11 = vweird.f32 %v4145_v46 }
0x2893   :  { %587 = vrot.lane.b32.xlu0 %v585_v28, %s3015_s21 }
0x289b   :  { %1520 = vrot.lane.b32.xlu0 %v1518_v15, %s3015_s21 }
0x28e5   :  { %v2369_v55 = vpop.permute.xlu0 %2368 }
0x28e6   :  { %2660 = vmatmul.msk.bf16.vlgmr.msrb.gmra.mxu0 %vm88_vm1, %v2369_v55 }
0x28ed   :  { %v195_v12 = vpop.permute.xlu0 %194 }
0x28ee   :  { %v197_v50 = vsub.f32 %v3200_v29, %v195_v12 }
0x28f0   :  { %v198_v24 = vmul.f32 %v197_v50, %v197_v50  ;;  %v1505_v50 = vmul.f32 %v3804_v53, %v3804_v53 }
0x2963   :  { %v2382_v60 = vpop.f32.mrf.mxu0 }
0x2964   :  { %v2383_v43 = vadd.f32 %v2382_v60, %v2365_v33 }
0x2966   :  { %v2387_v41 = vadd.f32 %v3990_v52, %v2383_v43  ;;  %v895_v52 = vmul.f32 2.0, %v3490_v21 }
0x2968   :  { %v2389_v22 = vmax.f32 %v2387_v41, 0.0  ;;  %v896_v2 = vmul.f32 %v895_v52, %v3490_v21 }
0x296b   :  { %v2384_v13 = vpop.f32.mrf.mxu0 }
0x296c   :  { %v2385_v18 = vadd.f32 %v2384_v13, %v2366_v54 }
0x296e   :  { %v2388_v39 = vadd.f32 %v3996_v59, %v2385_v18  ;;  %v1197_v59 = vpop.permute.xlu0 %1196 }
0x296f   :  { %v1199_v4 = vsub.f32 %v3644_v9, %v1197_v59  ;;  %v4152_v9 = vpop.permute.xlu2 %1209 }
0x2970   :  { %v2390_v36 = vmax.f32 %v2388_v39, 0.0  ;;  %vm1217_vm15 = vweird.f32 %v4152_v9 }
0x2971   :  { %v1200_v29 = vmul.f32 %v1199_v4, %v1199_v4 }
0x2972   :  { %v2391_v1 = vpack.c.bf16 %v2390_v36, %v2389_v22 }
0x2974   :  { %2661 = vmatmul.msk.bf16.vlgmr.msrb.gmra.mxu2 %vm147_vm0, %v2391_v1 }
0x2976   :  { %v2130_v3 = vpop.permute.xlu0 %2129 }
0x2977   :  { %v2132_v51 = vsub.f32 %v4006_v11, %v2130_v3  ;;  %v1822_v11 = vmul.f32 %v1821_v40, %v1821_v40  ;;  %v4163_v10 = vpop.permute.xlu2 %2142 }
0x2979   :  { %v2133_v14 = vmul.f32 %v2132_v51, %v2132_v51 }
0x297e   :  { %v588_v16 = vpop.permute.xlu0 %587 }
0x297f   :  { %v601_v41 = vand.u32 2147483648, %v588_v16  ;;  %vm595_vm3 = vweird.f32 %v588_v16  ;;  %v599_v18 = vand.u32 2147483647, %v588_v16  ;;  %v581_v12 = vpop.permute.xlu2 %580 }
0x2981   :  { %vm600_vm5 = vcmp.eq.f32.partialorder %v599_v18, 8.507059e+37 }
0x2986   :  { %v1521_v25 = vpop.permute.xlu0 %1520 }
0x2987   :  { %vm1528_vm7 = vweird.f32 %v1521_v25  ;;  %v1514_v3 = vpop.permute.xlu2 %1513 }
0x29f7   :  { %v2404_v61 = vpop.f32.mrf.mxu2 }
0x29f8   :  { %v4127_v8 = vadd.f32 %v4003_v62, %v2404_v61  ;;  %v602_v61 = vor.u32 1.1754944e-38, %v601_v41  ;;  %v192_v41 = vmul.f32 %v3221_v48, %v3221_v48 }
0x29fa   :  { %v2411_v56 = vand.u32 2147483647, %v4127_v8  ;;  %2438 = vrot.lane.b32.xlu1 %v4127_v8, %s3015_s21  ;;  %v2409_v63 = vmax.f32 %v4127_v8, 0.0 }
0x29fc   :  { %v2413_v27 = vsub.f32 0.0, %v2411_v56  ;;  %v572_v56 = vmul.f32 %v3387_v47, %v3387_v47 }
0x29fe   :  { %v2415_v31 = vmul.f32 1.442695, %v2413_v27  ;;  %v583_v52 = vadd.f32 %v581_v12, %v572_v56 }
0x2a00   :  { %2913 = vpow2.f32 %v2415_v31 }
0x2a02   :  { %898 = vrot.lane.b32.xlu1 %v896_v2, %s3015_s21 }
0x2a06   :  { %v2914_v62 = vpop.eup %2913 }
0x2a07   :  { %v2419_v6 = vadd.f32 1.0, %v2914_v62  ;;  %v1534_v62 = vand.u32 2147483648, %v1521_v25 }
0x2a09   :  { %2915 = vlog2.f32 %v2419_v6  ;;  %v1532_v6 = vand.u32 2147483647, %v1521_v25  ;;  %v1535_v38 = vor.u32 1.1754944e-38, %v1534_v62 }
0x2a0a   :  { %1831 = vrot.lane.b32.xlu1 %v1829_v44, %s3015_s21  ;;  %2917 = vrcp.f32 %v588_v16 }
0x2a0b   :  { %2919 = vlog2.f32 %v3387_v47  ;;  %vm1533_vm9 = vcmp.eq.f32.partialorder %v1532_v6, 8.507059e+37 }
0x2a0c   :  { %2921 = vlog2.f32 %v3221_v48  ;;  %v1221_v48 = vand.u32 2147483647, %v4152_v9 }
0x2a0d   :  { %2923 = vlog2.f32 %v3490_v21 }
0x2a0e   :  { %2925 = vrcp.f32 %v1521_v25  ;;  %vm1222_vm1 = vcmp.eq.f32.partialorder %v1221_v48, 8.507059e+37 }
0x2a0f   :  { %v2916_v20 = vpop.eup %2915  ;;  %2927 = vlog2.f32 %v3657_v42 }
0x2a10   :  { %v2422_v49 = vmul.f32 0.6931472, %v2916_v20  ;;  %v2918_v45 = vpop.eup %2917  ;;  %2929 = vlog2.f32 %v4019_v34 }
0x2a11   :  { %v591_v28 = vmul.f32 %v2918_v45, %v588_v16  ;;  %v2920_v55 = vpop.eup %2919  ;;  %vm596_vm2 = vweird.f32 %v2918_v45  ;;  %2931 = vrcp.f32 %v4145_v46 }
0x2a12   :  { %v4140_v30 = vadd.f32 %v2422_v49, %v2409_v63  ;;  %200 = vrot.lane.b32.xlu1 %v198_v24, %s3020_s0  ;;  %v4161_v33 = vmul.f32 0.6931472, %v2920_v55  ;;  %v2922_v58 = vpop.eup %2921  ;;  %vm597_vm4 = vmor %vm595_vm3, %vm596_vm2  ;;  %v1516_v24 = vadd.f32 %v1514_v3, %v1505_v50  ;;  %2933 = vrcp.f32 %v4152_v9 }
0x2a13   :  { %v592_v15 = vsub.f32 1.0, %v591_v28  ;;  %v2924_v43 = vpop.eup %2923  ;;  %v4167_v39 = vmul.f32 0.6931472, %v2922_v58 }
0x2a14   :  { %v2448_v37 = vmul.f32 2.0, %v4140_v30  ;;  %v2926_v13 = vpop.eup %2925  ;;  %v4171_v36 = vmul.f32 0.6931472, %v2924_v43  ;;  %v219_v43 = vand.u32 2147483647, %v4145_v46 }
0x2a15   :  { %v593_v60 = vmul.f32 %v2918_v45, %v592_v15  ;;  %v1524_v22 = vmul.f32 %v2926_v13, %v1521_v25  ;;  %v2928_v0 = vpop.eup %2927  ;;  %vm1529_vm6 = vweird.f32 %v2926_v13 }
0x2a16   :  { %v2449_v57 = vmul.f32 %v2448_v37, %v4140_v30  ;;  %v4179_v47 = vmul.f32 0.6931472, %v2928_v0  ;;  %vm1530_vm8 = vmor %vm1528_vm7, %vm1529_vm6  ;;  %v2930_v49 = vpop.eup %2929  ;;  %vm220_vm13 = vcmp.eq.f32.partialorder %v219_v43, 8.507059e+37  ;;  %vm2150_vm6 = vweird.f32 %v4163_v10 }
0x2a17   :  { %v594_v54 = vadd.f32 %v2918_v45, %v593_v60  ;;  %v1525_v31 = vsub.f32 1.0, %v1524_v22  ;;  %v4187_v4 = vmul.f32 0.6931472, %v2930_v49  ;;  %v221_v60 = vand.u32 2147483648, %v4145_v46 }
0x2a18   :  { %2451 = vrot.lane.b32.xlu0 %v2449_v57, %s3015_s21  ;;  %v883_v49 = vmul.f32 %v3490_v21, %v3490_v21 }
0x2a19   :  { %v598_v1 = vsel %vm597_vm4, %v2918_v45, %v594_v54  ;;  %v1526_v2 = vmul.f32 %v2926_v13, %v1525_v31 }
0x2a1a   :  { %1202 = vrot.lane.b32.xlu1 %v1200_v29, %s3020_s0  ;;  %v603_v27 = vsel %vm600_vm5, %v602_v61, %v598_v1  ;;  %v2932_v29 = vpop.eup %2931  ;;  %v222_v1 = vor.u32 1.1754944e-38, %v221_v60 }
0x2a1b   :  { %v604_v59 = vmul.f32 %v603_v27, %v583_v52  ;;  %v1527_v26 = vadd.f32 %v2926_v13, %v1526_v2  ;;  %v211_v19 = vmul.f32 %v2932_v29, %v4145_v46  ;;  %vm216_vm10 = vweird.f32 %v2932_v29 }
0x2a1c   :  { %vm217_vm12 = vmor %vm215_vm11, %vm216_vm10  ;;  %v1223_v46 = vand.u32 2147483648, %v4152_v9 }
0x2a1d   :  { %v1531_v44 = vsel %vm1530_vm8, %v2926_v13, %v1527_v26  ;;  %v212_v45 = vsub.f32 1.0, %v211_v19  ;;  %v1194_v26 = vmul.f32 %v3657_v42, %v3657_v42  ;;  %v2154_v19 = vand.u32 2147483647, %v4163_v10 }
0x2a1e   :  { %v1536_v20 = vsel %vm1533_vm9, %v1535_v38, %v1531_v44  ;;  %v1224_v44 = vor.u32 1.1754944e-38, %v1223_v46 }
0x2a1f   :  { %v1537_v63 = vmul.f32 %v1536_v20, %v1516_v24  ;;  %vm2155_vm9 = vcmp.eq.f32.partialorder %v2154_v19, 8.507059e+37 }
0x2a20   :  { %891 = vrot.lane.b32.xlu0 %v889_v35, %s3020_s0  ;;  %v2934_v35 = vpop.eup %2933 }
0x2a21   :  { %v1213_v28 = vmul.f32 %v2934_v35, %v4152_v9  ;;  %vm1218_vm14 = vweird.f32 %v2934_v35 }
0x2a22   :  { %2135 = vrot.lane.b32.xlu1 %v2133_v14, %s3020_s0  ;;  %v213_v14 = vmul.f32 %v2932_v29, %v212_v45  ;;  %vm1219_vm0 = vmor %vm1217_vm15, %vm1218_vm14 }
0x2a23   :  { %v1214_v25 = vsub.f32 1.0, %v1213_v28 }
0x2a24   :  { %v214_v55 = vadd.f32 %v2932_v29, %v213_v14 }
0x2a25   :  { %v1215_v54 = vmul.f32 %v2934_v35, %v1214_v25 }
0x2a26   :  { %v218_v18 = vsel %vm217_vm12, %v2932_v29, %v214_v55 }
0x2a27   :  { %v223_v56 = vsel %vm220_vm13, %v222_v1, %v218_v18  ;;  %v1216_v31 = vadd.f32 %v2934_v35, %v1215_v54 }
0x2a28   :  { %1824 = vrot.lane.b32.xlu0 %v1822_v11, %s3020_s0 }
0x2a29   :  { %v1220_v62 = vsel %vm1219_vm0, %v2934_v35, %v1216_v31  ;;  %v2127_v35 = vmul.f32 %v4019_v34, %v4019_v34 }
0x2a2a   :  { %568 = vrot.lane.b32.xlu1 %v4161_v33, %s3021_s20  ;;  %v1225_v20 = vsel %vm1222_vm1, %v1224_v44, %v1220_v62 }
0x2a30   :  { %188 = vrot.lane.b32.xlu0 %v4167_v39, %s3021_s20 }
0x2a32   :  { %879 = vrot.lane.b32.xlu1 %v4171_v36, %s3021_s20 }
0x2a38   :  { %606 = vrot.lane.b32.xlu0 %v604_v59, %s3021_s20 }
0x2a40   :  { %1190 = vrot.lane.b32.xlu0 %v4179_v47, %s3021_s20 }
0x2a48   :  { %1539 = vrot.lane.b32.xlu0 %v1537_v63, %s3021_s20 }
0x2a50   :  { %2123 = vrot.lane.b32.xlu0 %v4187_v4, %s3021_s20 }
0x2a6c   :  { %v2439_v16 = vpop.permute.xlu1 %2438 }
0x2a6d   :  { %v2441_v37 = vsub.f32 %v4127_v8, %v2439_v16  ;;  %v2436_v16 = vmul.f32 %v4140_v30, %v4140_v30 }
0x2a6f   :  { %v2442_v57 = vmul.f32 %v2441_v37, %v2441_v37  ;;  %v2156_v37 = vand.u32 2147483648, %v4163_v10 }
0x2a71   :  { %2444 = vrot.lane.b32.xlu2 %v2442_v57, %s3020_s0  ;;  %v2157_v60 = vor.u32 1.1754944e-38, %v2156_v37 }
0x2a74   :  { %v4196_v51 = vpop.permute.xlu1 %898 }
0x2a75   :  { %2935 = vrcp.f32 %v4196_v51  ;;  %v912_v9 = vand.u32 2147483648, %v4196_v51  ;;  %vm906_vm4 = vweird.f32 %v4196_v51  ;;  %v910_v24 = vand.u32 2147483647, %v4196_v51 }
0x2a76   :  { %2937 = vrcp.f32 %v4163_v10 }
0x2a77   :  { %vm911_vm8 = vcmp.eq.f32.partialorder %v910_v24, 8.507059e+37 }
0x2a7b   :  { %v4203_v15 = vpop.eup %2935 }
0x2a7c   :  { %v4201_v40 = vpop.permute.xlu1 %1831  ;;  %v4205_v11 = vpop.eup %2937  ;;  %v902_v58 = vmul.f32 %v4203_v15, %v4196_v51  ;;  %vm907_vm2 = vweird.f32 %v4203_v15  ;;  %v913_v51 = vor.u32 1.1754944e-38, %v912_v9 }
0x2a7d   :  { %v2146_v13 = vmul.f32 %v4205_v11, %v4163_v10  ;;  %2939 = vrcp.f32 %v4201_v40  ;;  %vm2151_vm3 = vweird.f32 %v4205_v11  ;;  %vm4237_vm5 = vmor %vm906_vm4, %vm907_vm2  ;;  %v1845_v1 = vand.u32 2147483648, %v4201_v40 }
0x2a7e   :  { %v903_v12 = vsub.f32 1.0, %v902_v58  ;;  %2941 = vlog2.f32 %v3904_v32  ;;  %vm2152_vm7 = vmor %vm2150_vm6, %vm2151_vm3  ;;  %vm1839_vm11 = vweird.f32 %v4201_v40  ;;  %vm2489_vm2 = vcmask 7168  }
0x2a7f   :  { %v2147_v27 = vsub.f32 1.0, %v2146_v13  ;;  %2943 = vlog2.f32 %v3804_v53  ;;  %v1846_v31 = vor.u32 1.1754944e-38, %v1845_v1 }
0x2a80   :  { %v904_v59 = vmul.f32 %v4203_v15, %v903_v12  ;;  %2945 = vlog2.f32 %v4140_v30 }
0x2a81   :  { %v2148_v0 = vmul.f32 %v4205_v11, %v2147_v27  ;;  %v1843_v27 = vand.u32 2147483647, %v4201_v40 }
0x2a82   :  { %v905_v38 = vadd.f32 %v4203_v15, %v904_v59 }
0x2a83   :  { %v2940_v50 = vpop.eup %2939  ;;  %v2149_v63 = vadd.f32 %v4205_v11, %v2148_v0  ;;  %vm1844_vm13 = vcmp.eq.f32.partialorder %v1843_v27, 8.507059e+37 }
0x2a84   :  { %v201_v22 = vpop.permute.xlu1 %200  ;;  %v1835_v57 = vmul.f32 %v2940_v50, %v4201_v40  ;;  %v909_v29 = vsel %vm4237_vm5, %v4203_v15, %v905_v38  ;;  %v2942_v28 = vpop.eup %2941  ;;  %vm1840_vm10 = vweird.f32 %v2940_v50 }
0x2a85   :  { %v203_v61 = vadd.f32 %v201_v22, %v192_v41  ;;  %v2153_v14 = vsel %vm2152_vm7, %v4205_v11, %v2149_v63  ;;  %v914_v25 = vsel %vm911_vm8, %v913_v51, %v909_v29  ;;  %v4256_v13 = vmul.f32 0.6931472, %v2942_v28  ;;  %v2406_v41 = vpop.f32.mrf.mxu2  ;;  %v2944_v11 = vpop.eup %2943  ;;  %vm1841_vm12 = vmor %vm1839_vm11, %vm1840_vm10 }
0x2a86   :  { %v1836_v15 = vsub.f32 1.0, %v1835_v57  ;;  %v2158_v43 = vsel %vm2155_vm9, %v2157_v60, %v2153_v14  ;;  %v2407_v18 = vadd.f32 %v4012_v17, %v2406_v41  ;;  %v4261_v53 = vmul.f32 0.6931472, %v2944_v11 }
0x2a87   :  { %v224_v52 = vmul.f32 %v223_v56, %v203_v61  ;;  %v1816_v56 = vmul.f32 %v3904_v32, %v3904_v32  ;;  %v2946_v32 = vpop.eup %2945 }
0x2a88   :  { %v1837_v34 = vmul.f32 %v2940_v50, %v1836_v15  ;;  %v2412_v61 = vand.u32 2147483647, %v2407_v18  ;;  %v4275_v40 = vmul.f32 0.6931472, %v2946_v32  ;;  %v2410_v9 = vmax.f32 %v2407_v18, 0.0 }
0x2a89   :  { %226 = vrot.lane.b32.xlu2 %v224_v52, %s3021_s20 }
0x2a8a   :  { %v4222_v2 = vpop.permute.xlu0 %2451  ;;  %v1838_v22 = vadd.f32 %v2940_v50, %v1837_v34  ;;  %v2414_v46 = vsub.f32 0.0, %v2412_v61 }
0x2a8b   :  { %v2465_v63 = vand.u32 2147483648, %v4222_v2  ;;  %vm2459_vm15 = vweird.f32 %v4222_v2 }
0x2a8c   :  { %v1203_v6 = vpop.permute.xlu1 %1202  ;;  %v1842_v17 = vsel %vm1841_vm12, %v2940_v50, %v1838_v22  ;;  %v2417_v0 = vmul.f32 1.442695, %v2414_v46 }
0x2a8d   :  { %v1205_v3 = vadd.f32 %v1203_v6, %v1194_v26  ;;  %v1847_v59 = vsel %vm1844_vm13, %v1846_v31, %v1842_v17  ;;  %v2466_v29 = vor.u32 1.1754944e-38, %v2465_v63 }
0x2a8e   :  { %2947 = vpow2.f32 %v2417_v0 }
0x2a8f   :  { %v1226_v42 = vmul.f32 %v1225_v20, %v1205_v3  ;;  %2949 = vrcp.f32 %v4222_v2 }
0x2a91   :  { %1228 = vrot.lane.b32.xlu1 %v1226_v42, %s3021_s20 }
0x2a92   :  { %v892_v21 = vpop.permute.xlu0 %891 }
0x2a93   :  { %v894_v45 = vadd.f32 %v892_v21, %v883_v49  ;;  %v2463_v49 = vand.u32 2147483647, %v4222_v2 }
0x2a94   :  { %v2136_v55 = vpop.permute.xlu1 %2135  ;;  %v2948_v26 = vpop.eup %2947 }
0x2a95   :  { %v915_v10 = vmul.f32 %v914_v25, %v894_v45  ;;  %v2138_v58 = vadd.f32 %v2136_v55, %v2127_v35  ;;  %v2420_v62 = vadd.f32 1.0, %v2948_v26  ;;  %v2950_v6 = vpop.eup %2949  ;;  %vm2464_vm1 = vcmp.eq.f32.partialorder %v2463_v49, 8.507059e+37 }
0x2a96   :  { %v2455_v44 = vmul.f32 %v2950_v6, %v4222_v2  ;;  %vm2460_vm14 = vweird.f32 %v2950_v6 }
0x2a97   :  { %v2159_v54 = vmul.f32 %v2158_v43, %v2138_v58  ;;  %917 = vrot.lane.b32.xlu2 %v915_v10, %s3021_s20  ;;  %2951 = vlog2.f32 %v2420_v62  ;;  %vm2461_vm0 = vmor %vm2459_vm15, %vm2460_vm14 }
0x2a98   :  { %v2456_v38 = vsub.f32 1.0, %v2455_v44 }
0x2a99   :  { %1812 = vrot.lane.b32.xlu1 %v4256_v13, %s3021_s20 }
0x2a9a   :  { %v1825_v12 = vpop.permute.xlu0 %1824  ;;  %v2457_v20 = vmul.f32 %v2950_v6, %v2456_v38 }
0x2a9b   :  { %v1827_v52 = vadd.f32 %v1825_v12, %v1816_v56 }
0x2a9c   :  { %v2458_v24 = vadd.f32 %v2950_v6, %v2457_v20  ;;  %v569_v28 = vpop.permute.xlu1 %568 }
0x2a9d   :  { %v1848_v48 = vmul.f32 %v1847_v59, %v1827_v52  ;;  %v2952_v3 = vpop.eup %2951  ;;  %v571_v34 = vsub.f32 %v4161_v33, %v569_v28 }
0x2a9e   :  { %v2424_v50 = vmul.f32 0.6931472, %v2952_v3  ;;  %v2462_v37 = vsel %vm2461_vm0, %v2950_v6, %v2458_v24 }
0x2a9f   :  { %1501 = vrot.lane.b32.xlu2 %v4261_v53, %s3021_s20  ;;  %v2467_v51 = vsel %vm2464_vm1, %v2466_v29, %v2462_v37 }
0x2aa0   :  { %v2426_v42 = vadd.f32 %v2424_v50, %v2410_v9 }
0x2aa1   :  { %2161 = vrot.lane.b32.xlu1 %v2159_v54, %s3021_s20 }
0x2aa2   :  { %2953 = vlog2.f32 %v2426_v42  ;;  %v189_v2 = vpop.permute.xlu0 %188 }
0x2aa3   :  { %v191_v54 = vsub.f32 %v4167_v39, %v189_v2 }
0x2aa7   :  { %1850 = vrot.lane.b32.xlu2 %v1848_v48, %s3021_s20 }
0x2aa8   :  { %v2954_v45 = vpop.eup %2953 }
0x2aa9   :  { %2476 = vrot.lane.b32.xlu1 %v4140_v30, %s3016_s24  ;;  %v2430_v35 = vmul.f32 0.6931472, %v2954_v45  ;;  %v880_v30 = vpop.permute.xlu1 %879 }
0x2aaa   :  { %v607_v55 = vpop.permute.xlu0 %606  ;;  %v882_v11 = vsub.f32 %v4171_v36, %v880_v30 }
0x2aab   :  { %v2484_v14 = vadd.f32 %v2430_v35, %v4025_v5  ;;  %v609_v22 = vadd.f32 %v607_v55, %v571_v34 }
0x2aaf   :  { %2432 = vrot.lane.b32.xlu2 %v4275_v40, %s3021_s20 }
0x2ab2   :  { %v1191_v15 = vpop.permute.xlu0 %1190 }
0x2ab3   :  { %v1193_v1 = vsub.f32 %v4179_v47, %v1191_v15 }
0x2aba   :  { %v1540_v43 = vpop.permute.xlu0 %1539 }
0x2ac2   :  { %v2124_v31 = vpop.permute.xlu0 %2123 }
0x2ac3   :  { %v2126_v33 = vsub.f32 %v4187_v4, %v2124_v31  ;;  %v2659_v4 = vld [vmem:[%s4308_s1 + $0x38] sm:$0xff] }
0x2acb   :  { %v2445_v57 = vpop.permute.xlu2 %2444 }
0x2acc   :  { %v2447_v19 = vadd.f32 %v2445_v57, %v2436_v16 }
0x2ace   :  { %v2468_v21 = vmul.f32 %v2467_v51, %v2447_v19 }
0x2ad0   :  { %2470 = vrot.lane.b32.xlu0 %v2468_v21, %s3021_s20 }
0x2ad8   :  { %2517 = vrot.lane.b32.xlu0 %v2484_v14, %s3017_s11 }
0x2ae3   :  { %v227_v25 = vpop.permute.xlu2 %226 }
0x2ae4   :  { %v229_v5 = vadd.f32 %v227_v25, %v191_v54 }
0x2ae6   :  { %v610_v61 = vadd.f32 %v609_v22, %v229_v5 }
0x2af1   :  { %v918_v60 = vpop.permute.xlu2 %917 }
0x2af2   :  { %v920_v12 = vadd.f32 %v918_v60, %v882_v11 }
0x2af4   :  { %v921_v27 = vadd.f32 %v920_v12, %v610_v61 }
0x2af9   :  { %v1502_v58 = vpop.permute.xlu2 %1501 }
0x2afa   :  { %v1504_v17 = vsub.f32 %v4261_v53, %v1502_v58  ;;  %v2534_v58 = vlaneseq }
0x2afc   :  { %v1542_v59 = vadd.f32 %v1540_v43, %v1504_v17  ;;  %v2535_v34 = vand.u32 127, %v2534_v58 }
0x2afe   :  { %vm2538_vm3 = vcmp.eq.s32.totalorder %v2535_v34, 2  ;;  %vm2537_vm4 = vcmp.eq.s32.totalorder %v2535_v34, 1  ;;  %vm2536_vm5 = vcmp.eq.s32.totalorder %v2535_v34, 0 }
0x2b01   :  { %v1851_v18 = vpop.permute.xlu2 %1850 }
0x2b03   :  { %v1229_v10 = vpop.permute.xlu1 %1228 }
0x2b04   :  { %v1231_v56 = vadd.f32 %v1229_v10, %v1193_v1 }
0x2b06   :  { %v1232_v39 = vadd.f32 %v1231_v56, %v921_v27 }
0x2b08   :  { %v1543_v0 = vadd.f32 %v1542_v59, %v1232_v39 }
0x2b09   :  { %v2433_v48 = vpop.permute.xlu2 %2432 }
0x2b0a   :  { %v2435_v47 = vsub.f32 %v4275_v40, %v2433_v48 }
0x2b0b   :  { %v1813_v41 = vpop.permute.xlu1 %1812 }
0x2b0c   :  { %v1815_v52 = vsub.f32 %v4256_v13, %v1813_v41 }
0x2b0e   :  { %v1853_v36 = vadd.f32 %v1851_v18, %v1815_v52 }
0x2b10   :  { %v1854_v26 = vadd.f32 %v1853_v36, %v1543_v0 }
0x2b13   :  { %v2162_v46 = vpop.permute.xlu1 %2161 }
0x2b14   :  { %v2164_v32 = vadd.f32 %v2162_v46, %v2126_v33 }
0x2b16   :  { %v2165_v6 = vadd.f32 %v2164_v32, %v1854_v26 }
0x2b1b   :  { %v2477_v38 = vpop.permute.xlu1 %2476 }
0x2b1c   :  { %v2479_v50 = vmul.f32 %v2659_v4, %v2477_v38 }
0x2b1e   :  { %v2480_v20 = vadd.f32 %v2479_v50, %v4127_v8 }
0x2b20   :  { %v2481_v40 = vsub.f32 %v4077_v23, %v2480_v20 }
0x2b22   :  { %v2482_v9 = vmul.f32 %v2481_v40, %v2481_v40 }
0x2b24   :  { %v2483_v42 = vadd.f32 %v2482_v9, %v4036_v7 }
0x2b26   :  { %v2503_v24 = vsel %vm2489_vm2, %v2483_v42, 0.0 }
0x2b42   :  { %v2471_v62 = vpop.permute.xlu0 %2470 }
0x2b43   :  { %v2473_v44 = vadd.f32 %v2471_v62, %v2435_v47 }
0x2b45   :  { %v2474_v3 = vadd.f32 %v2473_v44, %v2165_v6 }
0x2b47   :  { %2486 = vrot.lane.b32.xlu2 %v2474_v3, %s3017_s11 }
0x2b4a   :  { %v2518_v13 = vpop.permute.xlu0 %2517 }
0x2b4b   :  { %v2520_v53 = vsel %vm2489_vm2, %v2518_v13, 0.0 }
0x2b4c   :  { %2521 = vadd.xlane.f32.xlu0 %v2520_v53 }
0x2b70   :  { %2504 = vadd.xlane.f32.xlu2 %v2503_v24 }
0x2ba1   :  { %v2487_v63 = vpop.permute.xlu2 %2486 }
0x2ba2   :  { %v2490_v49 = vsel %vm2489_vm2, %v2487_v63, 0.0 }
0x2ba3   :  { %2491 = vadd.xlane.f32.xlu1 %v2490_v49 }
0x2bbf   :  { %v2522_v37 = vpop.xlane.xlu0 %2521 }
0x2bc0   :  { %v2523_v29 = vrot.slane %v2522_v37, 4 }
0x2bc2   :  { %v2524_v51 = vadd.f32 %v2523_v29, %v2522_v37 }
0x2bc4   :  { %v2525_v35 = vrot.slane %v2524_v51, 2 }
0x2bc6   :  { %v2526_v2 = vadd.f32 %v2525_v35, %v2524_v51 }
0x2bc8   :  { %v2527_v30 = vrot.slane %v2526_v2, 1 }
0x2bca   :  { %v2528_v10 = vadd.f32 %v2527_v30, %v2526_v2 }
0x2be3   :  { %v2505_v16 = vpop.xlane.xlu2 %2504 }
0x2be4   :  { %v2506_v57 = vrot.slane %v2505_v16, 4 }
0x2be6   :  { %v2507_v19 = vadd.f32 %v2506_v57, %v2505_v16 }
0x2be8   :  { %v2508_v21 = vrot.slane %v2507_v19, 2 }
0x2bea   :  { %v2509_v23 = vadd.f32 %v2508_v21, %v2507_v19 }
0x2bec   :  { %v2510_v25 = vrot.slane %v2509_v23, 1 }
0x2bee   :  { %v2511_v15 = vadd.f32 %v2510_v25, %v2509_v23 }
0x2c16   :  { %v2492_v45 = vpop.xlane.xlu1 %2491 }
0x2c17   :  { %v2493_v8 = vrot.slane %v2492_v45, 4 }
0x2c19   :  { %v2494_v14 = vadd.f32 %v2493_v8, %v2492_v45 }
0x2c1b   :  { %v2495_v28 = vrot.slane %v2494_v14, 2 }
0x2c1d   :  { %v2496_v7 = vadd.f32 %v2495_v28, %v2494_v14 }
0x2c1f   :  { %v2497_v55 = vrot.slane %v2496_v7, 1 }
0x2c21   :  { %v2498_v60 = vadd.f32 %v2497_v55, %v2496_v7 }
0x2c23   :  { %2675 = vpush %v2498_v60 }
0x2c24   :  { %2677 = vpush %v2511_v15 }
0x2c25   :  { %2679 = vpush %v2528_v10 }
0x2c54   :  { %s2676_s1 = spop %2675 }
0x2c55   :  { %s2678_s11 = spop %2677  ;;  %v2500_v54 = vstv %s2676_s1 }
0x2c56   :  { %v2513_v43 = vstv %s2678_s11  ;;  %s2680_s30 = spop %2679  ;;  %v2501_v18 = vmul.f32 0.125, %v2500_v54 }
0x2c57   :  { %v2530_v41 = vstv %s2680_s30  ;;  %v2514_v5 = vmul.f32 6.25, %v2513_v43 }
0x2c58   :  { %v2531_v11 = vmul.f32 0.125, %v2530_v41  ;;  %v2662_v61 = vadd.f32 -4.0, %v2501_v18 }
0x2c59   :  { %v2515_v12 = vadd.f32 -11.069173, %v2514_v5 }
0x2c5a   :  { %v2532_v22 = vadd.f32 11.351508, %v2531_v11 }
0x2c5c   :  { %v2533_v1 = vmul.f32 0.5, %v2532_v22 }
0x2c5e   :  { %v2539_v56 = vsel %vm2538_vm3, %v2533_v1, 0.0 }
0x2c5f   :  { %v2540_v27 = vsel %vm2537_vm4, %v2515_v12, %v2539_v56 }
0x2c60   :  { %v2541_v17 = vsel %vm2536_vm5, %v2662_v61, %v2540_v27 }
0x2c61   :  { %2542 = vst [vmem:[#allocation2] sm:$0x1] %v2541_v17 }
0x2c62   :  { %2553 = dma.vmem_to_hbm [thread:$0]  %s2549_s3, 16, %s2551_s18, [#allocation3]  }
0x2c63   :  { %3011 = dma.done.wait [#allocation3], 16  }
0x2c64   :  { %3012 = vsyncadd [#allocation3], 4294967280 }
0x2c65   :  { %2558 = vsyncpa [#allocation3], 1 }

</bundles_post_ra>
